<compile_context>
chip_gen: v7x
topology: tpu7x:2x2x1
jax: 0.10.0
libtpu: 0.0.40
codegen_flags: <defaults>
</compile_context>

<pallas_src>
import jax
import jax.numpy as jnp
from jax import lax
from jax.experimental import pallas as pl
from jax.experimental.pallas import tpu as pltpu

_LANE = 128
_BN_EPS = 1e-5


def _round_up(x, m):
    return (x + m - 1) // m * m


# ---------------------------------------------------------------------------
# Fused kernel: (pad -> conv3x3 -> BN -> ReLU) x 2, one batch image per step
# ---------------------------------------------------------------------------
def _conv3x3_taps(pad_ref, w_ref, H, W, cout):
    """3x3 conv on a zero-padded (H+2, W+2, Cin) VMEM scratch -> (H*W, cout) f32."""
    cin = pad_ref.shape[-1]
    acc = jnp.zeros((H * W, cout), jnp.float32)
    for ky in range(3):
        for kx in range(3):
            # Static-offset halo slice; with W % 8 == 0 and C a multiple of 128
            # the reshape below is layout-preserving (no extra relayout copy).
            patch = pad_ref[pl.ds(ky, H), pl.ds(kx, W), :].reshape(H * W, cin)
            acc = acc + jnp.dot(patch, w_ref[ky, kx],
                                preferred_element_type=jnp.float32)
    return acc


def _double_conv_kernel(x_ref, w1_ref, s1_ref, b1_ref, w2_ref, s2_ref, b2_ref,
                        o_ref, pad1_ref, pad2_ref):
    # x_ref:  (1, H, W, Cip)        lane-padded NHWC input tile
    # w*_ref: (3, 3, Cin_p, Cout_p) HWIO weights
    # s*/b*:  (1, Cout_p)           folded BatchNorm scale / bias
    # o_ref:  (1, H, W, Cop)
    # pad1_ref: VMEM (H+2, W+2, Cip) ; pad2_ref: VMEM (H+2, W+2, Cop)
    _, H, W, _ = x_ref.shape
    cm = pad2_ref.shape[-1]
    co = o_ref.shape[-1]

    # ---- in-kernel zero padding for conv1 (replaces wrapper-side jnp.pad) ----
    pad1_ref[...] = jnp.zeros_like(pad1_ref)
    pad1_ref[pl.ds(1, H), pl.ds(1, W), :] = x_ref[0]

    # ---- conv1 + BN1 + ReLU; result goes straight into conv2's padded input ----
    acc1 = _conv3x3_taps(pad1_ref, w1_ref, H, W, cm)
    y = jnp.maximum(acc1 * s1_ref[...] + b1_ref[...], 0.0)

    pad2_ref[...] = jnp.zeros_like(pad2_ref)
    pad2_ref[pl.ds(1, H), pl.ds(1, W), :] = y.reshape(H, W, cm).astype(pad2_ref.dtype)

    # ---- conv2 + BN2 + ReLU ----
    acc2 = _conv3x3_taps(pad2_ref, w2_ref, H, W, co)
    z = jnp.maximum(acc2 * s2_ref[...] + b2_ref[...], 0.0)
    o_ref[0] = z.reshape(H, W, co).astype(o_ref.dtype)


# ---------------------------------------------------------------------------
# Parameter setup, BN folding, forward wrappers
# ---------------------------------------------------------------------------
def _fold_bn(gamma, beta, mean, var, conv_bias):
    scale = gamma / jnp.sqrt(var + _BN_EPS)
    bias = beta + scale * (conv_bias - mean)
    return scale, bias


def _pad_last(a, target):
    pad = target - a.shape[-1]
    if pad == 0:
        return a
    widths = [(0, 0)] * (a.ndim - 1) + [(0, pad)]
    return jnp.pad(a, widths)


def init_double_conv_params(key, in_channels, out_channels):
    ks = jax.random.split(key, 8)
    p = {}
    # conv weights generated directly in HWIO layout (equiv. to OIHW transposed)
    p["w1"] = 0.1 * jax.random.normal(ks[0], (3, 3, in_channels, out_channels), jnp.float32)
    p["b1"] = 0.1 * jax.random.normal(ks[1], (out_channels,), jnp.float32)
    p["bn1_gamma"] = 1.0 + 0.1 * jax.random.normal(ks[2], (out_channels,), jnp.float32)
    p["bn1_beta"] = 0.1 * jax.random.normal(ks[3], (out_channels,), jnp.float32)
    p["bn1_mean"] = 0.05 * jax.random.normal(ks[6], (out_channels,), jnp.float32)
    p["bn1_var"] = jnp.ones((out_channels,), jnp.float32) * 0.9

    p["w2"] = 0.1 * jax.random.normal(ks[4], (3, 3, out_channels, out_channels), jnp.float32)
    p["b2"] = 0.1 * jax.random.normal(ks[5], (out_channels,), jnp.float32)
    p["bn2_gamma"] = 1.0 + 0.1 * jax.random.normal(ks[7], (out_channels,), jnp.float32)
    p["bn2_beta"] = jnp.zeros((out_channels,), jnp.float32)
    p["bn2_mean"] = jnp.zeros((out_channels,), jnp.float32)
    p["bn2_var"] = jnp.ones((out_channels,), jnp.float32)
    return p


# TODO(synk): BatchNorm is evaluated in inference mode (running stats folded into
# a per-channel affine); training-mode batch statistics are not computed here.
def double_conv_forward(x_nchw, p):
    x = jnp.transpose(x_nchw, (0, 2, 3, 1)).astype(jnp.float32)  # NCHW -> NHWC
    B, H, W, Cin = x.shape
    Cout = p["w1"].shape[-1]
    assert H % 8 == 0 and W % 8 == 0, "toy wrapper assumes sublane-aligned H, W"

    # Lane-dense channel packing (biggest measured store-path lever): pad
    # Cin/Cout up to the 128-lane width once in the wrapper, slice off at end.
    Cip = _round_up(Cin, _LANE)
    Cop = _round_up(Cout, _LANE)

    xp = _pad_last(x, Cip)
    w1 = _pad_last(jnp.pad(p["w1"], ((0, 0), (0, 0), (0, Cip - Cin), (0, 0))), Cop)
    w2 = _pad_last(jnp.pad(p["w2"], ((0, 0), (0, 0), (0, Cop - Cout), (0, 0))), Cop)

    s1, c1 = _fold_bn(p["bn1_gamma"], p["bn1_beta"], p["bn1_mean"], p["bn1_var"], p["b1"])
    s2, c2 = _fold_bn(p["bn2_gamma"], p["bn2_beta"], p["bn2_mean"], p["bn2_var"], p["b2"])
    s1 = _pad_last(s1, Cop).reshape(1, Cop).astype(jnp.float32)
    c1 = _pad_last(c1, Cop).reshape(1, Cop).astype(jnp.float32)
    s2 = _pad_last(s2, Cop).reshape(1, Cop).astype(jnp.float32)
    c2 = _pad_last(c2, Cop).reshape(1, Cop).astype(jnp.float32)

    out = pl.pallas_call(
        _double_conv_kernel,
        out_shape=jax.ShapeDtypeStruct((B, H, W, Cop), jnp.float32),
        grid=(B,),
        in_specs=[
            pl.BlockSpec((1, H, W, Cip), lambda b: (b, 0, 0, 0)),
            pl.BlockSpec((3, 3, Cip, Cop), lambda b: (0, 0, 0, 0)),
            pl.BlockSpec((1, Cop), lambda b: (0, 0)),
            pl.BlockSpec((1, Cop), lambda b: (0, 0)),
            pl.BlockSpec((3, 3, Cop, Cop), lambda b: (0, 0, 0, 0)),
            pl.BlockSpec((1, Cop), lambda b: (0, 0)),
            pl.BlockSpec((1, Cop), lambda b: (0, 0)),
        ],
        out_specs=pl.BlockSpec((1, H, W, Cop), lambda b: (b, 0, 0, 0)),
        scratch_shapes=[
            pltpu.VMEM((H + 2, W + 2, Cip), jnp.float32),   # padded conv1 input
            pltpu.VMEM((H + 2, W + 2, Cop), jnp.float32),   # padded conv2 input (ReLU1 out)
        ],
        compiler_params=pltpu.CompilerParams(
            dimension_semantics=("parallel",)),
    )(xp, w1, s1, c1, w2, s2, c2)

    out = out[..., :Cout]                       # drop lane padding
    return jnp.transpose(out, (0, 3, 1, 2))     # NHWC -> NCHW


def double_conv_reference(x_nchw, p):
    """Pure-JAX reference (lax conv) for correctness check."""
    x = jnp.transpose(x_nchw, (0, 2, 3, 1))

    def block(x, w, gamma, beta, mean, var, b):
        y = lax.conv_general_dilated(
            x, w, (1, 1), "SAME",
            dimension_numbers=("NHWC", "HWIO", "NHWC")) + b
        y = (y - mean) / jnp.sqrt(var + _BN_EPS) * gamma + beta
        return jnp.maximum(y, 0.0)

    x = block(x, p["w1"], p["bn1_gamma"], p["bn1_beta"], p["bn1_mean"], p["bn1_var"], p["b1"])
    x = block(x, p["w2"], p["bn2_gamma"], p["bn2_beta"], p["bn2_mean"], p["bn2_var"], p["b2"])
    return jnp.transpose(x, (0, 3, 1, 2))


if __name__ == "__main__":
    key = jax.random.PRNGKey(0)
    k_x, k_p = jax.random.split(key)

    B, Cin, H, W = 2, 4, 16, 16
    Cout = 8
    x = jax.random.normal(k_x, (B, Cin, H, W), jnp.float32)
    params = init_double_conv_params(k_p, Cin, Cout)

    out = jax.block_until_ready(double_conv_forward(x, params))
    ref = jax.block_until_ready(double_conv_reference(x, params))

    assert out.shape == (B, Cout, H, W), out.shape
    assert jnp.allclose(out, ref, rtol=1e-4, atol=1e-4), "mismatch vs JAX reference"

    print("KERNEL_OK")
</pallas_src>

<mosaic_0001>
module attributes {stable_mosaic.version = 11 : i64} {
  func.func @_double_conv_kernel(%arg0: i32, %arg1: memref<1x16x16x128xf32, #tpu.memory_space<vmem>>, %arg2: memref<3x3x128x128xf32, #tpu.memory_space<vmem>>, %arg3: memref<1x128xf32, #tpu.memory_space<vmem>>, %arg4: memref<1x128xf32, #tpu.memory_space<vmem>>, %arg5: memref<3x3x128x128xf32, #tpu.memory_space<vmem>>, %arg6: memref<1x128xf32, #tpu.memory_space<vmem>>, %arg7: memref<1x128xf32, #tpu.memory_space<vmem>>, %arg8: memref<1x16x16x128xf32, #tpu.memory_space<vmem>>, %arg9: memref<18x18x128xf32, #tpu.memory_space<vmem>>, %arg10: memref<18x18x128xf32, #tpu.memory_space<vmem>>) attributes {dimension_semantics = [#tpu.dimension_semantics<parallel>], iteration_bounds = array<i64: 2>, scalar_prefetch = 0 : i64, scratch_operands = 2 : i64, tpu.core_type = #tpu.core_type<tc>, window_params = [{transform_indices = @transform_0, window_bounds = array<i64: 1, 16, 16, 128>}, {pipeline_mode = #tpu.pipeline_mode<synchronous>, transform_indices = @transform_1, window_bounds = array<i64: 3, 3, 128, 128>}, {pipeline_mode = #tpu.pipeline_mode<synchronous>, transform_indices = @transform_2, window_bounds = array<i64: 1, 128>}, {pipeline_mode = #tpu.pipeline_mode<synchronous>, transform_indices = @transform_3, window_bounds = array<i64: 1, 128>}, {pipeline_mode = #tpu.pipeline_mode<synchronous>, transform_indices = @transform_4, window_bounds = array<i64: 3, 3, 128, 128>}, {pipeline_mode = #tpu.pipeline_mode<synchronous>, transform_indices = @transform_5, window_bounds = array<i64: 1, 128>}, {pipeline_mode = #tpu.pipeline_mode<synchronous>, transform_indices = @transform_6, window_bounds = array<i64: 1, 128>}, {transform_indices = @transform_7, window_bounds = array<i64: 1, 16, 16, 128>}]} {
    %cst = arith.constant 0.000000e+00 : f32
    %0 = vector.broadcast %cst : f32 to vector<18x18x128xf32>
    %c0 = arith.constant 0 : index
    %c0_0 = arith.constant 0 : index
    %c0_1 = arith.constant 0 : index
    %1 = vector.load %arg9[%c0, %c0_0, %c0_1] : memref<18x18x128xf32, #tpu.memory_space<vmem>>, vector<18x18x128xf32>
    tpu.vector_store %arg9[%c0, %c0_0, %c0_1], %0 {strides = array<i32>} : memref<18x18x128xf32, #tpu.memory_space<vmem>>, vector<18x18x128xf32>,
    %c0_2 = arith.constant 0 : index
    %c0_3 = arith.constant 0 : index
    %c0_4 = arith.constant 0 : index
    %c0_5 = arith.constant 0 : index
    %2 = vector.load %arg1[%c0_2, %c0_3, %c0_4, %c0_5] : memref<1x16x16x128xf32, #tpu.memory_space<vmem>>, vector<1x16x16x128xf32>
    %3 = vector.shape_cast %2 : vector<1x16x16x128xf32> to vector<16x16x128xf32>
    %c1 = arith.constant 1 : index
    %c1_6 = arith.constant 1 : index
    %c0_7 = arith.constant 0 : index
    %4 = vector.load %arg9[%c1, %c1_6, %c0_7] : memref<18x18x128xf32, #tpu.memory_space<vmem>>, vector<16x16x128xf32>
    tpu.vector_store %arg9[%c1, %c1_6, %c0_7], %3 {strides = array<i32>} : memref<18x18x128xf32, #tpu.memory_space<vmem>>, vector<16x16x128xf32>,
    %cst_8 = arith.constant 0.000000e+00 : f32
    %5 = vector.broadcast %cst_8 : f32 to vector<256x128xf32>
    %c0_9 = arith.constant 0 : index
    %c0_10 = arith.constant 0 : index
    %c0_11 = arith.constant 0 : index
    %6 = vector.load %arg9[%c0_9, %c0_10, %c0_11] : memref<18x18x128xf32, #tpu.memory_space<vmem>>, vector<16x16x128xf32>
    %7 = vector.shape_cast %6 : vector<16x16x128xf32> to vector<256x128xf32>
    %c0_12 = arith.constant 0 : index
    %c0_13 = arith.constant 0 : index
    %c0_14 = arith.constant 0 : index
    %c0_15 = arith.constant 0 : index
    %8 = vector.load %arg2[%c0_12, %c0_13, %c0_14, %c0_15] : memref<3x3x128x128xf32, #tpu.memory_space<vmem>>, vector<1x1x128x128xf32>
    %9 = vector.shape_cast %8 : vector<1x1x128x128xf32> to vector<128x128xf32>
    %cst_16 = arith.constant dense<0.000000e+00> : vector<256x128xf32>
    %10 = tpu.matmul %7, %9, %cst_16 {dimension_numbers = #tpu.dot_dimension_numbers<[1], [0], [0], [1], [0, 0, 1, 1], [], []>} : vector<256x128xf32>, vector<128x128xf32>, vector<256x128xf32> -> vector<256x128xf32>
    %11 = arith.addf %5, %10 : vector<256x128xf32>
    %c0_17 = arith.constant 0 : index
    %c1_18 = arith.constant 1 : index
    %c0_19 = arith.constant 0 : index
    %12 = vector.load %arg9[%c0_17, %c1_18, %c0_19] : memref<18x18x128xf32, #tpu.memory_space<vmem>>, vector<16x16x128xf32>
    %13 = vector.shape_cast %12 : vector<16x16x128xf32> to vector<256x128xf32>
    %c0_20 = arith.constant 0 : index
    %c1_21 = arith.constant 1 : index
    %c0_22 = arith.constant 0 : index
    %c0_23 = arith.constant 0 : index
    %14 = vector.load %arg2[%c0_20, %c1_21, %c0_22, %c0_23] : memref<3x3x128x128xf32, #tpu.memory_space<vmem>>, vector<1x1x128x128xf32>
    %15 = vector.shape_cast %14 : vector<1x1x128x128xf32> to vector<128x128xf32>
    %cst_24 = arith.constant dense<0.000000e+00> : vector<256x128xf32>
    %16 = tpu.matmul %13, %15, %cst_24 {dimension_numbers = #tpu.dot_dimension_numbers<[1], [0], [0], [1], [0, 0, 1, 1], [], []>} : vector<256x128xf32>, vector<128x128xf32>, vector<256x128xf32> -> vector<256x128xf32>
    %17 = arith.addf %11, %16 : vector<256x128xf32>
    %c0_25 = arith.constant 0 : index
    %c2 = arith.constant 2 : index
    %c0_26 = arith.constant 0 : index
    %18 = vector.load %arg9[%c0_25, %c2, %c0_26] : memref<18x18x128xf32, #tpu.memory_space<vmem>>, vector<16x16x128xf32>
    %19 = vector.shape_cast %18 : vector<16x16x128xf32> to vector<256x128xf32>
    %c0_27 = arith.constant 0 : index
    %c2_28 = arith.constant 2 : index
    %c0_29 = arith.constant 0 : index
    %c0_30 = arith.constant 0 : index
    %20 = vector.load %arg2[%c0_27, %c2_28, %c0_29, %c0_30] : memref<3x3x128x128xf32, #tpu.memory_space<vmem>>, vector<1x1x128x128xf32>
    %21 = vector.shape_cast %20 : vector<1x1x128x128xf32> to vector<128x128xf32>
    %cst_31 = arith.constant dense<0.000000e+00> : vector<256x128xf32>
    %22 = tpu.matmul %19, %21, %cst_31 {dimension_numbers = #tpu.dot_dimension_numbers<[1], [0], [0], [1], [0, 0, 1, 1], [], []>} : vector<256x128xf32>, vector<128x128xf32>, vector<256x128xf32> -> vector<256x128xf32>
    %23 = arith.addf %17, %22 : vector<256x128xf32>
    %c1_32 = arith.constant 1 : index
    %c0_33 = arith.constant 0 : index
    %c0_34 = arith.constant 0 : index
    %24 = vector.load %arg9[%c1_32, %c0_33, %c0_34] : memref<18x18x128xf32, #tpu.memory_space<vmem>>, vector<16x16x128xf32>
    %25 = vector.shape_cast %24 : vector<16x16x128xf32> to vector<256x128xf32>
    %c1_35 = arith.constant 1 : index
    %c0_36 = arith.constant 0 : index
    %c0_37 = arith.constant 0 : index
    %c0_38 = arith.constant 0 : index
    %26 = vector.load %arg2[%c1_35, %c0_36, %c0_37, %c0_38] : memref<3x3x128x128xf32, #tpu.memory_space<vmem>>, vector<1x1x128x128xf32>
    %27 = vector.shape_cast %26 : vector<1x1x128x128xf32> to vector<128x128xf32>
    %cst_39 = arith.constant dense<0.000000e+00> : vector<256x128xf32>
    %28 = tpu.matmul %25, %27, %cst_39 {dimension_numbers = #tpu.dot_dimension_numbers<[1], [0], [0], [1], [0, 0, 1, 1], [], []>} : vector<256x128xf32>, vector<128x128xf32>, vector<256x128xf32> -> vector<256x128xf32>
    %29 = arith.addf %23, %28 : vector<256x128xf32>
    %c1_40 = arith.constant 1 : index
    %c1_41 = arith.constant 1 : index
    %c0_42 = arith.constant 0 : index
    %30 = vector.load %arg9[%c1_40, %c1_41, %c0_42] : memref<18x18x128xf32, #tpu.memory_space<vmem>>, vector<16x16x128xf32>
    %31 = vector.shape_cast %30 : vector<16x16x128xf32> to vector<256x128xf32>
    %c1_43 = arith.constant 1 : index
    %c1_44 = arith.constant 1 : index
    %c0_45 = arith.constant 0 : index
    %c0_46 = arith.constant 0 : index
    %32 = vector.load %arg2[%c1_43, %c1_44, %c0_45, %c0_46] : memref<3x3x128x128xf32, #tpu.memory_space<vmem>>, vector<1x1x128x128xf32>
    %33 = vector.shape_cast %32 : vector<1x1x128x128xf32> to vector<128x128xf32>
    %cst_47 = arith.constant dense<0.000000e+00> : vector<256x128xf32>
    %34 = tpu.matmul %31, %33, %cst_47 {dimension_numbers = #tpu.dot_dimension_numbers<[1], [0], [0], [1], [0, 0, 1, 1], [], []>} : vector<256x128xf32>, vector<128x128xf32>, vector<256x128xf32> -> vector<256x128xf32>
    %35 = arith.addf %29, %34 : vector<256x128xf32>
    %c1_48 = arith.constant 1 : index
    %c2_49 = arith.constant 2 : index
    %c0_50 = arith.constant 0 : index
    %36 = vector.load %arg9[%c1_48, %c2_49, %c0_50] : memref<18x18x128xf32, #tpu.memory_space<vmem>>, vector<16x16x128xf32>
    %37 = vector.shape_cast %36 : vector<16x16x128xf32> to vector<256x128xf32>
    %c1_51 = arith.constant 1 : index
    %c2_52 = arith.constant 2 : index
    %c0_53 = arith.constant 0 : index
    %c0_54 = arith.constant 0 : index
    %38 = vector.load %arg2[%c1_51, %c2_52, %c0_53, %c0_54] : memref<3x3x128x128xf32, #tpu.memory_space<vmem>>, vector<1x1x128x128xf32>
    %39 = vector.shape_cast %38 : vector<1x1x128x128xf32> to vector<128x128xf32>
    %cst_55 = arith.constant dense<0.000000e+00> : vector<256x128xf32>
    %40 = tpu.matmul %37, %39, %cst_55 {dimension_numbers = #tpu.dot_dimension_numbers<[1], [0], [0], [1], [0, 0, 1, 1], [], []>} : vector<256x128xf32>, vector<128x128xf32>, vector<256x128xf32> -> vector<256x128xf32>
    %41 = arith.addf %35, %40 : vector<256x128xf32>
    %c2_56 = arith.constant 2 : index
    %c0_57 = arith.constant 0 : index
    %c0_58 = arith.constant 0 : index
    %42 = vector.load %arg9[%c2_56, %c0_57, %c0_58] : memref<18x18x128xf32, #tpu.memory_space<vmem>>, vector<16x16x128xf32>
    %43 = vector.shape_cast %42 : vector<16x16x128xf32> to vector<256x128xf32>
    %c2_59 = arith.constant 2 : index
    %c0_60 = arith.constant 0 : index
    %c0_61 = arith.constant 0 : index
    %c0_62 = arith.constant 0 : index
    %44 = vector.load %arg2[%c2_59, %c0_60, %c0_61, %c0_62] : memref<3x3x128x128xf32, #tpu.memory_space<vmem>>, vector<1x1x128x128xf32>
    %45 = vector.shape_cast %44 : vector<1x1x128x128xf32> to vector<128x128xf32>
    %cst_63 = arith.constant dense<0.000000e+00> : vector<256x128xf32>
    %46 = tpu.matmul %43, %45, %cst_63 {dimension_numbers = #tpu.dot_dimension_numbers<[1], [0], [0], [1], [0, 0, 1, 1], [], []>} : vector<256x128xf32>, vector<128x128xf32>, vector<256x128xf32> -> vector<256x128xf32>
    %47 = arith.addf %41, %46 : vector<256x128xf32>
    %c2_64 = arith.constant 2 : index
    %c1_65 = arith.constant 1 : index
    %c0_66 = arith.constant 0 : index
    %48 = vector.load %arg9[%c2_64, %c1_65, %c0_66] : memref<18x18x128xf32, #tpu.memory_space<vmem>>, vector<16x16x128xf32>
    %49 = vector.shape_cast %48 : vector<16x16x128xf32> to vector<256x128xf32>
    %c2_67 = arith.constant 2 : index
    %c1_68 = arith.constant 1 : index
    %c0_69 = arith.constant 0 : index
    %c0_70 = arith.constant 0 : index
    %50 = vector.load %arg2[%c2_67, %c1_68, %c0_69, %c0_70] : memref<3x3x128x128xf32, #tpu.memory_space<vmem>>, vector<1x1x128x128xf32>
    %51 = vector.shape_cast %50 : vector<1x1x128x128xf32> to vector<128x128xf32>
    %cst_71 = arith.constant dense<0.000000e+00> : vector<256x128xf32>
    %52 = tpu.matmul %49, %51, %cst_71 {dimension_numbers = #tpu.dot_dimension_numbers<[1], [0], [0], [1], [0, 0, 1, 1], [], []>} : vector<256x128xf32>, vector<128x128xf32>, vector<256x128xf32> -> vector<256x128xf32>
    %53 = arith.addf %47, %52 : vector<256x128xf32>
    %c2_72 = arith.constant 2 : index
    %c2_73 = arith.constant 2 : index
    %c0_74 = arith.constant 0 : index
    %54 = vector.load %arg9[%c2_72, %c2_73, %c0_74] : memref<18x18x128xf32, #tpu.memory_space<vmem>>, vector<16x16x128xf32>
    %55 = vector.shape_cast %54 : vector<16x16x128xf32> to vector<256x128xf32>
    %c2_75 = arith.constant 2 : index
    %c2_76 = arith.constant 2 : index
    %c0_77 = arith.constant 0 : index
    %c0_78 = arith.constant 0 : index
    %56 = vector.load %arg2[%c2_75, %c2_76, %c0_77, %c0_78] : memref<3x3x128x128xf32, #tpu.memory_space<vmem>>, vector<1x1x128x128xf32>
    %57 = vector.shape_cast %56 : vector<1x1x128x128xf32> to vector<128x128xf32>
    %cst_79 = arith.constant dense<0.000000e+00> : vector<256x128xf32>
    %58 = tpu.matmul %55, %57, %cst_79 {dimension_numbers = #tpu.dot_dimension_numbers<[1], [0], [0], [1], [0, 0, 1, 1], [], []>} : vector<256x128xf32>, vector<128x128xf32>, vector<256x128xf32> -> vector<256x128xf32>
    %59 = arith.addf %53, %58 : vector<256x128xf32>
    %c0_80 = arith.constant 0 : index
    %c0_81 = arith.constant 0 : index
    %60 = vector.load %arg3[%c0_80, %c0_81] : memref<1x128xf32, #tpu.memory_space<vmem>>, vector<1x128xf32>
    %61 = vector.broadcast %60 : vector<1x128xf32> to vector<256x128xf32>
    %62 = arith.mulf %59, %61 : vector<256x128xf32>
    %c0_82 = arith.constant 0 : index
    %c0_83 = arith.constant 0 : index
    %63 = vector.load %arg4[%c0_82, %c0_83] : memref<1x128xf32, #tpu.memory_space<vmem>>, vector<1x128xf32>
    %64 = vector.broadcast %63 : vector<1x128xf32> to vector<256x128xf32>
    %65 = arith.addf %62, %64 : vector<256x128xf32>
    %cst_84 = arith.constant 0.000000e+00 : f32
    %66 = vector.broadcast %cst_84 : f32 to vector<256x128xf32>
    %67 = arith.maximumf %65, %66 : vector<256x128xf32>
    %cst_85 = arith.constant 0.000000e+00 : f32
    %68 = vector.broadcast %cst_85 : f32 to vector<18x18x128xf32>
    %c0_86 = arith.constant 0 : index
    %c0_87 = arith.constant 0 : index
    %c0_88 = arith.constant 0 : index
    %69 = vector.load %arg10[%c0_86, %c0_87, %c0_88] : memref<18x18x128xf32, #tpu.memory_space<vmem>>, vector<18x18x128xf32>
    tpu.vector_store %arg10[%c0_86, %c0_87, %c0_88], %68 {strides = array<i32>} : memref<18x18x128xf32, #tpu.memory_space<vmem>>, vector<18x18x128xf32>,
    %70 = vector.shape_cast %67 : vector<256x128xf32> to vector<16x16x128xf32>
    %c1_89 = arith.constant 1 : index
    %c1_90 = arith.constant 1 : index
    %c0_91 = arith.constant 0 : index
    %71 = vector.load %arg10[%c1_89, %c1_90, %c0_91] : memref<18x18x128xf32, #tpu.memory_space<vmem>>, vector<16x16x128xf32>
    tpu.vector_store %arg10[%c1_89, %c1_90, %c0_91], %70 {strides = array<i32>} : memref<18x18x128xf32, #tpu.memory_space<vmem>>, vector<16x16x128xf32>,
    %cst_92 = arith.constant 0.000000e+00 : f32
    %72 = vector.broadcast %cst_92 : f32 to vector<256x128xf32>
    %c0_93 = arith.constant 0 : index
    %c0_94 = arith.constant 0 : index
    %c0_95 = arith.constant 0 : index
    %73 = vector.load %arg10[%c0_93, %c0_94, %c0_95] : memref<18x18x128xf32, #tpu.memory_space<vmem>>, vector<16x16x128xf32>
    %74 = vector.shape_cast %73 : vector<16x16x128xf32> to vector<256x128xf32>
    %c0_96 = arith.constant 0 : index
    %c0_97 = arith.constant 0 : index
    %c0_98 = arith.constant 0 : index
    %c0_99 = arith.constant 0 : index
    %75 = vector.load %arg5[%c0_96, %c0_97, %c0_98, %c0_99] : memref<3x3x128x128xf32, #tpu.memory_space<vmem>>, vector<1x1x128x128xf32>
    %76 = vector.shape_cast %75 : vector<1x1x128x128xf32> to vector<128x128xf32>
    %cst_100 = arith.constant dense<0.000000e+00> : vector<256x128xf32>
    %77 = tpu.matmul %74, %76, %cst_100 {dimension_numbers = #tpu.dot_dimension_numbers<[1], [0], [0], [1], [0, 0, 1, 1], [], []>} : vector<256x128xf32>, vector<128x128xf32>, vector<256x128xf32> -> vector<256x128xf32>
    %78 = arith.addf %72, %77 : vector<256x128xf32>
    %c0_101 = arith.constant 0 : index
    %c1_102 = arith.constant 1 : index
    %c0_103 = arith.constant 0 : index
    %79 = vector.load %arg10[%c0_101, %c1_102, %c0_103] : memref<18x18x128xf32, #tpu.memory_space<vmem>>, vector<16x16x128xf32>
    %80 = vector.shape_cast %79 : vector<16x16x128xf32> to vector<256x128xf32>
    %c0_104 = arith.constant 0 : index
    %c1_105 = arith.constant 1 : index
    %c0_106 = arith.constant 0 : index
    %c0_107 = arith.constant 0 : index
    %81 = vector.load %arg5[%c0_104, %c1_105, %c0_106, %c0_107] : memref<3x3x128x128xf32, #tpu.memory_space<vmem>>, vector<1x1x128x128xf32>
    %82 = vector.shape_cast %81 : vector<1x1x128x128xf32> to vector<128x128xf32>
    %cst_108 = arith.constant dense<0.000000e+00> : vector<256x128xf32>
    %83 = tpu.matmul %80, %82, %cst_108 {dimension_numbers = #tpu.dot_dimension_numbers<[1], [0], [0], [1], [0, 0, 1, 1], [], []>} : vector<256x128xf32>, vector<128x128xf32>, vector<256x128xf32> -> vector<256x128xf32>
    %84 = arith.addf %78, %83 : vector<256x128xf32>
    %c0_109 = arith.constant 0 : index
    %c2_110 = arith.constant 2 : index
    %c0_111 = arith.constant 0 : index
    %85 = vector.load %arg10[%c0_109, %c2_110, %c0_111] : memref<18x18x128xf32, #tpu.memory_space<vmem>>, vector<16x16x128xf32>
    %86 = vector.shape_cast %85 : vector<16x16x128xf32> to vector<256x128xf32>
    %c0_112 = arith.constant 0 : index
    %c2_113 = arith.constant 2 : index
    %c0_114 = arith.constant 0 : index
    %c0_115 = arith.constant 0 : index
    %87 = vector.load %arg5[%c0_112, %c2_113, %c0_114, %c0_115] : memref<3x3x128x128xf32, #tpu.memory_space<vmem>>, vector<1x1x128x128xf32>
    %88 = vector.shape_cast %87 : vector<1x1x128x128xf32> to vector<128x128xf32>
    %cst_116 = arith.constant dense<0.000000e+00> : vector<256x128xf32>
    %89 = tpu.matmul %86, %88, %cst_116 {dimension_numbers = #tpu.dot_dimension_numbers<[1], [0], [0], [1], [0, 0, 1, 1], [], []>} : vector<256x128xf32>, vector<128x128xf32>, vector<256x128xf32> -> vector<256x128xf32>
    %90 = arith.addf %84, %89 : vector<256x128xf32>
    %c1_117 = arith.constant 1 : index
    %c0_118 = arith.constant 0 : index
    %c0_119 = arith.constant 0 : index
    %91 = vector.load %arg10[%c1_117, %c0_118, %c0_119] : memref<18x18x128xf32, #tpu.memory_space<vmem>>, vector<16x16x128xf32>
    %92 = vector.shape_cast %91 : vector<16x16x128xf32> to vector<256x128xf32>
    %c1_120 = arith.constant 1 : index
    %c0_121 = arith.constant 0 : index
    %c0_122 = arith.constant 0 : index
    %c0_123 = arith.constant 0 : index
    %93 = vector.load %arg5[%c1_120, %c0_121, %c0_122, %c0_123] : memref<3x3x128x128xf32, #tpu.memory_space<vmem>>, vector<1x1x128x128xf32>
    %94 = vector.shape_cast %93 : vector<1x1x128x128xf32> to vector<128x128xf32>
    %cst_124 = arith.constant dense<0.000000e+00> : vector<256x128xf32>
    %95 = tpu.matmul %92, %94, %cst_124 {dimension_numbers = #tpu.dot_dimension_numbers<[1], [0], [0], [1], [0, 0, 1, 1], [], []>} : vector<256x128xf32>, vector<128x128xf32>, vector<256x128xf32> -> vector<256x128xf32>
    %96 = arith.addf %90, %95 : vector<256x128xf32>
    %c1_125 = arith.constant 1 : index
    %c1_126 = arith.constant 1 : index
    %c0_127 = arith.constant 0 : index
    %97 = vector.load %arg10[%c1_125, %c1_126, %c0_127] : memref<18x18x128xf32, #tpu.memory_space<vmem>>, vector<16x16x128xf32>
    %98 = vector.shape_cast %97 : vector<16x16x128xf32> to vector<256x128xf32>
    %c1_128 = arith.constant 1 : index
    %c1_129 = arith.constant 1 : index
    %c0_130 = arith.constant 0 : index
    %c0_131 = arith.constant 0 : index
    %99 = vector.load %arg5[%c1_128, %c1_129, %c0_130, %c0_131] : memref<3x3x128x128xf32, #tpu.memory_space<vmem>>, vector<1x1x128x128xf32>
    %100 = vector.shape_cast %99 : vector<1x1x128x128xf32> to vector<128x128xf32>
    %cst_132 = arith.constant dense<0.000000e+00> : vector<256x128xf32>
    %101 = tpu.matmul %98, %100, %cst_132 {dimension_numbers = #tpu.dot_dimension_numbers<[1], [0], [0], [1], [0, 0, 1, 1], [], []>} : vector<256x128xf32>, vector<128x128xf32>, vector<256x128xf32> -> vector<256x128xf32>
    %102 = arith.addf %96, %101 : vector<256x128xf32>
    %c1_133 = arith.constant 1 : index
    %c2_134 = arith.constant 2 : index
    %c0_135 = arith.constant 0 : index
    %103 = vector.load %arg10[%c1_133, %c2_134, %c0_135] : memref<18x18x128xf32, #tpu.memory_space<vmem>>, vector<16x16x128xf32>
    %104 = vector.shape_cast %103 : vector<16x16x128xf32> to vector<256x128xf32>
    %c1_136 = arith.constant 1 : index
    %c2_137 = arith.constant 2 : index
    %c0_138 = arith.constant 0 : index
    %c0_139 = arith.constant 0 : index
    %105 = vector.load %arg5[%c1_136, %c2_137, %c0_138, %c0_139] : memref<3x3x128x128xf32, #tpu.memory_space<vmem>>, vector<1x1x128x128xf32>
    %106 = vector.shape_cast %105 : vector<1x1x128x128xf32> to vector<128x128xf32>
    %cst_140 = arith.constant dense<0.000000e+00> : vector<256x128xf32>
    %107 = tpu.matmul %104, %106, %cst_140 {dimension_numbers = #tpu.dot_dimension_numbers<[1], [0], [0], [1], [0, 0, 1, 1], [], []>} : vector<256x128xf32>, vector<128x128xf32>, vector<256x128xf32> -> vector<256x128xf32>
    %108 = arith.addf %102, %107 : vector<256x128xf32>
    %c2_141 = arith.constant 2 : index
    %c0_142 = arith.constant 0 : index
    %c0_143 = arith.constant 0 : index
    %109 = vector.load %arg10[%c2_141, %c0_142, %c0_143] : memref<18x18x128xf32, #tpu.memory_space<vmem>>, vector<16x16x128xf32>
    %110 = vector.shape_cast %109 : vector<16x16x128xf32> to vector<256x128xf32>
    %c2_144 = arith.constant 2 : index
    %c0_145 = arith.constant 0 : index
    %c0_146 = arith.constant 0 : index
    %c0_147 = arith.constant 0 : index
    %111 = vector.load %arg5[%c2_144, %c0_145, %c0_146, %c0_147] : memref<3x3x128x128xf32, #tpu.memory_space<vmem>>, vector<1x1x128x128xf32>
    %112 = vector.shape_cast %111 : vector<1x1x128x128xf32> to vector<128x128xf32>
    %cst_148 = arith.constant dense<0.000000e+00> : vector<256x128xf32>
    %113 = tpu.matmul %110, %112, %cst_148 {dimension_numbers = #tpu.dot_dimension_numbers<[1], [0], [0], [1], [0, 0, 1, 1], [], []>} : vector<256x128xf32>, vector<128x128xf32>, vector<256x128xf32> -> vector<256x128xf32>
    %114 = arith.addf %108, %113 : vector<256x128xf32>
    %c2_149 = arith.constant 2 : index
    %c1_150 = arith.constant 1 : index
    %c0_151 = arith.constant 0 : index
    %115 = vector.load %arg10[%c2_149, %c1_150, %c0_151] : memref<18x18x128xf32, #tpu.memory_space<vmem>>, vector<16x16x128xf32>
    %116 = vector.shape_cast %115 : vector<16x16x128xf32> to vector<256x128xf32>
    %c2_152 = arith.constant 2 : index
    %c1_153 = arith.constant 1 : index
    %c0_154 = arith.constant 0 : index
    %c0_155 = arith.constant 0 : index
    %117 = vector.load %arg5[%c2_152, %c1_153, %c0_154, %c0_155] : memref<3x3x128x128xf32, #tpu.memory_space<vmem>>, vector<1x1x128x128xf32>
    %118 = vector.shape_cast %117 : vector<1x1x128x128xf32> to vector<128x128xf32>
    %cst_156 = arith.constant dense<0.000000e+00> : vector<256x128xf32>
    %119 = tpu.matmul %116, %118, %cst_156 {dimension_numbers = #tpu.dot_dimension_numbers<[1], [0], [0], [1], [0, 0, 1, 1], [], []>} : vector<256x128xf32>, vector<128x128xf32>, vector<256x128xf32> -> vector<256x128xf32>
    %120 = arith.addf %114, %119 : vector<256x128xf32>
    %c2_157 = arith.constant 2 : index
    %c2_158 = arith.constant 2 : index
    %c0_159 = arith.constant 0 : index
    %121 = vector.load %arg10[%c2_157, %c2_158, %c0_159] : memref<18x18x128xf32, #tpu.memory_space<vmem>>, vector<16x16x128xf32>
    %122 = vector.shape_cast %121 : vector<16x16x128xf32> to vector<256x128xf32>
    %c2_160 = arith.constant 2 : index
    %c2_161 = arith.constant 2 : index
    %c0_162 = arith.constant 0 : index
    %c0_163 = arith.constant 0 : index
    %123 = vector.load %arg5[%c2_160, %c2_161, %c0_162, %c0_163] : memref<3x3x128x128xf32, #tpu.memory_space<vmem>>, vector<1x1x128x128xf32>
    %124 = vector.shape_cast %123 : vector<1x1x128x128xf32> to vector<128x128xf32>
    %cst_164 = arith.constant dense<0.000000e+00> : vector<256x128xf32>
    %125 = tpu.matmul %122, %124, %cst_164 {dimension_numbers = #tpu.dot_dimension_numbers<[1], [0], [0], [1], [0, 0, 1, 1], [], []>} : vector<256x128xf32>, vector<128x128xf32>, vector<256x128xf32> -> vector<256x128xf32>
    %126 = arith.addf %120, %125 : vector<256x128xf32>
    %c0_165 = arith.constant 0 : index
    %c0_166 = arith.constant 0 : index
    %127 = vector.load %arg6[%c0_165, %c0_166] : memref<1x128xf32, #tpu.memory_space<vmem>>, vector<1x128xf32>
    %128 = vector.broadcast %127 : vector<1x128xf32> to vector<256x128xf32>
    %129 = arith.mulf %126, %128 : vector<256x128xf32>
    %c0_167 = arith.constant 0 : index
    %c0_168 = arith.constant 0 : index
    %130 = vector.load %arg7[%c0_167, %c0_168] : memref<1x128xf32, #tpu.memory_space<vmem>>, vector<1x128xf32>
    %131 = vector.broadcast %130 : vector<1x128xf32> to vector<256x128xf32>
    %132 = arith.addf %129, %131 : vector<256x128xf32>
    %cst_169 = arith.constant 0.000000e+00 : f32
    %133 = vector.broadcast %cst_169 : f32 to vector<256x128xf32>
    %134 = arith.maximumf %132, %133 : vector<256x128xf32>
    %135 = vector.shape_cast %134 : vector<256x128xf32> to vector<16x16x128xf32>
    %c0_170 = arith.constant 0 : index
    %c0_171 = arith.constant 0 : index
    %c0_172 = arith.constant 0 : index
    %c0_173 = arith.constant 0 : index
    %136 = vector.load %arg8[%c0_170, %c0_171, %c0_172, %c0_173] : memref<1x16x16x128xf32, #tpu.memory_space<vmem>>, vector<1x16x16x128xf32>
    %137 = vector.shape_cast %136 : vector<1x16x16x128xf32> to vector<16x16x128xf32>
    %138 = vector.shape_cast %135 : vector<16x16x128xf32> to vector<1x16x16x128xf32>
    tpu.vector_store %arg8[%c0_170, %c0_171, %c0_172, %c0_173], %138 {strides = array<i32>} : memref<1x16x16x128xf32, #tpu.memory_space<vmem>>, vector<1x16x16x128xf32>,
    return
  }
  func.func @transform_0(%arg0: i32) -> (i32, i32, i32, i32) {
    %c0_i32 = arith.constant 0 : i32
    %c0_i32_0 = arith.constant 0 : i32
    %c0_i32_1 = arith.constant 0 : i32
    %c0_i32_2 = arith.constant 0 : i32
    return %arg0, %c0_i32, %c0_i32_0, %c0_i32_1 : i32, i32, i32, i32
  }
  func.func @transform_1(%arg0: i32) -> (i32, i32, i32, i32) {
    %c0_i32 = arith.constant 0 : i32
    %c0_i32_0 = arith.constant 0 : i32
    %c0_i32_1 = arith.constant 0 : i32
    %c0_i32_2 = arith.constant 0 : i32
    %c0_i32_3 = arith.constant 0 : i32
    return %c0_i32, %c0_i32_0, %c0_i32_1, %c0_i32_2 : i32, i32, i32, i32
  }
  func.func @transform_2(%arg0: i32) -> (i32, i32) {
    %c0_i32 = arith.constant 0 : i32
    %c0_i32_0 = arith.constant 0 : i32
    %c0_i32_1 = arith.constant 0 : i32
    return %c0_i32, %c0_i32_0 : i32, i32
  }
  func.func @transform_3(%arg0: i32) -> (i32, i32) {
    %c0_i32 = arith.constant 0 : i32
    %c0_i32_0 = arith.constant 0 : i32
    %c0_i32_1 = arith.constant 0 : i32
    return %c0_i32, %c0_i32_0 : i32, i32
  }
  func.func @transform_4(%arg0: i32) -> (i32, i32, i32, i32) {
    %c0_i32 = arith.constant 0 : i32
    %c0_i32_0 = arith.constant 0 : i32
    %c0_i32_1 = arith.constant 0 : i32
    %c0_i32_2 = arith.constant 0 : i32
    %c0_i32_3 = arith.constant 0 : i32
    return %c0_i32, %c0_i32_0, %c0_i32_1, %c0_i32_2 : i32, i32, i32, i32
  }
  func.func @transform_5(%arg0: i32) -> (i32, i32) {
    %c0_i32 = arith.constant 0 : i32
    %c0_i32_0 = arith.constant 0 : i32
    %c0_i32_1 = arith.constant 0 : i32
    return %c0_i32, %c0_i32_0 : i32, i32
  }
  func.func @transform_6(%arg0: i32) -> (i32, i32) {
    %c0_i32 = arith.constant 0 : i32
    %c0_i32_0 = arith.constant 0 : i32
    %c0_i32_1 = arith.constant 0 : i32
    return %c0_i32, %c0_i32_0 : i32, i32
  }
  func.func @transform_7(%arg0: i32) -> (i32, i32, i32, i32) {
    %c0_i32 = arith.constant 0 : i32
    %c0_i32_0 = arith.constant 0 : i32
    %c0_i32_1 = arith.constant 0 : i32
    %c0_i32_2 = arith.constant 0 : i32
    return %arg0, %c0_i32, %c0_i32_0, %c0_i32_1 : i32, i32, i32, i32
  }
}

</mosaic_0001>

<bundles_post_ra>
// kernel: tpu_custom_call.1
= control target key start
LH: loop header
LB: loop body
LE: loop exit
PB: predicated region body
PF: predicated region fallthrough
CT: control target
= control target key end

     0   :  { %12 = vsyncpa [#allocation5], 0  ;;  %s11419_s0 = inlined_call_operand.hbm [shape: f32[2,16,16,128], index: 0, kind: input, shape index: {}]   ;;  %s11420_s1 = inlined_call_operand.hbm [shape: f32[3,3,128,128], index: 1, kind: input, shape index: {}]   ;;  %s11421_s2 = inlined_call_operand.vmem [shape: f32[1,128], index: 2, kind: input, shape index: {}]   ;;  %s11422_s3 = inlined_call_operand.vmem [shape: f32[1,128], index: 3, kind: input, shape index: {}]   ;;  %s11423_s4 = inlined_call_operand.hbm [shape: f32[3,3,128,128], index: 4, kind: input, shape index: {}]   ;;  %s11424_s5 = inlined_call_operand.vmem [shape: f32[1,128], index: 5, kind: input, shape index: {}]   ;;  %s11425_s6 = inlined_call_operand.vmem [shape: f32[1,128], index: 6, kind: input, shape index: {}]   ;;  %s11426_s7 = inlined_call_operand.hbm [shape: f32[2,16,16,128], index: 7, kind: output, shape index: {}]  }
   0x1   :  { %14 = vsyncpa [#allocation5 + $0x1], 0 }
   0x2   :  { %15 = vsyncpa [#allocation8], 0 }
   0x3   :  { %16 = vsyncpa [#allocation6], 0 }
   0x4   :  { %18 = vsyncpa [#allocation6 + $0x1], 0  ;;  %s9969_s24 = smov 0   ;;  %s9971_s25 = smov 0  }
   0x5   :  { %s9973_s26 = smov 0   ;;  %s9975_s27 = smov 0  }
   0x6 LB: > { %s9990_s28 = sadd.s32 4294967295, %s9918_s27   ;;  %s6270_s29 = sadd.s32 4294967294, %s9918_s27   ;;  %s9918_s27 = sphi %s9975_s27, %s11668_s27   ;;  %s9914_s26 = sphi %s9973_s26, %s11667_s26   ;;  %s9910_s25 = sphi %s9971_s25, %s11666_s25   ;;  %s9906_s24 = sphi %s9969_s24, %s11665_s24  }
   0x7   : > { %p44_p0 = scmp.ne.s32.totalorder %s9910_s25, %s9906_s24  ;;  %p11427_p1 = scmp.eq.s32.totalorder %s9990_s28, 0 }
   0x8   : > { %p200_p3 = scmp.eq.s32.totalorder %s6270_s29, 1  ;;  %p6271_p5 = scmp.ge.s32.totalorder %s9918_s27, 1 }
   0x9   : > { %p9999_p4 = por %p11427_p1, %p44_p0  ;;  %p207_p7 = scmp.lt.s32.totalorder %s9918_s27, 3 }
   0xa   : > { %p10004_p6 = por %p200_p3, %p44_p0  ;;  %s9920_s10 = smov [#allocation7]  }
   0xb   : > { %s11505_s30 = scalar_select %p9999_p4, 1, 0 }
   0xc   : > { %s11506_s8 = scalar_select %p10004_p6, 1, 0 }
   0xd   : > { %p10009_p8 = pnand %p6271_p5, %p207_p7  ;;  %s219_s11 = sshll.u32 %s9920_s10, 4  ;;  %s10013_s11 = int_to_ptr.vmem [resolvable:$true] %s219_s11 }
   0xe   : > { %s9921_s13 = smov [#allocation9]   ;;  %s9762_s17 = scalar_lea.hbm %s11420_s1, 18432 }
   0xf   : > { %p9698_p9 = pneg %p10009_p8  ;;  %s238_s14 = sshll.u32 %s9921_s13, 4  ;;  %s10024_s14 = int_to_ptr.vmem [resolvable:$true] %s238_s14 }
  0x10   : > { %p9763_p12 = scmp.ne.s32.totalorder %s11420_s1, %s9762_s17  ;;  %p9769_p5 = scmp.lt.u32.totalorder %s9762_s17, %s11420_s1 }
  0x11   : > { %p10020_p11 = pnand %p9698_p9, %p11427_p1 }
  0x13   : > { %p9764_p13 = pneg %p10020_p11 }
  0x15   : > { %p9765_p0 = pnand %p9764_p13, %p9763_p12 }
  0x17   : > { %p9766_p3 = pneg %p9765_p0 }
  0x19   : > { %p9771_p7 = pnand %p9769_p5, %p9766_p3 }
  0x1b   : > { %9774 = shalt.err (!%p9771_p7)
}
  0x1c   : > { %s9775_s22 = scalar_lea.vmem %s10013_s11, 18432  ;;  %p9783_p2 = scmp.lt.s32.totalorder %s10013_s11, %s10013_s11 }
  0x1d   : > { %p9776_p9 = scmp.ne.s32.totalorder %s10013_s11, %s9775_s22  ;;  %p9784_p12 = scmp.lt.s32.totalorder %s9775_s22, %s9775_s22 }
  0x1f   : > { %p9778_p10 = pnand %p9776_p9, %p9764_p13  ;;  %p9785_p0 = por %p9784_p12, %p9783_p2 }
  0x21   : > { %p9779_p1 = pneg %p9778_p10 }
  0x23   : > { %p9786_p6 = pnand %p9785_p0, %p9779_p1 }
  0x25   : > { %9789 = shalt.err (!%p9786_p6)
}
  0x26   : > { %s11428_s23 = smov 128   ;;  %s9923_s29 = smov 8  }
  0x27   : > { %9701 = dma.hbm_to_vmem [thread:$0]  (!%p10020_p11), %s11420_s1, 18432, %s10013_s11, [#allocation8], %s11428_s23, %s11428_s23, %s9923_s29  }
  0x28   : > { %s9790_s17 = scalar_lea.hbm %s11423_s4, 18432 }
  0x29   : > { %p9791_p1 = scmp.ne.s32.totalorder %s11423_s4, %s9790_s17  ;;  %p9797_p10 = scmp.lt.u32.totalorder %s9790_s17, %s11423_s4 }
  0x2b   : > { %p9793_p2 = pnand %p9791_p1, %p9764_p13 }
  0x2d   : > { %p9794_p6 = pneg %p9793_p2 }
  0x2f   : > { %p9799_p3 = pnand %p9797_p10, %p9794_p6 }
  0x31   : > { %9802 = shalt.err (!%p9799_p3)
}
  0x32   : > { %s9803_s11 = scalar_lea.vmem %s10024_s14, 18432  ;;  %p9811_p12 = scmp.lt.s32.totalorder %s10024_s14, %s10024_s14 }
  0x33   : > { %p9804_p5 = scmp.ne.s32.totalorder %s10024_s14, %s9803_s11  ;;  %p9812_p0 = scmp.lt.s32.totalorder %s9803_s11, %s9803_s11 }
  0x35   : > { %p9806_p7 = pnand %p9804_p5, %p9764_p13  ;;  %p9813_p1 = por %p9812_p0, %p9811_p12 }
  0x37   : > { %p9807_p9 = pneg %p9806_p7 }
  0x39   : > { %p9814_p2 = pnand %p9813_p1, %p9807_p9 }
  0x3b   : > { %9817 = shalt.err (!%p9814_p2)
}
  0x3c   : > { %9704 = dma.hbm_to_vmem [thread:$0]  (!%p10020_p11), %s11423_s4, 18432, %s10024_s14, [#allocation8], %s11428_s23, %s11428_s23, %s9923_s29  }
  0x3d   : > { %s10085_s12 = sadd.s32 1, %s9918_s27   ;;  %s31_s13 = sadd.s32 1, %s9914_s26 }
  0x3e   : > { %s28_s15 = ssub.s32 %s9918_s27, %s10085_s12  ;;  %p38_p13 = scmp.ne.s32.totalorder %s9914_s26, %s9910_s25 }
  0x3f   : > { %p29_p6 = scmp.eq.s32.totalorder %s28_s15, 0  ;;  %p39_p10 = scmp.eq.s32.totalorder %s9918_s27, 0 }
  0x40   : > { %p11509_p3 = scmp.eq.s32.totalorder %s9990_s28, 1  ;;  %p9715_p7 = scmp.lt.s32.totalorder %s9918_s27, 2 }
  0x41   : > { %s10101_s17 = scalar_select %p29_p6, %s9914_s26, %s31_s13  }
  0x42   : > { %p10095_p5 = por %p11509_p3, %p38_p13  ;;  %p40_p9 = por %p39_p10, %p38_p13 }
  0x43   : > { %s258_s18 = sand.u32 1, %s9914_s26   ;;  %s6292_s14 = sshll.u32 %s9918_s27, 12 }
  0x44   : > { %s11510_s16 = scalar_select %p10095_p5, 1, 0 }
  0x45   : > { %s6275_s19 = sshll.u32 %s258_s18, 8  ;;  %s10108_s11 = scalar_lea.hbm %s11419_s0, %s6292_s14 }
  0x46   : > { %s262_s22 = scalar_lea.vmem [#allocation4], %s6275_s19  ;;  %p10112_p11 = pnand %p9715_p7, %p40_p9 }
  0x47   : > { %s269_s10 = sshll.u32 %s262_s22, 4  ;;  %s10116_s15 = scalar_lea.sflag [#allocation5], %s258_s18  ;;  %s10110_s10 = int_to_ptr.vmem [resolvable:$true] %s269_s10 }
  0x48   : > { %s9818_s23 = scalar_lea.hbm %s10108_s11, 4096  ;;  %p9820_p0 = pneg %p10112_p11 }
  0x49   : > { %p9819_p12 = scmp.ne.s32.totalorder %s10108_s11, %s9818_s23  ;;  %s9823_s20 = scalar_lea.hbm %s11419_s0, 8192 }
  0x4a   : > { %p9824_p13 = scmp.lt.u32.totalorder %s10108_s11, %s11419_s0  ;;  %p9825_p6 = scmp.lt.u32.totalorder %s9823_s20, %s9818_s23 }
  0x4b   : > { %p9821_p1 = pnand %p9820_p0, %p9819_p12  ;;  %p9827_p3 = scmp.lt.u32.totalorder %s9818_s23, %s10108_s11 }
  0x4c   : > { %p9826_p10 = por %p9825_p6, %p9824_p13 }
  0x4d   : > { %p9822_p2 = pneg %p9821_p1 }
  0x4e   : > { %p9828_p7 = por %p9827_p3, %p9826_p10 }
  0x50   : > { %p9829_p9 = pnand %p9828_p7, %p9822_p2 }
  0x52   : > { %9832 = shalt.err (!%p9829_p9)
}
  0x53   : > { %s9833_s18 = scalar_lea.vmem %s10110_s10, 4096  ;;  %s9924_s19 = smov [#allocation4]  }
  0x54   : > { %p9834_p12 = scmp.ne.s32.totalorder %s10110_s10, %s9833_s18  ;;  %s9838_s14 = sshll.u32 %s9924_s19, 4  ;;  %s9839_s14 = int_to_ptr.vmem [resolvable:$false] %s9838_s14 }
  0x55   : > { %s9840_s21 = scalar_lea.vmem %s9839_s14, 8192  ;;  %p9841_p4 = scmp.lt.s32.totalorder %s10110_s10, %s9839_s14 }
  0x56   : > { %p9836_p1 = pnand %p9834_p12, %p9820_p0  ;;  %p9842_p13 = scmp.lt.s32.totalorder %s9840_s21, %s9833_s18 }
  0x58   : > { %p9837_p5 = pneg %p9836_p1  ;;  %p9843_p6 = por %p9842_p13, %p9841_p4 }
  0x5a   : > { %p9844_p10 = pnand %p9843_p6, %p9837_p5 }
  0x5c   : > { %9847 = shalt.err (!%p9844_p10)
}
  0x5d   : > { %s11512_s23 = smov 128   ;;  %281 = sbr.rel (%p10009_p8) target bundleno = 1676 (0x68c), region = 48 }
  0x5e   : > { %9708 = dma.hbm_to_vmem [thread:$0]  (!%p10112_p11), %s10108_s11, 4096, %s10110_s10, %s10116_s15, %s11512_s23, %s11512_s23, %s9923_s29  }
  0x64   : > { %s10150_s20 = sand.u32 1, %s9910_s25   ;;  %p11513_p4 = scmp.ne.s32.totalorder %s11505_s30, 0 }
  0x65   : > { %s6279_s22 = sshll.u32 %s10150_s20, 8  ;;  %s284_s18 = scalar_lea.sflag [#allocation5], %s10150_s20 }
  0x66   : > { %s10156_s13 = scalar_lea.vmem [#allocation4], %s6279_s22 }
  0x67   : > { %9893 = dma.done.wait (%p11513_p4), %s284_s18, 4096  }
  0x68   : > { %9895 = vsyncadd (%p11513_p4), %s284_s18, 4294963200  ;;  %p11514_p5 = scmp.eq.s32.totalorder %s9990_s28, 0 }
  0x6a   : > { %9897 = dma.done.wait (%p11514_p5), [#allocation8], 36864   ;;  %p11515_p8 = pmov %p11514_p5 }
  0x6b   : > { %v9925_v0 = vmov 0.0   ;;  %v526_v1 = vld [vmem:[#allocation7 + $0x80] sm:$0xff]  ;;  %v527_v2 = vld [vmem:[#allocation7 + $0x88] sm:$0xff]  ;;  %v528_v3 = vld [vmem:[#allocation7 + $0x90] sm:$0xff]  ;;  %s11276_s21 = scalar_lea.vmem [#allocation10], %s6279_s22  ;;  %s6293_s23 = sshll.u32 %s9990_s28, 12 }
  0x6c   : > { %9899 = vsyncadd (%p11515_p8), [#allocation8], 4294930432  ;;  %326 = vst [vmem:[#allocation2] sm:$0xff] %v9925_v0  ;;  %v8598_v4 = vpack.c.bf16 %v527_v2, %v526_v1  ;;  %v529_v5 = vld [vmem:[#allocation7 + $0x98] sm:$0xff]  ;;  %v530_v7 = vld [vmem:[#allocation7 + $0xa0] sm:$0xff]  ;;  %s6178_s22 = sshll.u32 %s11276_s21, 4  ;;  %s11371_s30 = scalar_lea.hbm %s11426_s7, %s6293_s23  ;;  %s11373_s22 = int_to_ptr.vmem [resolvable:$true] %s6178_s22 }
  0x6d   : > { %327 = vst [vmem:[#allocation2 + $0x8] sm:$0xff] %v9925_v0  ;;  %328 = vst [vmem:[#allocation2 + $0x10] sm:$0x3] %v9925_v0  ;;  %v8602_v6 = vpack.c.bf16 %v529_v5, %v528_v3  ;;  %v531_v8 = vld [vmem:[#allocation7 + $0xa8] sm:$0xff]  ;;  %v532_v11 = vld [vmem:[#allocation7 + $0xb0] sm:$0xff]  ;;  %s6165_s28 = scalar_lea.sflag [#allocation6], %s10150_s20 }
  0x6e   : > { %329 = vst [vmem:[#allocation2 + $0x18] sm:$0xff] %v9925_v0  ;;  %330 = vst [vmem:[#allocation2 + $0x20] sm:$0xff] %v9925_v0  ;;  %8599 = vmatprep.subr.bf16.mxu0 %v8598_v4  ;;  %v8606_v9 = vpack.c.bf16 %v531_v8, %v530_v7  ;;  %v533_v12 = vld [vmem:[#allocation7 + $0xb8] sm:$0xff]  ;;  %v10275_v13 = vld [vmem:[%s10156_s13] sm:$0xff]  ;;  %s9848_s9 = scalar_lea.vmem %s11373_s22, 4096  ;;  %p11662_p0 = scmp.ne.s32.totalorder %s11510_s16, 0 }
  0x6f   : > { %331 = vst [vmem:[#allocation2 + $0x28] sm:$0x3] %v9925_v0  ;;  %332 = vst [vmem:[#allocation2 + $0x30] sm:$0xff] %v9925_v0  ;;  %8601 = vmatpush3.bf16.msra.mxu0 %v8598_v4  ;;  %v10279_v14 = vld [vmem:[%s10156_s13 + $0x8] sm:$0xff]  ;;  %v10282_v15 = vld [vmem:[%s10156_s13 + $0x10] sm:$0xff]  ;;  %v8610_v18 = vpack.c.bf16 %v533_v12, %v532_v11  ;;  %p9849_p11 = scmp.ne.s32.totalorder %s11373_s22, %s9848_s9  ;;  %s9926_s29 = smov [#allocation10]  }
  0x70   : > { %333 = vst [vmem:[#allocation2 + $0x38] sm:$0xff] %v9925_v0  ;;  %334 = vst [vmem:[#allocation2 + $0x40] sm:$0x3] %v9925_v0  ;;  %8603 = vmatprep.subr.bf16.mxu0 %v8602_v6  ;;  %v10285_v16 = vld [vmem:[%s10156_s13 + $0x18] sm:$0xff]  ;;  %v10291_v17 = vld [vmem:[%s10156_s13 + $0x20] sm:$0xff]  ;;  %s9852_s11 = sshll.u32 %s9926_s29, 4  ;;  %s9853_s11 = int_to_ptr.vmem [resolvable:$false] %s9852_s11 }
  0x71   : > { %335 = vst [vmem:[#allocation2 + $0x48] sm:$0xff] %v9925_v0  ;;  %336 = vst [vmem:[#allocation2 + $0x50] sm:$0xff] %v9925_v0  ;;  %v10295_v19 = vld [vmem:[%s10156_s13 + $0x28] sm:$0xff]  ;;  %v10298_v20 = vld [vmem:[%s10156_s13 + $0x30] sm:$0xff]  ;;  %p9850_p2 = pnand %p9849_p11, %p11662_p0  ;;  %s9854_s10 = scalar_lea.vmem %s9853_s11, 8192 }
  0x72   : > { %337 = vst [vmem:[#allocation2 + $0x58] sm:$0x3] %v9925_v0  ;;  %338 = vst [vmem:[#allocation2 + $0x60] sm:$0xff] %v9925_v0  ;;  %v10301_v21 = vld [vmem:[%s10156_s13 + $0x38] sm:$0xff]  ;;  %v534_v22 = vld [vmem:[#allocation7 + $0xc0] sm:$0xff]  ;;  %p9855_p7 = scmp.lt.s32.totalorder %s11373_s22, %s9853_s11  ;;  %p9856_p9 = scmp.lt.s32.totalorder %s9854_s10, %s9848_s9 }
  0x73   : > { %339 = vst [vmem:[#allocation2 + $0x68] sm:$0xff] %v9925_v0  ;;  %340 = vst [vmem:[#allocation2 + $0x70] sm:$0x3] %v9925_v0  ;;  %8605 = vmatpush3.bf16.msra.mxu0 %v8602_v6  ;;  %v535_v23 = vld [vmem:[#allocation7 + $0xc8] sm:$0xff]  ;;  %v10307_v24 = vld [vmem:[%s10156_s13 + $0x40] sm:$0xff]  ;;  %p9851_p3 = pneg %p9850_p2 }
  0x74   : > { %341 = vst [vmem:[#allocation2 + $0x78] sm:$0xff] %v9925_v0  ;;  %342 = vst [vmem:[#allocation2 + $0x80] sm:$0xff] %v9925_v0  ;;  %v493_v10 = vld [vmem:[#allocation2 + $0x1] sm:$0xff]  ;;  %8607 = vmatprep.subr.bf16.mxu0 %v8606_v9  ;;  %v10314_v26 = vld [vmem:[%s10156_s13 + $0x50] sm:$0xff]  ;;  %v8614_v29 = vpack.c.bf16 %v535_v23, %v534_v22  ;;  %p9857_p12 = por %p9856_p9, %p9855_p7 }
  0x75   : > { %343 = vst [vmem:[#allocation2 + $0x88] sm:$0x3] %v9925_v0  ;;  %344 = vst [vmem:[#allocation2 + $0x90] sm:$0xff] %v9925_v0  ;;  %7190 = vmatprep.mubr.f32.mxu0 %v493_v10  ;;  %v10311_v25 = vld [vmem:[%s10156_s13 + $0x48] sm:$0xff]  ;;  %v10317_v27 = vld [vmem:[%s10156_s13 + $0x58] sm:$0xff] }
  0x76   : > { %345 = vst [vmem:[#allocation2 + $0x98] sm:$0xff] %v9925_v0  ;;  %346 = vst [vmem:[#allocation2 + $0xa0] sm:$0x3] %v9925_v0  ;;  %v10323_v28 = vld [vmem:[%s10156_s13 + $0x60] sm:$0xff]  ;;  %v10327_v30 = vld [vmem:[%s10156_s13 + $0x68] sm:$0xff]  ;;  %p9858_p1 = pnand %p9857_p12, %p9851_p3 }
  0x77   : > { %347 = vst [vmem:[#allocation2 + $0xa8] sm:$0xff] %v9925_v0  ;;  %348 = vst [vmem:[#allocation2 + $0xb0] sm:$0xff] %v9925_v0  ;;  %8609 = vmatpush3.bf16.msra.mxu0 %v8606_v9  ;;  %v10330_v31 = vld [vmem:[%s10156_s13 + $0x70] sm:$0xff]  ;;  %v10333_v32 = vld [vmem:[%s10156_s13 + $0x78] sm:$0xff] }
  0x78   : > { %349 = vst [vmem:[#allocation2 + $0xb8] sm:$0x3] %v9925_v0  ;;  %350 = vst [vmem:[#allocation2 + $0xc0] sm:$0xff] %v9925_v0  ;;  %8611 = vmatprep.subr.bf16.mxu0 %v8610_v18  ;;  %v536_v33 = vld [vmem:[#allocation7 + $0xd0] sm:$0xff]  ;;  %v537_v34 = vld [vmem:[#allocation7 + $0xd8] sm:$0xff] }
  0x79   : > { %351 = vst [vmem:[#allocation2 + $0xc8] sm:$0xff] %v9925_v0  ;;  %352 = vst [vmem:[#allocation2 + $0xd0] sm:$0x3] %v9925_v0  ;;  %v10339_v35 = vld [vmem:[%s10156_s13 + $0x80] sm:$0xff]  ;;  %v10343_v36 = vld [vmem:[%s10156_s13 + $0x88] sm:$0xff]  ;;  %v8618_v40 = vpack.c.bf16 %v537_v34, %v536_v33 }
  0x7a   : > { %353 = vst [vmem:[#allocation2 + $0xd8] sm:$0xff] %v9925_v0  ;;  %354 = vst [vmem:[#allocation2 + $0xe0] sm:$0xff] %v9925_v0  ;;  %v10346_v37 = vld [vmem:[%s10156_s13 + $0x90] sm:$0xff]  ;;  %v10349_v38 = vld [vmem:[%s10156_s13 + $0x98] sm:$0xff] }
  0x7b   : > { %355 = vst [vmem:[#allocation2 + $0xe8] sm:$0x3] %v9925_v0  ;;  %356 = vst [vmem:[#allocation2 + $0xf0] sm:$0xff] %v9925_v0  ;;  %8613 = vmatpush3.bf16.msra.mxu0 %v8610_v18  ;;  %v10355_v39 = vld [vmem:[%s10156_s13 + $0xa0] sm:$0xff]  ;;  %v10359_v41 = vld [vmem:[%s10156_s13 + $0xa8] sm:$0xff] }
  0x7c   : > { %357 = vst [vmem:[#allocation2 + $0xf8] sm:$0xff] %v9925_v0  ;;  %358 = vst [vmem:[#allocation2 + $0x100] sm:$0x3] %v9925_v0  ;;  %8615 = vmatprep.subr.bf16.mxu0 %v8614_v29  ;;  %v10362_v42 = vld [vmem:[%s10156_s13 + $0xb0] sm:$0xff]  ;;  %v10365_v43 = vld [vmem:[%s10156_s13 + $0xb8] sm:$0xff] }
  0x7d   : > { %359 = vst [vmem:[#allocation2 + $0x108] sm:$0xff] %v9925_v0  ;;  %360 = vst [vmem:[#allocation2 + $0x110] sm:$0xff] %v9925_v0  ;;  %v538_v44 = vld [vmem:[#allocation7 + $0xe0] sm:$0xff]  ;;  %v539_v45 = vld [vmem:[#allocation7 + $0xe8] sm:$0xff] }
  0x7e   : > { %361 = vst [vmem:[#allocation2 + $0x118] sm:$0x3] %v9925_v0  ;;  %362 = vst [vmem:[#allocation2 + $0x120] sm:$0xff] %v9925_v0  ;;  %v10371_v46 = vld [vmem:[%s10156_s13 + $0xc0] sm:$0xff]  ;;  %v10375_v47 = vld [vmem:[%s10156_s13 + $0xc8] sm:$0xff]  ;;  %v8622_v51 = vpack.c.bf16 %v539_v45, %v538_v44 }
  0x7f   : > { %363 = vst [vmem:[#allocation2 + $0x128] sm:$0xff] %v9925_v0  ;;  %364 = vst [vmem:[#allocation2 + $0x130] sm:$0x3] %v9925_v0  ;;  %v10378_v48 = vld [vmem:[%s10156_s13 + $0xd0] sm:$0xff]  ;;  %v10381_v49 = vld [vmem:[%s10156_s13 + $0xd8] sm:$0xff]  ;;  %8617 = vmatpush3.bf16.msra.mxu0 %v8614_v29 }
  0x80   : > { %365 = vst [vmem:[#allocation2 + $0x138] sm:$0xff] %v9925_v0  ;;  %366 = vst [vmem:[#allocation2 + $0x140] sm:$0xff] %v9925_v0  ;;  %v10387_v50 = vld [vmem:[%s10156_s13 + $0xe0] sm:$0xff]  ;;  %8619 = vmatprep.subr.bf16.mxu0 %v8618_v40  ;;  %v10391_v52 = vld [vmem:[%s10156_s13 + $0xe8] sm:$0xff] }
  0x81   : > { %367 = vst [vmem:[#allocation2 + $0x148] sm:$0x3] %v9925_v0  ;;  %368 = vst [vmem:[#allocation2 + $0x150] sm:$0xff] %v9925_v0  ;;  %v540_v53 = vld [vmem:[#allocation7 + $0xf0] sm:$0xff]  ;;  %v541_v54 = vld [vmem:[#allocation7 + $0xf8] sm:$0xff] }
  0x82   : > { %369 = vst [vmem:[#allocation2 + $0x158] sm:$0xff] %v9925_v0  ;;  %370 = vst [vmem:[#allocation2 + $0x160] sm:$0x3] %v9925_v0  ;;  %v8626_v55 = vpack.c.bf16 %v541_v54, %v540_v53  ;;  %v477_v56 = vld [vmem:[#allocation7] sm:$0xff]  ;;  %v478_v57 = vld [vmem:[#allocation7 + $0x8] sm:$0xff] }
  0x83   : > { %371 = vst [vmem:[#allocation2 + $0x168] sm:$0xff] %v9925_v0  ;;  %372 = vst [vmem:[#allocation2 + $0x170] sm:$0xff] %v9925_v0  ;;  %8621 = vmatpush3.bf16.msra.mxu0 %v8618_v40  ;;  %v8630_v58 = vpack.c.bf16 %v478_v57, %v477_v56  ;;  %v479_v59 = vld [vmem:[#allocation7 + $0x10] sm:$0xff]  ;;  %v480_v60 = vld [vmem:[#allocation7 + $0x18] sm:$0xff] }
  0x84   : > { %373 = vst [vmem:[#allocation2 + $0x178] sm:$0x3] %v9925_v0  ;;  %374 = vst [vmem:[#allocation2 + $0x180] sm:$0xff] %v9925_v0  ;;  %8623 = vmatprep.subr.bf16.mxu0 %v8622_v51  ;;  %v494_v61 = vld [vmem:[#allocation2 + $0x9] sm:$0xff]  ;;  %v8634_v62 = vpack.c.bf16 %v480_v60, %v479_v59  ;;  %v481_v63 = vld [vmem:[#allocation7 + $0x20] sm:$0xff] }
  0x85   : > { %375 = vst [vmem:[#allocation2 + $0x188] sm:$0xff] %v9925_v0  ;;  %376 = vst [vmem:[#allocation2 + $0x190] sm:$0x3] %v9925_v0  ;;  %v482_v1 = vld [vmem:[#allocation7 + $0x28] sm:$0xff]  ;;  %v483_v3 = vld [vmem:[#allocation7 + $0x30] sm:$0xff] }
  0x86   : > { %377 = vst [vmem:[#allocation2 + $0x198] sm:$0xff] %v9925_v0  ;;  %378 = vst [vmem:[#allocation2 + $0x1a0] sm:$0xff] %v9925_v0  ;;  %v8638_v2 = vpack.c.bf16 %v482_v1, %v481_v63  ;;  %v484_v4 = vld [vmem:[#allocation7 + $0x38] sm:$0xff]  ;;  %v485_v6 = vld [vmem:[#allocation7 + $0x40] sm:$0xff] }
  0x87   : > { %379 = vst [vmem:[#allocation2 + $0x1a8] sm:$0x3] %v9925_v0  ;;  %3245 = vst [vmem:[#allocation3] sm:$0xff] %v9925_v0  ;;  %8625 = vmatpush3.bf16.msra.mxu0 %v8622_v51  ;;  %v8642_v5 = vpack.c.bf16 %v484_v4, %v483_v3  ;;  %v486_v7 = vld [vmem:[#allocation7 + $0x48] sm:$0xff]  ;;  %v487_v9 = vld [vmem:[#allocation7 + $0x50] sm:$0xff] }
  0x88   : > { %3246 = vst [vmem:[#allocation3 + $0x8] sm:$0xff] %v9925_v0  ;;  %3247 = vst [vmem:[#allocation3 + $0x10] sm:$0x3] %v9925_v0  ;;  %8627 = vmatprep.subr.bf16.mxu0 %v8626_v55  ;;  %v8646_v8 = vpack.c.bf16 %v486_v7, %v485_v6  ;;  %v488_v10 = vld [vmem:[#allocation7 + $0x58] sm:$0xff]  ;;  %v489_v12 = vld [vmem:[#allocation7 + $0x60] sm:$0xff] }
  0x89   : > { %3248 = vst [vmem:[#allocation3 + $0x18] sm:$0xff] %v9925_v0  ;;  %3249 = vst [vmem:[#allocation3 + $0x20] sm:$0xff] %v9925_v0  ;;  %v8650_v11 = vpack.c.bf16 %v488_v10, %v487_v9  ;;  %v490_v18 = vld [vmem:[#allocation7 + $0x68] sm:$0xff]  ;;  %v491_v23 = vld [vmem:[#allocation7 + $0x70] sm:$0xff] }
  0x8a   : > { %3250 = vst [vmem:[#allocation3 + $0x28] sm:$0x3] %v9925_v0  ;;  %3251 = vst [vmem:[#allocation3 + $0x30] sm:$0xff] %v9925_v0  ;;  %v8654_v22 = vpack.c.bf16 %v490_v18, %v489_v12  ;;  %v492_v29 = vld [vmem:[#allocation7 + $0x78] sm:$0xff]  ;;  %v1025_v34 = vld [vmem:[#allocation7 + $0x100] sm:$0xff] }
  0x8b   : > { %3252 = vst [vmem:[#allocation3 + $0x38] sm:$0xff] %v9925_v0  ;;  %3253 = vst [vmem:[#allocation3 + $0x40] sm:$0x3] %v9925_v0  ;;  %8629 = vmatpush3.bf16.msra.mxu0 %v8626_v55  ;;  %v8658_v33 = vpack.c.bf16 %v492_v29, %v491_v23  ;;  %v1026_v40 = vld [vmem:[#allocation7 + $0x108] sm:$0xff]  ;;  %v1027_v45 = vld [vmem:[#allocation7 + $0x110] sm:$0xff] }
  0x8c   : > { %3254 = vst [vmem:[#allocation3 + $0x48] sm:$0xff] %v9925_v0  ;;  %3255 = vst [vmem:[#allocation3 + $0x50] sm:$0xff] %v9925_v0  ;;  %8631 = vmatprep.subr.bf16.mxu0 %v8630_v58  ;;  %v8662_v44 = vpack.c.bf16 %v1026_v40, %v1025_v34  ;;  %v1028_v51 = vld [vmem:[#allocation7 + $0x118] sm:$0xff]  ;;  %v1029_v55 = vld [vmem:[#allocation7 + $0x120] sm:$0xff] }
  0x8d   : > { %3256 = vst [vmem:[#allocation3 + $0x58] sm:$0x3] %v9925_v0  ;;  %3257 = vst [vmem:[#allocation3 + $0x60] sm:$0xff] %v9925_v0  ;;  %v8666_v54 = vpack.c.bf16 %v1028_v51, %v1027_v45  ;;  %v1030_v56 = vld [vmem:[#allocation7 + $0x128] sm:$0xff]  ;;  %v1031_v60 = vld [vmem:[#allocation7 + $0x130] sm:$0xff] }
  0x8e   : > { %3258 = vst [vmem:[#allocation3 + $0x68] sm:$0xff] %v9925_v0  ;;  %3259 = vst [vmem:[#allocation3 + $0x70] sm:$0x3] %v9925_v0  ;;  %7191 = vmatmul.mubr.f32.vlgmr.msra.gmra.mrb[0].mxu0 %v494_v61  ;;  %v8670_v59 = vpack.c.bf16 %v1030_v56, %v1029_v55  ;;  %v1032_v61 = vld [vmem:[#allocation7 + $0x138] sm:$0xff]  ;;  %v1033_v1 = vld [vmem:[#allocation7 + $0x140] sm:$0xff] }
  0x8f   : > { %3260 = vst [vmem:[#allocation3 + $0x78] sm:$0xff] %v9925_v0  ;;  %3261 = vst [vmem:[#allocation3 + $0x80] sm:$0xff] %v9925_v0  ;;  %8633 = vmatpush3.bf16.msra.mxu0 %v8630_v58  ;;  %7193 = vmatprep.mubr.f32.mxu0 %v10275_v13  ;;  %v1035_v6 = vld [vmem:[#allocation7 + $0x150] sm:$0xff]  ;;  %v1036_v7 = vld [vmem:[#allocation7 + $0x158] sm:$0xff] }
  0x90   : > { %3262 = vst [vmem:[#allocation3 + $0x88] sm:$0x3] %v9925_v0  ;;  %3263 = vst [vmem:[#allocation3 + $0x90] sm:$0xff] %v9925_v0  ;;  %8635 = vmatprep.subr.bf16.mxu0 %v8634_v62  ;;  %v8682_v10 = vpack.c.bf16 %v1036_v7, %v1035_v6  ;;  %v1038_v12 = vld [vmem:[#allocation7 + $0x168] sm:$0xff]  ;;  %v1039_v29 = vld [vmem:[#allocation7 + $0x170] sm:$0xff] }
  0x91   : > { %3264 = vst [vmem:[#allocation3 + $0x98] sm:$0xff] %v9925_v0  ;;  %3265 = vst [vmem:[#allocation3 + $0xa0] sm:$0x3] %v9925_v0  ;;  %v1331_v45 = vld [vmem:[#allocation7 + $0x180] sm:$0xff]  ;;  %v1332_v51 = vld [vmem:[#allocation7 + $0x188] sm:$0xff] }
  0x92   : > { %3266 = vst [vmem:[#allocation3 + $0xa8] sm:$0xff] %v9925_v0  ;;  %3267 = vst [vmem:[#allocation3 + $0xb0] sm:$0xff] %v9925_v0  ;;  %7194 = vmatmul.mubr.f32.gmra.mrb[2].mxu0 %v10279_v14  ;;  %v8694_v56 = vpack.c.bf16 %v1332_v51, %v1331_v45  ;;  %v992_v51 = vld [vmem:[#allocation2 + $0x2] sm:$0xff] }
  0x93   : > { %3268 = vst [vmem:[#allocation3 + $0xb8] sm:$0x3] %v9925_v0  ;;  %3269 = vst [vmem:[#allocation3 + $0xc0] sm:$0xff] %v9925_v0  ;;  %7196 = vmatprep.mubr.f32.mxu0 %v10282_v15  ;;  %8637 = vmatpush3.bf16.msra.mxu0 %v8634_v62 }
  0x94   : > { %3270 = vst [vmem:[#allocation3 + $0xc8] sm:$0xff] %v9925_v0  ;;  %3271 = vst [vmem:[#allocation3 + $0xd0] sm:$0x3] %v9925_v0  ;;  %8639 = vmatprep.subr.bf16.mxu0 %v8638_v2 }
  0x95   : > { %3272 = vst [vmem:[#allocation3 + $0xd8] sm:$0xff] %v9925_v0  ;;  %3273 = vst [vmem:[#allocation3 + $0xe0] sm:$0xff] %v9925_v0 }
  0x96   : > { %3274 = vst [vmem:[#allocation3 + $0xe8] sm:$0x3] %v9925_v0  ;;  %3275 = vst [vmem:[#allocation3 + $0xf0] sm:$0xff] %v9925_v0  ;;  %7197 = vmatmul.mubr.f32.gmra.mrb[4].mxu0 %v10285_v16 }
  0x97   : > { %3276 = vst [vmem:[#allocation3 + $0xf8] sm:$0xff] %v9925_v0  ;;  %3277 = vst [vmem:[#allocation3 + $0x100] sm:$0x3] %v9925_v0  ;;  %7199 = vmatprep.mubr.f32.mxu0 %v10291_v17  ;;  %8641 = vmatpush3.bf16.msra.mxu0 %v8638_v2  ;;  %v1034_v2 = vld [vmem:[#allocation7 + $0x148] sm:$0xff] }
  0x98   : > { %3278 = vst [vmem:[#allocation3 + $0x108] sm:$0xff] %v9925_v0  ;;  %3279 = vst [vmem:[#allocation3 + $0x110] sm:$0xff] %v9925_v0  ;;  %8643 = vmatprep.subr.bf16.mxu0 %v8642_v5 }
  0x99   : > { %3280 = vst [vmem:[#allocation3 + $0x118] sm:$0x3] %v9925_v0  ;;  %3281 = vst [vmem:[#allocation3 + $0x120] sm:$0xff] %v9925_v0 }
  0x9a   : > { %3282 = vst [vmem:[#allocation3 + $0x128] sm:$0xff] %v9925_v0  ;;  %3283 = vst [vmem:[#allocation3 + $0x130] sm:$0x3] %v9925_v0  ;;  %7200 = vmatmul.mubr.f32.gmra.mrb[6].mxu0 %v10295_v19 }
  0x9b   : > { %3284 = vst [vmem:[#allocation3 + $0x138] sm:$0xff] %v9925_v0  ;;  %3285 = vst [vmem:[#allocation3 + $0x140] sm:$0xff] %v9925_v0  ;;  %7202 = vmatprep.mubr.f32.mxu0 %v10298_v20  ;;  %8645 = vmatpush3.bf16.msra.mxu0 %v8642_v5  ;;  %v8678_v5 = vpack.c.bf16 %v1034_v2, %v1033_v1 }
  0x9c   : > { %3286 = vst [vmem:[#allocation3 + $0x148] sm:$0x3] %v9925_v0  ;;  %3287 = vst [vmem:[#allocation3 + $0x150] sm:$0xff] %v9925_v0  ;;  %8647 = vmatprep.subr.bf16.mxu0 %v8646_v8 }
  0x9d   : > { %3288 = vst [vmem:[#allocation3 + $0x158] sm:$0xff] %v9925_v0  ;;  %3289 = vst [vmem:[#allocation3 + $0x160] sm:$0x3] %v9925_v0 }
  0x9e   : > { %3290 = vst [vmem:[#allocation3 + $0x168] sm:$0xff] %v9925_v0  ;;  %3291 = vst [vmem:[#allocation3 + $0x170] sm:$0xff] %v9925_v0  ;;  %7203 = vmatmul.mubr.f32.gmra.mrb[8].mxu0 %v10301_v21 }
  0x9f   : > { %3292 = vst [vmem:[#allocation3 + $0x178] sm:$0x3] %v9925_v0  ;;  %3293 = vst [vmem:[#allocation3 + $0x180] sm:$0xff] %v9925_v0  ;;  %7205 = vmatprep.mubr.f32.mxu0 %v10307_v24  ;;  %8649 = vmatpush3.bf16.msra.mxu0 %v8646_v8 }
  0xa0   : > { %3294 = vst [vmem:[#allocation3 + $0x188] sm:$0xff] %v9925_v0  ;;  %3295 = vst [vmem:[#allocation3 + $0x190] sm:$0x3] %v9925_v0  ;;  %8651 = vmatprep.subr.bf16.mxu0 %v8650_v11 }
  0xa1   : > { %3296 = vst [vmem:[#allocation3 + $0x198] sm:$0xff] %v9925_v0  ;;  %3297 = vst [vmem:[#allocation3 + $0x1a0] sm:$0xff] %v9925_v0 }
  0xa2   : > { %3298 = vst [vmem:[#allocation3 + $0x1a8] sm:$0x3] %v9925_v0  ;;  %413 = vst [vmem:[#allocation2 + $0x19] sm:$0xff] %v10275_v13  ;;  %7206 = vmatmul.mubr.f32.gmra.mrb[10].mxu0 %v10311_v25 }
  0xa3   : > { %414 = vst [vmem:[#allocation2 + $0x21] sm:$0xff] %v10279_v14  ;;  %415 = vst [vmem:[#allocation2 + $0x31] sm:$0xff] %v10282_v15  ;;  %7208 = vmatprep.mubr.f32.mxu0 %v10314_v26  ;;  %8653 = vmatpush3.bf16.msra.mxu0 %v8650_v11  ;;  %v1037_v11 = vld [vmem:[#allocation7 + $0x160] sm:$0xff] }
  0xa4   : > { %416 = vst [vmem:[#allocation2 + $0x39] sm:$0xff] %v10285_v16  ;;  %417 = vst [vmem:[#allocation2 + $0x49] sm:$0xff] %v10291_v17  ;;  %8655 = vmatprep.subr.bf16.mxu0 %v8654_v22  ;;  %v8686_v23 = vpack.c.bf16 %v1038_v12, %v1037_v11 }
  0xa5   : > { %418 = vst [vmem:[#allocation2 + $0x51] sm:$0xff] %v10295_v19  ;;  %419 = vst [vmem:[#allocation2 + $0x61] sm:$0xff] %v10298_v20 }
  0xa6   : > { %420 = vst [vmem:[#allocation2 + $0x69] sm:$0xff] %v10301_v21  ;;  %421 = vst [vmem:[#allocation2 + $0x79] sm:$0xff] %v10307_v24  ;;  %7209 = vmatmul.mubr.f32.gmra.mrb[12].mxu0 %v10317_v27 }
  0xa7   : > { %422 = vst [vmem:[#allocation2 + $0x81] sm:$0xff] %v10311_v25  ;;  %423 = vst [vmem:[#allocation2 + $0x91] sm:$0xff] %v10314_v26  ;;  %7211 = vmatprep.mubr.f32.mxu0 %v10323_v28  ;;  %8657 = vmatpush3.bf16.msra.mxu0 %v8654_v22 }
  0xa8   : > { %424 = vst [vmem:[#allocation2 + $0x99] sm:$0xff] %v10317_v27  ;;  %425 = vst [vmem:[#allocation2 + $0xa9] sm:$0xff] %v10323_v28  ;;  %8659 = vmatprep.subr.bf16.mxu0 %v8658_v33 }
  0xa9   : > { %426 = vst [vmem:[#allocation2 + $0xb1] sm:$0xff] %v10327_v30  ;;  %427 = vst [vmem:[#allocation2 + $0xc1] sm:$0xff] %v10330_v31  ;;  %v10425_v53 = vld [vmem:[#allocation2 + $0x18] sm:$0xff] }
  0xaa   : > { %428 = vst [vmem:[#allocation2 + $0xc9] sm:$0xff] %v10333_v32  ;;  %429 = vst [vmem:[#allocation2 + $0xd9] sm:$0xff] %v10339_v35  ;;  %7212 = vmatmul.mubr.f32.gmra.mrb[14].mxu0 %v10327_v30  ;;  %v10429_v57 = vld [vmem:[#allocation2 + $0x20] sm:$0xff]  ;;  %v10431_v58 = vld [vmem:[#allocation2 + $0x30] sm:$0xff] }
  0xab   : > { %430 = vst [vmem:[#allocation2 + $0xe1] sm:$0xff] %v10343_v36  ;;  %431 = vst [vmem:[#allocation2 + $0xf1] sm:$0xff] %v10346_v37  ;;  %7214 = vmatprep.mubr.f32.mxu0 %v10330_v31  ;;  %8661 = vmatpush3.bf16.msra.mxu0 %v8658_v33  ;;  %v10435_v62 = vld [vmem:[#allocation2 + $0x38] sm:$0xff]  ;;  %v10437_v63 = vld [vmem:[#allocation2 + $0x48] sm:$0xff] }
  0xac   : > { %432 = vst [vmem:[#allocation2 + $0xf9] sm:$0xff] %v10349_v38  ;;  %11516 = vst [vmem:[#allocation14_spill] sm:$0xff] %v10355_v39  ;;  %8663 = vmatprep.subr.bf16.mxu0 %v8662_v44  ;;  %v10441_v3 = vld [vmem:[#allocation2 + $0x50] sm:$0xff]  ;;  %v10443_v4 = vld [vmem:[#allocation2 + $0x60] sm:$0xff] }
  0xad   : > { %433 = vst [vmem:[#allocation2 + $0x109] sm:$0xff] %v10355_v39  ;;  %11517 = vst [vmem:[#allocation15_spill] sm:$0xff] %v10359_v41  ;;  %v10447_v8 = vld [vmem:[#allocation2 + $0x68] sm:$0xff]  ;;  %v10449_v9 = vld [vmem:[#allocation2 + $0x78] sm:$0xff] }
  0xae   : > { %11518 = vst [vmem:[#allocation16_spill] sm:$0xff] %v10362_v42  ;;  %11519 = vst [vmem:[#allocation17_spill] sm:$0xff] %v10365_v43  ;;  %7215 = vmatmul.mubr.f32.gmra.mrb[16].mxu0 %v10333_v32  ;;  %v10453_v18 = vld [vmem:[#allocation2 + $0x80] sm:$0xff]  ;;  %v10455_v22 = vld [vmem:[#allocation2 + $0x90] sm:$0xff] }
  0xaf   : > { %434 = vst [vmem:[#allocation2 + $0x111] sm:$0xff] %v10359_v41  ;;  %435 = vst [vmem:[#allocation2 + $0x121] sm:$0xff] %v10362_v42  ;;  %7217 = vmatprep.mubr.f32.mxu0 %v10339_v35  ;;  %v1040_v33 = vld [vmem:[#allocation7 + $0x178] sm:$0xff]  ;;  %v10461_v40 = vld [vmem:[#allocation2 + $0xa8] sm:$0xff] }
  0xb0   : > { %436 = vst [vmem:[#allocation2 + $0x129] sm:$0xff] %v10365_v43  ;;  %11520 = vst [vmem:[#allocation18_spill] sm:$0xff] %v10371_v46  ;;  %v10459_v34 = vld [vmem:[#allocation2 + $0x98] sm:$0xff]  ;;  %v10467_v55 = vld [vmem:[#allocation2 + $0xc0] sm:$0xff] }
  0xb1   : > { %437 = vst [vmem:[#allocation2 + $0x139] sm:$0xff] %v10371_v46  ;;  %11521 = vst [vmem:[#allocation19_spill] sm:$0xff] %v10375_v47 }
  0xb2   : > { %11522 = vst [vmem:[#allocation20_spill] sm:$0xff] %v10378_v48  ;;  %11523 = vst [vmem:[#allocation21_spill] sm:$0xff] %v10381_v49  ;;  %7218 = vmatmul.mubr.f32.gmra.mrb[18].mxu0 %v10343_v36 }
  0xb3   : > { %438 = vst [vmem:[#allocation2 + $0x141] sm:$0xff] %v10375_v47  ;;  %439 = vst [vmem:[#allocation2 + $0x151] sm:$0xff] %v10378_v48  ;;  %7220 = vmatprep.mubr.f32.mxu0 %v10346_v37  ;;  %v10483_v1 = vld [vmem:[#allocation2 + $0xf8] sm:$0xff] }
  0xb4   : > { %440 = vst [vmem:[#allocation2 + $0x159] sm:$0xff] %v10381_v49  ;;  %11524 = vst [vmem:[#allocation22_spill] sm:$0xff] %v10387_v50  ;;  %v10485_v2 = vld [vmem:[#allocation2 + $0x108] sm:$0xff] }
  0xb5   : > { %441 = vst [vmem:[#allocation2 + $0x169] sm:$0xff] %v10387_v50  ;;  %11525 = vst [vmem:[#allocation23_spill] sm:$0xff] %v10391_v52 }
  0xb6   : > { %442 = vst [vmem:[#allocation2 + $0x171] sm:$0xff] %v10391_v52  ;;  %7221 = vmatmul.mubr.f32.gmra.mrb[20].mxu0 %v10349_v38  ;;  %v10491_v6 = vld [vmem:[#allocation2 + $0x120] sm:$0xff] }
  0xb7   : > { %7223 = vmatprep.mubr.f32.mxu0 %v10355_v39  ;;  %v10495_v7 = vld [vmem:[#allocation2 + $0x128] sm:$0xff]  ;;  %v1338_v39 = vld [vmem:[#allocation7 + $0x1b8] sm:$0xff] }
  0xba   : > { %7224 = vmatmul.mubr.f32.gmra.mrb[22].mxu0 %v10359_v41  ;;  %v10501_v11 = vld [vmem:[#allocation2 + $0x140] sm:$0xff]  ;;  %v10503_v12 = vld [vmem:[#allocation2 + $0x150] sm:$0xff] }
  0xbb   : > { %7226 = vmatprep.mubr.f32.mxu0 %v10362_v42  ;;  %v1337_v41 = vld [vmem:[#allocation7 + $0x1b0] sm:$0xff] }
  0xbd   : > { %v10521_v45 = vld [vmem:[#allocation2 + $0x170] sm:$0xff] }
  0xbe   : > { %7227 = vmatmul.mubr.f32.gmra.mrb[24].mxu0 %v10365_v43  ;;  %v10529_v43 = vld [vmem:[#allocation2 + $0x32] sm:$0xff] }
  0xbf   : > { %7229 = vmatprep.mubr.f32.mxu0 %v10371_v46  ;;  %v10527_v46 = vld [vmem:[#allocation2 + $0x22] sm:$0xff]  ;;  %11530 = vst [vmem:[#allocation28_spill] sm:$0xff] %v10529_v43 }
  0xc0   : > { %11529 = vst [vmem:[#allocation27_spill] sm:$0xff] %v10527_v46 }
  0xc2   : > { %7230 = vmatmul.mubr.f32.gmra.mrb[26].mxu0 %v10375_v47  ;;  %v1336_v47 = vld [vmem:[#allocation7 + $0x1a8] sm:$0xff] }
  0xc3   : > { %7232 = vmatprep.mubr.f32.mxu0 %v10378_v48  ;;  %v1335_v48 = vld [vmem:[#allocation7 + $0x1a0] sm:$0xff] }
  0xc4   : > { %v8702_v42 = vpack.c.bf16 %v1336_v47, %v1335_v48  ;;  %v10539_v47 = vld [vmem:[#allocation2 + $0x52] sm:$0xff]  ;;  %v10541_v48 = vld [vmem:[#allocation2 + $0x62] sm:$0xff] }
  0xc5   : > { %11533 = vst [vmem:[#allocation31_spill] sm:$0xff] %v10539_v47  ;;  %11534 = vst [vmem:[#allocation32_spill] sm:$0xff] %v10541_v48 }
  0xc6   : > { %7233 = vmatmul.mubr.f32.gmra.mrb[28].mxu0 %v10381_v49 }
  0xc7   : > { %7235 = vmatprep.mubr.f32.mxu0 %v10387_v50  ;;  %v993_v50 = vld [vmem:[#allocation2 + $0xa] sm:$0xff] }
  0xca   : > { %7236 = vmatmul.mubr.f32.gmra.mrb[30].mxu0 %v10391_v52  ;;  %v1334_v52 = vld [vmem:[#allocation7 + $0x198] sm:$0xff] }
  0xcb   : > { %7270 = vmatprep.mubr.f32.mxu0 %v9925_v0 }
  0xce   : > { %7271 = vmatmul.mubr.f32.vlgmr.msra.gmra.mrb[0].mxu0 %v9925_v0  ;;  %v8674_v0 = vpack.c.bf16 %v1032_v61, %v1031_v60  ;;  %v10473_v60 = vld [vmem:[#allocation2 + $0xd8] sm:$0xff]  ;;  %v10477_v61 = vld [vmem:[#allocation2 + $0xe0] sm:$0xff] }
  0xcf   : > { %8665 = vmatpush3.bf16.msra.mxu0 %v8662_v44  ;;  %7273 = vmatprep.mubr.f32.mxu0 %v10425_v53  ;;  %v8690_v44 = vpack.c.bf16 %v1040_v33, %v1039_v29  ;;  %v10510_v29 = vld [vmem:[%s10156_s13 + $0xf8] sm:$0xff] }
  0xd0   : > { %8667 = vmatprep.subr.bf16.mxu0 %v8666_v54  ;;  %11527 = vst [vmem:[#allocation25_spill] sm:$0xff] %v10510_v29  ;;  %444 = vst [vmem:[#allocation2 + $0x189] sm:$0xff] %v10510_v29  ;;  %v10515_v33 = vld [vmem:[#allocation2 + $0x158] sm:$0xff] }
  0xd1   : > { %v10524_v29 = vld [vmem:[#allocation2 + $0x1a] sm:$0xff] }
  0xd2   : > { %7274 = vmatmul.mubr.f32.gmra.mrb[2].mxu0 %v10429_v57  ;;  %11528 = vst [vmem:[#allocation26_spill] sm:$0xff] %v10524_v29 }
  0xd3   : > { %7276 = vmatprep.mubr.f32.mxu0 %v10431_v58  ;;  %8669 = vmatpush3.bf16.msra.mxu0 %v8666_v54  ;;  %v10465_v54 = vld [vmem:[#allocation2 + $0xb0] sm:$0xff] }
  0xd4   : > { %8671 = vmatprep.subr.bf16.mxu0 %v8670_v59 }
  0xd6   : > { %7277 = vmatmul.mubr.f32.gmra.mrb[4].mxu0 %v10435_v62 }
  0xd7   : > { %7279 = vmatprep.mubr.f32.mxu0 %v10437_v63  ;;  %8673 = vmatpush3.bf16.msra.mxu0 %v8670_v59  ;;  %v10471_v59 = vld [vmem:[#allocation2 + $0xc8] sm:$0xff] }
  0xd8   : > { %8675 = vmatprep.subr.bf16.mxu0 %v8674_v0 }
  0xda   : > { %7280 = vmatmul.mubr.f32.gmra.mrb[6].mxu0 %v10441_v3 }
  0xdb   : > { %7282 = vmatprep.mubr.f32.mxu0 %v10443_v4  ;;  %8677 = vmatpush3.bf16.msra.mxu0 %v8674_v0  ;;  %v10479_v0 = vld [vmem:[#allocation2 + $0xf0] sm:$0xff] }
  0xdc   : > { %8679 = vmatprep.subr.bf16.mxu0 %v8678_v5 }
  0xde   : > { %7283 = vmatmul.mubr.f32.gmra.mrb[8].mxu0 %v10447_v8 }
  0xdf   : > { %7285 = vmatprep.mubr.f32.mxu0 %v10449_v9  ;;  %8681 = vmatpush3.bf16.msra.mxu0 %v8678_v5  ;;  %v10489_v5 = vld [vmem:[#allocation2 + $0x110] sm:$0xff] }
  0xe0   : > { %8683 = vmatprep.subr.bf16.mxu0 %v8682_v10 }
  0xe2   : > { %7286 = vmatmul.mubr.f32.gmra.mrb[10].mxu0 %v10453_v18 }
  0xe3   : > { %7288 = vmatprep.mubr.f32.mxu0 %v10455_v22  ;;  %8685 = vmatpush3.bf16.msra.mxu0 %v8682_v10  ;;  %v10497_v10 = vld [vmem:[#allocation2 + $0x138] sm:$0xff] }
  0xe4   : > { %8687 = vmatprep.subr.bf16.mxu0 %v8686_v23 }
  0xe6   : > { %7289 = vmatmul.mubr.f32.gmra.mrb[12].mxu0 %v10459_v34 }
  0xe7   : > { %7291 = vmatprep.mubr.f32.mxu0 %v10461_v40  ;;  %8689 = vmatpush3.bf16.msra.mxu0 %v8686_v23  ;;  %v10506_v23 = vld [vmem:[%s10156_s13 + $0xf0] sm:$0xff] }
  0xe8   : > { %8691 = vmatprep.subr.bf16.mxu0 %v8690_v44  ;;  %11526 = vst [vmem:[#allocation24_spill] sm:$0xff] %v10506_v23  ;;  %443 = vst [vmem:[#allocation2 + $0x181] sm:$0xff] %v10506_v23  ;;  %v1333_v23 = vld [vmem:[#allocation7 + $0x190] sm:$0xff] }
  0xe9   : > { %v8698_v49 = vpack.c.bf16 %v1334_v52, %v1333_v23  ;;  %v10535_v52 = vld [vmem:[#allocation2 + $0x4a] sm:$0xff] }
  0xea   : > { %7292 = vmatmul.mubr.f32.gmra.mrb[14].mxu0 %v10465_v54  ;;  %11532 = vst [vmem:[#allocation30_spill] sm:$0xff] %v10535_v52  ;;  %v1340_v23 = vld [vmem:[#allocation7 + $0x1c8] sm:$0xff] }
  0xeb   : > { %7294 = vmatprep.mubr.f32.mxu0 %v10467_v55  ;;  %8693 = vmatpush3.bf16.msra.mxu0 %v8690_v44  ;;  %v10517_v44 = vld [vmem:[#allocation2 + $0x168] sm:$0xff] }
  0xec   : > { %8695 = vmatprep.subr.bf16.mxu0 %v8694_v56 }
  0xee   : > { %7295 = vmatmul.mubr.f32.gmra.mrb[16].mxu0 %v10471_v59 }
  0xef   : > { %7297 = vmatprep.mubr.f32.mxu0 %v10473_v60 }
  0xf2   : > { %7298 = vmatmul.mubr.f32.gmra.mrb[18].mxu0 %v10477_v61 }
  0xf3   : > { %7300 = vmatprep.mubr.f32.mxu0 %v10479_v0 }
  0xf6   : > { %7301 = vmatmul.mubr.f32.gmra.mrb[20].mxu0 %v10483_v1 }
  0xf7   : > { %7303 = vmatprep.mubr.f32.mxu0 %v10485_v2 }
  0xfa   : > { %7304 = vmatmul.mubr.f32.gmra.mrb[22].mxu0 %v10489_v5 }
  0xfb   : > { %7306 = vmatprep.mubr.f32.mxu0 %v10491_v6 }
  0xfe   : > { %7307 = vmatmul.mubr.f32.gmra.mrb[24].mxu0 %v10495_v7 }
  0xff   : > { %7309 = vmatprep.mubr.f32.mxu0 %v10497_v10 }
 0x102   : > { %7310 = vmatmul.mubr.f32.gmra.mrb[26].mxu0 %v10501_v11 }
 0x103   : > { %7312 = vmatprep.mubr.f32.mxu0 %v10503_v12 }
 0x106   : > { %7313 = vmatmul.mubr.f32.gmra.mrb[28].mxu0 %v10515_v33 }
 0x107   : > { %7315 = vmatprep.mubr.f32.mxu0 %v10517_v44 }
 0x10a   : > { %7316 = vmatmul.mubr.f32.gmra.mrb[30].mxu0 %v10521_v45 }
 0x10b   : > { %7350 = vmatprep.mubr.f32.mxu0 %v992_v51  ;;  %v10533_v51 = vld [vmem:[#allocation2 + $0x3a] sm:$0xff] }
 0x10c   : > { %11531 = vst [vmem:[#allocation29_spill] sm:$0xff] %v10533_v51 }
 0x10e   : > { %7351 = vmatmul.mubr.f32.vlgmr.msra.gmra.mrb[0].mxu0 %v993_v50  ;;  %v8706_v50 = vpack.c.bf16 %v1338_v39, %v1337_v41  ;;  %v10545_v39 = vld [vmem:[#allocation2 + $0x6a] sm:$0xff]  ;;  %v10547_v41 = vld [vmem:[#allocation2 + $0x7a] sm:$0xff] }
 0x10f   : > { %8697 = vmatpush3.bf16.msra.mxu0 %v8694_v56  ;;  %7353 = vmatprep.mubr.f32.mxu0 %v10524_v29  ;;  %v1339_v56 = vld [vmem:[#allocation7 + $0x1c0] sm:$0xff]  ;;  %v1342_v29 = vld [vmem:[#allocation7 + $0x1d8] sm:$0xff]  ;;  %11535 = vst [vmem:[#allocation33_spill] sm:$0xff] %v10545_v39  ;;  %11536 = vst [vmem:[#allocation34_spill] sm:$0xff] %v10547_v41 }
 0x110   : > { %8699 = vmatprep.subr.bf16.mxu0 %v8698_v49 }
 0x112   : > { %7354 = vmatmul.mubr.f32.gmra.mrb[2].mxu0 %v10527_v46  ;;  %v1341_v46 = vld [vmem:[#allocation7 + $0x1d0] sm:$0xff] }
 0x113   : > { %7356 = vmatprep.mubr.f32.mxu0 %v10529_v43  ;;  %8701 = vmatpush3.bf16.msra.mxu0 %v8698_v49  ;;  %v8710_v43 = vpack.c.bf16 %v1340_v23, %v1339_v56  ;;  %v8714_v49 = vpack.c.bf16 %v1342_v29, %v1341_v46  ;;  %v10553_v56 = vld [vmem:[#allocation2 + $0x92] sm:$0xff]  ;;  %v10557_v46 = vld [vmem:[#allocation2 + $0x9a] sm:$0xff]  ;;  %v10559_v29 = vld [vmem:[#allocation2 + $0xaa] sm:$0xff] }
 0x114   : > { %8703 = vmatprep.subr.bf16.mxu0 %v8702_v42 }
 0x116   : > { %7357 = vmatmul.mubr.f32.gmra.mrb[4].mxu0 %v10533_v51  ;;  %v1344_v51 = vld [vmem:[#allocation7 + $0x1e8] sm:$0xff] }
 0x117   : > { %7359 = vmatprep.mubr.f32.mxu0 %v10535_v52  ;;  %8705 = vmatpush3.bf16.msra.mxu0 %v8702_v42  ;;  %v1343_v52 = vld [vmem:[#allocation7 + $0x1e0] sm:$0xff] }
 0x118   : > { %8707 = vmatprep.subr.bf16.mxu0 %v8706_v50  ;;  %v10551_v42 = vld [vmem:[#allocation2 + $0x82] sm:$0xff]  ;;  %v8718_v23 = vpack.c.bf16 %v1344_v51, %v1343_v52 }
 0x119   : > { %v10565_v51 = vld [vmem:[#allocation2 + $0xc2] sm:$0xff] }
 0x11a   : > { %7360 = vmatmul.mubr.f32.gmra.mrb[6].mxu0 %v10539_v47  ;;  %v1346_v47 = vld [vmem:[#allocation7 + $0x1f8] sm:$0xff]  ;;  %11538 = vst [vmem:[#allocation36_spill] sm:$0xff] %v10565_v51 }
 0x11b   : > { %7362 = vmatprep.mubr.f32.mxu0 %v10541_v48  ;;  %8709 = vmatpush3.bf16.msra.mxu0 %v8706_v50  ;;  %v1345_v48 = vld [vmem:[#allocation7 + $0x1f0] sm:$0xff] }
 0x11c   : > { %8711 = vmatprep.subr.bf16.mxu0 %v8710_v43  ;;  %v8722_v50 = vpack.c.bf16 %v1346_v47, %v1345_v48  ;;  %v10571_v47 = vld [vmem:[#allocation2 + $0xda] sm:$0xff]  ;;  %v10575_v48 = vld [vmem:[#allocation2 + $0xe2] sm:$0xff] }
 0x11d   : > { %11540 = vst [vmem:[#allocation38_spill] sm:$0xff] %v10571_v47  ;;  %11541 = vst [vmem:[#allocation39_spill] sm:$0xff] %v10575_v48 }
 0x11e   : > { %7363 = vmatmul.mubr.f32.gmra.mrb[8].mxu0 %v10545_v39  ;;  %v1638_v39 = vld [vmem:[#allocation7 + $0x208] sm:$0xff] }
 0x11f   : > { %7365 = vmatprep.mubr.f32.mxu0 %v10547_v41  ;;  %8713 = vmatpush3.bf16.msra.mxu0 %v8710_v43  ;;  %v1637_v41 = vld [vmem:[#allocation7 + $0x200] sm:$0xff]  ;;  %v10563_v43 = vld [vmem:[#allocation2 + $0xb2] sm:$0xff] }
 0x120   : > { %8715 = vmatprep.subr.bf16.mxu0 %v8714_v49  ;;  %11537 = vst [vmem:[#allocation35_spill] sm:$0xff] %v10563_v43  ;;  %v8726_v52 = vpack.c.bf16 %v1638_v39, %v1637_v41  ;;  %v10581_v39 = vld [vmem:[#allocation2 + $0xfa] sm:$0xff]  ;;  %v10583_v41 = vld [vmem:[#allocation2 + $0x10a] sm:$0xff] }
 0x121   : > { %11543 = vst [vmem:[#allocation41_spill] sm:$0xff] %v10581_v39  ;;  %11544 = vst [vmem:[#allocation42_spill] sm:$0xff] %v10583_v41 }
 0x122   : > { %7366 = vmatmul.mubr.f32.gmra.mrb[10].mxu0 %v10551_v42 }
 0x123   : > { %7368 = vmatprep.mubr.f32.mxu0 %v10553_v56  ;;  %8717 = vmatpush3.bf16.msra.mxu0 %v8714_v49  ;;  %v10569_v49 = vld [vmem:[#allocation2 + $0xca] sm:$0xff] }
 0x124   : > { %8719 = vmatprep.subr.bf16.mxu0 %v8718_v23  ;;  %11539 = vst [vmem:[#allocation37_spill] sm:$0xff] %v10569_v49 }
 0x126   : > { %7369 = vmatmul.mubr.f32.gmra.mrb[12].mxu0 %v10557_v46 }
 0x127   : > { %7371 = vmatprep.mubr.f32.mxu0 %v10559_v29  ;;  %8721 = vmatpush3.bf16.msra.mxu0 %v8718_v23  ;;  %v10577_v23 = vld [vmem:[#allocation2 + $0xf2] sm:$0xff] }
 0x128   : > { %8723 = vmatprep.subr.bf16.mxu0 %v8722_v50  ;;  %11542 = vst [vmem:[#allocation40_spill] sm:$0xff] %v10577_v23 }
 0x12a   : > { %7372 = vmatmul.mubr.f32.gmra.mrb[14].mxu0 %v10563_v43  ;;  %v1642_v43 = vld [vmem:[#allocation7 + $0x228] sm:$0xff] }
 0x12b   : > { %7374 = vmatprep.mubr.f32.mxu0 %v10565_v51  ;;  %8725 = vmatpush3.bf16.msra.mxu0 %v8722_v50  ;;  %v10587_v50 = vld [vmem:[#allocation2 + $0x112] sm:$0xff] }
 0x12c   : > { %8727 = vmatprep.subr.bf16.mxu0 %v8726_v52  ;;  %11545 = vst [vmem:[#allocation43_spill] sm:$0xff] %v10587_v50 }
 0x12e   : > { %7375 = vmatmul.mubr.f32.gmra.mrb[16].mxu0 %v10569_v49  ;;  %v10589_v49 = vld [vmem:[#allocation2 + $0x122] sm:$0xff] }
 0x12f   : > { %7377 = vmatprep.mubr.f32.mxu0 %v10571_v47  ;;  %11546 = vst [vmem:[#allocation44_spill] sm:$0xff] %v10589_v49  ;;  %v10593_v47 = vld [vmem:[#allocation2 + $0x12a] sm:$0xff] }
 0x130   : > { %11547 = vst [vmem:[#allocation45_spill] sm:$0xff] %v10593_v47 }
 0x132   : > { %7378 = vmatmul.mubr.f32.gmra.mrb[18].mxu0 %v10575_v48  ;;  %v10595_v48 = vld [vmem:[#allocation2 + $0x13a] sm:$0xff] }
 0x133   : > { %7380 = vmatprep.mubr.f32.mxu0 %v10577_v23  ;;  %11548 = vst [vmem:[#allocation46_spill] sm:$0xff] %v10595_v48  ;;  %v10599_v23 = vld [vmem:[#allocation2 + $0x142] sm:$0xff] }
 0x134   : > { %11549 = vst [vmem:[#allocation47_spill] sm:$0xff] %v10599_v23 }
 0x136   : > { %7381 = vmatmul.mubr.f32.gmra.mrb[20].mxu0 %v10581_v39  ;;  %v10601_v39 = vld [vmem:[#allocation2 + $0x152] sm:$0xff] }
 0x137   : > { %7383 = vmatprep.mubr.f32.mxu0 %v10583_v41  ;;  %11550 = vst [vmem:[#allocation48_spill] sm:$0xff] %v10601_v39  ;;  %v10605_v41 = vld [vmem:[#allocation2 + $0x15a] sm:$0xff] }
 0x138   : > { %11551 = vst [vmem:[#allocation49_spill] sm:$0xff] %v10605_v41 }
 0x13a   : > { %7384 = vmatmul.mubr.f32.gmra.mrb[22].mxu0 %v10587_v50  ;;  %v10607_v50 = vld [vmem:[#allocation2 + $0x16a] sm:$0xff] }
 0x13b   : > { %7386 = vmatprep.mubr.f32.mxu0 %v10589_v49  ;;  %11552 = vst [vmem:[#allocation50_spill] sm:$0xff] %v10607_v50  ;;  %v10611_v49 = vld [vmem:[#allocation2 + $0x172] sm:$0xff] }
 0x13c   : > { %11553 = vst [vmem:[#allocation51_spill] sm:$0xff] %v10611_v49 }
 0x13e   : > { %7387 = vmatmul.mubr.f32.gmra.mrb[24].mxu0 %v10593_v47  ;;  %v1639_v47 = vld [vmem:[#allocation7 + $0x210] sm:$0xff] }
 0x13f   : > { %7389 = vmatprep.mubr.f32.mxu0 %v10595_v48  ;;  %v1640_v48 = vld [vmem:[#allocation7 + $0x218] sm:$0xff] }
 0x140   : > { %v8730_v51 = vpack.c.bf16 %v1640_v48, %v1639_v47  ;;  %v1646_v47 = vld [vmem:[#allocation7 + $0x248] sm:$0xff]  ;;  %v1649_v48 = vld [vmem:[#allocation7 + $0x260] sm:$0xff] }
 0x142   : > { %7390 = vmatmul.mubr.f32.gmra.mrb[26].mxu0 %v10599_v23  ;;  %v1641_v23 = vld [vmem:[#allocation7 + $0x220] sm:$0xff] }
 0x143   : > { %7392 = vmatprep.mubr.f32.mxu0 %v10601_v39  ;;  %v1643_v39 = vld [vmem:[#allocation7 + $0x230] sm:$0xff] }
 0x146   : > { %7393 = vmatmul.mubr.f32.gmra.mrb[28].mxu0 %v10605_v41  ;;  %v8734_v41 = vpack.c.bf16 %v1642_v43, %v1641_v23  ;;  %v1648_v43 = vld [vmem:[#allocation7 + $0x258] sm:$0xff]  ;;  %v1650_v23 = vld [vmem:[#allocation7 + $0x268] sm:$0xff] }
 0x147   : > { %7395 = vmatprep.mubr.f32.mxu0 %v10607_v50  ;;  %v1644_v50 = vld [vmem:[#allocation7 + $0x238] sm:$0xff] }
 0x14a   : > { %7396 = vmatmul.mubr.f32.gmra.mrb[30].mxu0 %v10611_v49  ;;  %v8738_v49 = vpack.c.bf16 %v1644_v50, %v1643_v39  ;;  %v8750_v39 = vpack.c.bf16 %v1650_v23, %v1649_v48  ;;  %v1652_v50 = vld [vmem:[#allocation7 + $0x278] sm:$0xff] }
 0x14b   : > { %7430 = vmatprep.mubr.f32.mxu0 %v10425_v53  ;;  %v1645_v53 = vld [vmem:[#allocation7 + $0x240] sm:$0xff]  ;;  %v1946_v48 = vld [vmem:[#allocation7 + $0x298] sm:$0xff] }
 0x14e   : > { %7431 = vmatmul.mubr.f32.vlgmr.msra.gmra.mrb[0].mxu0 %v10429_v57  ;;  %v8742_v57 = vpack.c.bf16 %v1646_v47, %v1645_v53  ;;  %v1943_v53 = vld [vmem:[#allocation7 + $0x280] sm:$0xff]  ;;  %v1944_v47 = vld [vmem:[#allocation7 + $0x288] sm:$0xff] }
 0x14f   : > { %8729 = vmatpush3.bf16.msra.mxu0 %v8726_v52  ;;  %7433 = vmatprep.mubr.f32.mxu0 %v10431_v58  ;;  %v1647_v52 = vld [vmem:[#allocation7 + $0x250] sm:$0xff] }
 0x150   : > { %8731 = vmatprep.subr.bf16.mxu0 %v8730_v51 }
 0x152   : > { %7434 = vmatmul.mubr.f32.gmra.mrb[2].mxu0 %v10435_v62 }
 0x153   : > { %7436 = vmatprep.mubr.f32.mxu0 %v10437_v63  ;;  %8733 = vmatpush3.bf16.msra.mxu0 %v8730_v51  ;;  %v8746_v51 = vpack.c.bf16 %v1648_v43, %v1647_v52  ;;  %v10643_v52 = vld [vmem:[#allocation2 + $0x180] sm:$0xff]  ;;  %v10647_v43 = vld [vmem:[#allocation2 + $0x188] sm:$0xff] }
 0x154   : > { %8735 = vmatprep.subr.bf16.mxu0 %v8734_v41 }
 0x156   : > { %7437 = vmatmul.mubr.f32.gmra.mrb[4].mxu0 %v10441_v3 }
 0x157   : > { %7439 = vmatprep.mubr.f32.mxu0 %v10443_v4  ;;  %8737 = vmatpush3.bf16.msra.mxu0 %v8734_v41  ;;  %v1651_v41 = vld [vmem:[#allocation7 + $0x270] sm:$0xff] }
 0x158   : > { %8739 = vmatprep.subr.bf16.mxu0 %v8738_v49 }
 0x15a   : > { %7440 = vmatmul.mubr.f32.gmra.mrb[6].mxu0 %v10447_v8 }
 0x15b   : > { %7442 = vmatprep.mubr.f32.mxu0 %v10449_v9  ;;  %8741 = vmatpush3.bf16.msra.mxu0 %v8738_v49  ;;  %v8754_v49 = vpack.c.bf16 %v1652_v50, %v1651_v41  ;;  %v1948_v41 = vld [vmem:[#allocation7 + $0x2a8] sm:$0xff] }
 0x15c   : > { %8743 = vmatprep.subr.bf16.mxu0 %v8742_v57 }
 0x15e   : > { %7443 = vmatmul.mubr.f32.gmra.mrb[8].mxu0 %v10453_v18 }
 0x15f   : > { %7445 = vmatprep.mubr.f32.mxu0 %v10455_v22  ;;  %8745 = vmatpush3.bf16.msra.mxu0 %v8742_v57  ;;  %v8758_v57 = vpack.c.bf16 %v1944_v47, %v1943_v53  ;;  %v1950_v53 = vld [vmem:[#allocation7 + $0x2b8] sm:$0xff] }
 0x160   : > { %8747 = vmatprep.subr.bf16.mxu0 %v8746_v51 }
 0x162   : > { %7446 = vmatmul.mubr.f32.gmra.mrb[10].mxu0 %v10459_v34 }
 0x163   : > { %7448 = vmatprep.mubr.f32.mxu0 %v10461_v40  ;;  %8749 = vmatpush3.bf16.msra.mxu0 %v8746_v51  ;;  %v1945_v51 = vld [vmem:[#allocation7 + $0x290] sm:$0xff] }
 0x164   : > { %8751 = vmatprep.subr.bf16.mxu0 %v8750_v39  ;;  %v8762_v23 = vpack.c.bf16 %v1946_v48, %v1945_v51  ;;  %v1952_v51 = vld [vmem:[#allocation7 + $0x2c8] sm:$0xff] }
 0x165   : > { %v1956_v48 = vld [vmem:[#allocation7 + $0x2e8] sm:$0xff] }
 0x166   : > { %7449 = vmatmul.mubr.f32.gmra.mrb[12].mxu0 %v10465_v54 }
 0x167   : > { %7451 = vmatprep.mubr.f32.mxu0 %v10467_v55  ;;  %8753 = vmatpush3.bf16.msra.mxu0 %v8750_v39  ;;  %v1947_v39 = vld [vmem:[#allocation7 + $0x2a0] sm:$0xff] }
 0x168   : > { %8755 = vmatprep.subr.bf16.mxu0 %v8754_v49  ;;  %v8766_v50 = vpack.c.bf16 %v1948_v41, %v1947_v39  ;;  %v2251_v39 = vld [vmem:[#allocation7 + $0x308] sm:$0xff]  ;;  %v11561_v41 = vld [vmem:[#allocation21_spill] sm:$0xff] }
 0x16a   : > { %7452 = vmatmul.mubr.f32.gmra.mrb[14].mxu0 %v10471_v59 }
 0x16b   : > { %7454 = vmatprep.mubr.f32.mxu0 %v10473_v60  ;;  %8757 = vmatpush3.bf16.msra.mxu0 %v8754_v49  ;;  %v1949_v49 = vld [vmem:[#allocation7 + $0x2b0] sm:$0xff] }
 0x16c   : > { %8759 = vmatprep.subr.bf16.mxu0 %v8758_v57  ;;  %v8770_v47 = vpack.c.bf16 %v1950_v53, %v1949_v49  ;;  %v2253_v49 = vld [vmem:[#allocation7 + $0x318] sm:$0xff] }
 0x16d   : > { %v11565_v53 = vld [vmem:[#allocation25_spill] sm:$0xff] }
 0x16e   : > { %7455 = vmatmul.mubr.f32.gmra.mrb[16].mxu0 %v10477_v61 }
 0x16f   : > { %7457 = vmatprep.mubr.f32.mxu0 %v10479_v0 }
 0x172   : > { %7458 = vmatmul.mubr.f32.gmra.mrb[18].mxu0 %v10483_v1 }
 0x173   : > { %7460 = vmatprep.mubr.f32.mxu0 %v10485_v2 }
 0x176   : > { %7461 = vmatmul.mubr.f32.gmra.mrb[20].mxu0 %v10489_v5 }
 0x177   : > { %7463 = vmatprep.mubr.f32.mxu0 %v10491_v6 }
 0x17a   : > { %7464 = vmatmul.mubr.f32.gmra.mrb[22].mxu0 %v10495_v7 }
 0x17b   : > { %7466 = vmatprep.mubr.f32.mxu0 %v10497_v10 }
 0x17e   : > { %7467 = vmatmul.mubr.f32.gmra.mrb[24].mxu0 %v10501_v11 }
 0x17f   : > { %7469 = vmatprep.mubr.f32.mxu0 %v10503_v12 }
 0x182   : > { %7470 = vmatmul.mubr.f32.gmra.mrb[26].mxu0 %v10515_v33 }
 0x183   : > { %7472 = vmatprep.mubr.f32.mxu0 %v10517_v44 }
 0x186   : > { %7473 = vmatmul.mubr.f32.gmra.mrb[28].mxu0 %v10521_v45 }
 0x187   : > { %7475 = vmatprep.mubr.f32.mxu0 %v10643_v52 }
 0x18a   : > { %7476 = vmatmul.mubr.f32.gmra.mrb[30].mxu0 %v10647_v43 }
 0x18b   : > { %7510 = vmatprep.mubr.f32.mxu0 %v10275_v13  ;;  %v1951_v13 = vld [vmem:[#allocation7 + $0x2c0] sm:$0xff] }
 0x18e   : > { %7511 = vmatmul.mubr.f32.vlgmr.msra.gmra.mrb[0].mxu0 %v10279_v14  ;;  %v8774_v14 = vpack.c.bf16 %v1952_v51, %v1951_v13  ;;  %v2254_v51 = vld [vmem:[#allocation7 + $0x320] sm:$0xff] }
 0x18f   : > { %8761 = vmatpush3.bf16.msra.mxu0 %v8758_v57  ;;  %7513 = vmatprep.mubr.f32.mxu0 %v10282_v15  ;;  %v1953_v15 = vld [vmem:[#allocation7 + $0x2d0] sm:$0xff]  ;;  %v1954_v57 = vld [vmem:[#allocation7 + $0x2d8] sm:$0xff] }
 0x190   : > { %8763 = vmatprep.subr.bf16.mxu0 %v8762_v23 }
 0x192   : > { %7514 = vmatmul.mubr.f32.gmra.mrb[2].mxu0 %v10285_v16  ;;  %v8778_v16 = vpack.c.bf16 %v1954_v57, %v1953_v15  ;;  %v11567_v15 = vld [vmem:[#allocation27_spill] sm:$0xff]  ;;  %v11568_v57 = vld [vmem:[#allocation28_spill] sm:$0xff] }
 0x193   : > { %7516 = vmatprep.mubr.f32.mxu0 %v10291_v17  ;;  %8765 = vmatpush3.bf16.msra.mxu0 %v8762_v23  ;;  %v1955_v17 = vld [vmem:[#allocation7 + $0x2e0] sm:$0xff]  ;;  %v1958_v23 = vld [vmem:[#allocation7 + $0x2f8] sm:$0xff] }
 0x194   : > { %8767 = vmatprep.subr.bf16.mxu0 %v8766_v50 }
 0x196   : > { %7517 = vmatmul.mubr.f32.gmra.mrb[4].mxu0 %v10295_v19  ;;  %v8782_v19 = vpack.c.bf16 %v1956_v48, %v1955_v17  ;;  %v2256_v17 = vld [vmem:[#allocation7 + $0x330] sm:$0xff]  ;;  %v2257_v48 = vld [vmem:[#allocation7 + $0x338] sm:$0xff] }
 0x197   : > { %7519 = vmatprep.mubr.f32.mxu0 %v10298_v20  ;;  %8769 = vmatpush3.bf16.msra.mxu0 %v8766_v50  ;;  %v1957_v20 = vld [vmem:[#allocation7 + $0x2f0] sm:$0xff] }
 0x198   : > { %8771 = vmatprep.subr.bf16.mxu0 %v8770_v47  ;;  %v2252_v50 = vld [vmem:[#allocation7 + $0x310] sm:$0xff] }
 0x199   : > { %v8794_v13 = vpack.c.bf16 %v2253_v49, %v2252_v50  ;;  %v2556_v49 = vld [vmem:[#allocation7 + $0x380] sm:$0xff] }
 0x19a   : > { %7520 = vmatmul.mubr.f32.gmra.mrb[6].mxu0 %v10301_v21  ;;  %v8786_v21 = vpack.c.bf16 %v1958_v23, %v1957_v20  ;;  %v11570_v20 = vld [vmem:[#allocation30_spill] sm:$0xff]  ;;  %v8802_v23 = vpack.c.bf16 %v2257_v48, %v2256_v17  ;;  %v11585_v17 = vld [vmem:[#allocation45_spill] sm:$0xff] }
 0x19b   : > { %7522 = vmatprep.mubr.f32.mxu0 %v10307_v24  ;;  %8773 = vmatpush3.bf16.msra.mxu0 %v8770_v47  ;;  %v2250_v24 = vld [vmem:[#allocation7 + $0x300] sm:$0xff] }
 0x19c   : > { %8775 = vmatprep.subr.bf16.mxu0 %v8774_v14  ;;  %v11566_v47 = vld [vmem:[#allocation26_spill] sm:$0xff] }
 0x19d   : > { %v11586_v48 = vld [vmem:[#allocation46_spill] sm:$0xff] }
 0x19e   : > { %7523 = vmatmul.mubr.f32.gmra.mrb[8].mxu0 %v10311_v25  ;;  %v8790_v25 = vpack.c.bf16 %v2251_v39, %v2250_v24  ;;  %v2259_v24 = vld [vmem:[#allocation7 + $0x348] sm:$0xff] }
 0x19f   : > { %7525 = vmatprep.mubr.f32.mxu0 %v10314_v26  ;;  %8777 = vmatpush3.bf16.msra.mxu0 %v8774_v14  ;;  %v11554_v26 = vld [vmem:[#allocation14_spill] sm:$0xff]  ;;  %v2255_v14 = vld [vmem:[#allocation7 + $0x328] sm:$0xff] }
 0x1a0   : > { %8779 = vmatprep.subr.bf16.mxu0 %v8778_v16  ;;  %v11571_v39 = vld [vmem:[#allocation31_spill] sm:$0xff] }
 0x1a2   : > { %7526 = vmatmul.mubr.f32.gmra.mrb[10].mxu0 %v10317_v27  ;;  %v11555_v27 = vld [vmem:[#allocation15_spill] sm:$0xff] }
 0x1a3   : > { %7528 = vmatprep.mubr.f32.mxu0 %v10323_v28  ;;  %8781 = vmatpush3.bf16.msra.mxu0 %v8778_v16  ;;  %v11556_v28 = vld [vmem:[#allocation16_spill] sm:$0xff]  ;;  %v8798_v16 = vpack.c.bf16 %v2255_v14, %v2254_v51  ;;  %v11578_v51 = vld [vmem:[#allocation38_spill] sm:$0xff]  ;;  %v11581_v14 = vld [vmem:[#allocation41_spill] sm:$0xff] }
 0x1a4   : > { %8783 = vmatprep.subr.bf16.mxu0 %v8782_v19 }
 0x1a6   : > { %7529 = vmatmul.mubr.f32.gmra.mrb[12].mxu0 %v10327_v30  ;;  %v11557_v30 = vld [vmem:[#allocation17_spill] sm:$0xff] }
 0x1a7   : > { %7531 = vmatprep.mubr.f32.mxu0 %v10330_v31  ;;  %8785 = vmatpush3.bf16.msra.mxu0 %v8782_v19  ;;  %v11558_v31 = vld [vmem:[#allocation18_spill] sm:$0xff]  ;;  %v11569_v19 = vld [vmem:[#allocation29_spill] sm:$0xff] }
 0x1a8   : > { %8787 = vmatprep.subr.bf16.mxu0 %v8786_v21 }
 0x1aa   : > { %7532 = vmatmul.mubr.f32.gmra.mrb[14].mxu0 %v10333_v32  ;;  %v11559_v32 = vld [vmem:[#allocation19_spill] sm:$0xff] }
 0x1ab   : > { %7534 = vmatprep.mubr.f32.mxu0 %v10339_v35  ;;  %8789 = vmatpush3.bf16.msra.mxu0 %v8786_v21  ;;  %v11560_v35 = vld [vmem:[#allocation20_spill] sm:$0xff]  ;;  %v2258_v21 = vld [vmem:[#allocation7 + $0x340] sm:$0xff] }
 0x1ac   : > { %8791 = vmatprep.subr.bf16.mxu0 %v8790_v25 }
 0x1ae   : > { %7535 = vmatmul.mubr.f32.gmra.mrb[16].mxu0 %v10343_v36  ;;  %v11562_v36 = vld [vmem:[#allocation22_spill] sm:$0xff] }
 0x1af   : > { %7537 = vmatprep.mubr.f32.mxu0 %v10346_v37  ;;  %v11563_v37 = vld [vmem:[#allocation23_spill] sm:$0xff] }
 0x1b2   : > { %7538 = vmatmul.mubr.f32.gmra.mrb[18].mxu0 %v10349_v38  ;;  %v11564_v38 = vld [vmem:[#allocation24_spill] sm:$0xff] }
 0x1b3   : > { %7540 = vmatprep.mubr.f32.mxu0 %v11554_v26  ;;  %v11572_v26 = vld [vmem:[#allocation32_spill] sm:$0xff] }
 0x1b6   : > { %7541 = vmatmul.mubr.f32.gmra.mrb[20].mxu0 %v11555_v27  ;;  %v2260_v27 = vld [vmem:[#allocation7 + $0x350] sm:$0xff] }
 0x1b7   : > { %7543 = vmatprep.mubr.f32.mxu0 %v11556_v28  ;;  %v2261_v28 = vld [vmem:[#allocation7 + $0x358] sm:$0xff] }
 0x1ba   : > { %7544 = vmatmul.mubr.f32.gmra.mrb[22].mxu0 %v11557_v30  ;;  %v11573_v30 = vld [vmem:[#allocation33_spill] sm:$0xff] }
 0x1bb   : > { %7546 = vmatprep.mubr.f32.mxu0 %v11558_v31  ;;  %v11574_v31 = vld [vmem:[#allocation34_spill] sm:$0xff] }
 0x1be   : > { %7547 = vmatmul.mubr.f32.gmra.mrb[24].mxu0 %v11559_v32  ;;  %v8810_v32 = vpack.c.bf16 %v2261_v28, %v2260_v27  ;;  %v2559_v27 = vld [vmem:[#allocation7 + $0x398] sm:$0xff] }
 0x1bf   : > { %7549 = vmatprep.mubr.f32.mxu0 %v11560_v35  ;;  %v2262_v35 = vld [vmem:[#allocation7 + $0x360] sm:$0xff] }
 0x1c2   : > { %7550 = vmatmul.mubr.f32.gmra.mrb[26].mxu0 %v11561_v41  ;;  %v2263_v41 = vld [vmem:[#allocation7 + $0x368] sm:$0xff] }
 0x1c3   : > { %7552 = vmatprep.mubr.f32.mxu0 %v11562_v36  ;;  %v8814_v36 = vpack.c.bf16 %v2263_v41, %v2262_v35  ;;  %v2562_v35 = vld [vmem:[#allocation7 + $0x3b0] sm:$0xff]  ;;  %v2563_v41 = vld [vmem:[#allocation7 + $0x3b8] sm:$0xff] }
 0x1c6   : > { %7553 = vmatmul.mubr.f32.gmra.mrb[28].mxu0 %v11563_v37  ;;  %v2264_v37 = vld [vmem:[#allocation7 + $0x370] sm:$0xff] }
 0x1c7   : > { %7555 = vmatprep.mubr.f32.mxu0 %v11564_v38  ;;  %v2265_v38 = vld [vmem:[#allocation7 + $0x378] sm:$0xff] }
 0x1c8   : > { %v8818_v50 = vpack.c.bf16 %v2265_v38, %v2264_v37  ;;  %v2565_v37 = vld [vmem:[#allocation7 + $0x3c8] sm:$0xff]  ;;  %v2567_v38 = vld [vmem:[#allocation7 + $0x3d8] sm:$0xff] }
 0x1ca   : > { %7556 = vmatmul.mubr.f32.gmra.mrb[30].mxu0 %v11565_v53  ;;  %v2557_v53 = vld [vmem:[#allocation7 + $0x388] sm:$0xff] }
 0x1cb   : > { %7590 = vmatprep.mubr.f32.mxu0 %v11566_v47  ;;  %v11575_v47 = vld [vmem:[#allocation35_spill] sm:$0xff] }
 0x1ce   : > { %7591 = vmatmul.mubr.f32.vlgmr.msra.gmra.mrb[0].mxu0 %v11567_v15  ;;  %v11582_v15 = vld [vmem:[#allocation42_spill] sm:$0xff] }
 0x1cf   : > { %8793 = vmatpush3.bf16.msra.mxu0 %v8790_v25  ;;  %7593 = vmatprep.mubr.f32.mxu0 %v11568_v57  ;;  %v8806_v25 = vpack.c.bf16 %v2259_v24, %v2258_v21  ;;  %v11583_v57 = vld [vmem:[#allocation43_spill] sm:$0xff]  ;;  %v11590_v21 = vld [vmem:[#allocation50_spill] sm:$0xff] }
 0x1d0   : > { %8795 = vmatprep.subr.bf16.mxu0 %v8794_v13  ;;  %v10711_v24 = vld [vmem:[#allocation2 + $0x182] sm:$0xff] }
 0x1d2   : > { %7594 = vmatmul.mubr.f32.gmra.mrb[2].mxu0 %v11569_v19  ;;  %v11587_v19 = vld [vmem:[#allocation47_spill] sm:$0xff] }
 0x1d3   : > { %7596 = vmatprep.mubr.f32.mxu0 %v11570_v20  ;;  %8797 = vmatpush3.bf16.msra.mxu0 %v8794_v13  ;;  %v11576_v13 = vld [vmem:[#allocation36_spill] sm:$0xff] }
 0x1d4   : > { %8799 = vmatprep.subr.bf16.mxu0 %v8798_v16  ;;  %v11588_v20 = vld [vmem:[#allocation48_spill] sm:$0xff] }
 0x1d6   : > { %7597 = vmatmul.mubr.f32.gmra.mrb[4].mxu0 %v11571_v39  ;;  %v11591_v39 = vld [vmem:[#allocation51_spill] sm:$0xff] }
 0x1d7   : > { %7599 = vmatprep.mubr.f32.mxu0 %v11572_v26  ;;  %8801 = vmatpush3.bf16.msra.mxu0 %v8798_v16  ;;  %v11584_v16 = vld [vmem:[#allocation44_spill] sm:$0xff] }
 0x1d8   : > { %8803 = vmatprep.subr.bf16.mxu0 %v8802_v23  ;;  %v10715_v26 = vld [vmem:[#allocation2 + $0x18a] sm:$0xff] }
 0x1da   : > { %7600 = vmatmul.mubr.f32.gmra.mrb[6].mxu0 %v11573_v30  ;;  %v2560_v30 = vld [vmem:[#allocation7 + $0x3a0] sm:$0xff] }
 0x1db   : > { %7602 = vmatprep.mubr.f32.mxu0 %v11574_v31  ;;  %8805 = vmatpush3.bf16.msra.mxu0 %v8802_v23  ;;  %v11589_v23 = vld [vmem:[#allocation49_spill] sm:$0xff]  ;;  %v2561_v31 = vld [vmem:[#allocation7 + $0x3a8] sm:$0xff] }
 0x1dc   : > { %8807 = vmatprep.subr.bf16.mxu0 %v8806_v25 }
 0x1de   : > { %7603 = vmatmul.mubr.f32.gmra.mrb[8].mxu0 %v10551_v42  ;;  %v8822_v42 = vpack.c.bf16 %v2557_v53, %v2556_v49  ;;  %v2571_v49 = vld [vmem:[#allocation7 + $0x3f8] sm:$0xff]  ;;  %v2863_v53 = vld [vmem:[#allocation7 + $0x408] sm:$0xff] }
 0x1df   : > { %7605 = vmatprep.mubr.f32.mxu0 %v10553_v56  ;;  %8809 = vmatpush3.bf16.msra.mxu0 %v8806_v25  ;;  %v11577_v56 = vld [vmem:[#allocation37_spill] sm:$0xff]  ;;  %v2558_v25 = vld [vmem:[#allocation7 + $0x390] sm:$0xff] }
 0x1e0   : > { %8811 = vmatprep.subr.bf16.mxu0 %v8810_v32  ;;  %v8826_v28 = vpack.c.bf16 %v2559_v27, %v2558_v25  ;;  %v2873_v25 = vld [vmem:[#allocation7 + $0x458] sm:$0xff] }
 0x1e1   : > { %v2532_v27 = vld [vmem:[#allocation2 + $0x99] sm:$0xff] }
 0x1e2   : > { %7606 = vmatmul.mubr.f32.gmra.mrb[10].mxu0 %v10557_v46  ;;  %v11579_v46 = vld [vmem:[#allocation39_spill] sm:$0xff] }
 0x1e3   : > { %7608 = vmatprep.mubr.f32.mxu0 %v10559_v29  ;;  %8813 = vmatpush3.bf16.msra.mxu0 %v8810_v32  ;;  %v11580_v29 = vld [vmem:[#allocation40_spill] sm:$0xff]  ;;  %v8830_v32 = vpack.c.bf16 %v2561_v31, %v2560_v30  ;;  %v2874_v31 = vld [vmem:[#allocation7 + $0x460] sm:$0xff] }
 0x1e4   : > { %8815 = vmatprep.subr.bf16.mxu0 %v8814_v36 }
 0x1e6   : > { %7609 = vmatmul.mubr.f32.gmra.mrb[12].mxu0 %v11575_v47  ;;  %v2868_v47 = vld [vmem:[#allocation7 + $0x430] sm:$0xff] }
 0x1e7   : > { %7611 = vmatprep.mubr.f32.mxu0 %v11576_v13  ;;  %8817 = vmatpush3.bf16.msra.mxu0 %v8814_v36  ;;  %v8834_v36 = vpack.c.bf16 %v2563_v41, %v2562_v35  ;;  %v2534_v35 = vld [vmem:[#allocation2 + $0xb1] sm:$0xff]  ;;  %v2535_v41 = vld [vmem:[#allocation2 + $0xc1] sm:$0xff] }
 0x1e8   : > { %8819 = vmatprep.subr.bf16.mxu0 %v8818_v50 }
 0x1ea   : > { %7612 = vmatmul.mubr.f32.gmra.mrb[14].mxu0 %v11577_v56  ;;  %v3419_v56 = vld [vmem:[#allocation9 + $0xb0] sm:$0xff] }
 0x1eb   : > { %7614 = vmatprep.mubr.f32.mxu0 %v11578_v51  ;;  %8821 = vmatpush3.bf16.msra.mxu0 %v8818_v50  ;;  %v2569_v50 = vld [vmem:[#allocation7 + $0x3e8] sm:$0xff]  ;;  %v3420_v51 = vld [vmem:[#allocation9 + $0xb8] sm:$0xff] }
 0x1ec   : > { %8823 = vmatprep.subr.bf16.mxu0 %v8822_v42 }
 0x1ee   : > { %7615 = vmatmul.mubr.f32.gmra.mrb[16].mxu0 %v11579_v46  ;;  %v2528_v46 = vld [vmem:[#allocation2 + $0x69] sm:$0xff] }
 0x1ef   : > { %7617 = vmatprep.mubr.f32.mxu0 %v11580_v29  ;;  %v2529_v29 = vld [vmem:[#allocation2 + $0x79] sm:$0xff] }
 0x1f2   : > { %7618 = vmatmul.mubr.f32.gmra.mrb[18].mxu0 %v11581_v14 }
 0x1f3   : > { %7620 = vmatprep.mubr.f32.mxu0 %v11582_v15  ;;  %v2870_v15 = vld [vmem:[#allocation7 + $0x440] sm:$0xff] }
 0x1f6   : > { %7621 = vmatmul.mubr.f32.gmra.mrb[20].mxu0 %v11583_v57  ;;  %v8898_v57 = vpack.c.bf16 %v3420_v51, %v3419_v56  ;;  %v2844_v56 = vld [vmem:[#allocation2 + $0xe2] sm:$0xff]  ;;  %v2845_v51 = vld [vmem:[#allocation2 + $0xf2] sm:$0xff] }
 0x1f7   : > { %7623 = vmatprep.mubr.f32.mxu0 %v11584_v16  ;;  %v2871_v16 = vld [vmem:[#allocation7 + $0x448] sm:$0xff] }
 0x1fa   : > { %7624 = vmatmul.mubr.f32.gmra.mrb[22].mxu0 %v11585_v17  ;;  %v3421_v17 = vld [vmem:[#allocation9 + $0xc0] sm:$0xff] }
 0x1fb   : > { %7626 = vmatprep.mubr.f32.mxu0 %v11586_v48  ;;  %v3422_v48 = vld [vmem:[#allocation9 + $0xc8] sm:$0xff] }
 0x1fe   : > { %7627 = vmatmul.mubr.f32.gmra.mrb[24].mxu0 %v11587_v19  ;;  %v2530_v19 = vld [vmem:[#allocation2 + $0x81] sm:$0xff] }
 0x1ff   : > { %7629 = vmatprep.mubr.f32.mxu0 %v11588_v20  ;;  %v2531_v20 = vld [vmem:[#allocation2 + $0x91] sm:$0xff] }
 0x202   : > { %7630 = vmatmul.mubr.f32.gmra.mrb[26].mxu0 %v11589_v23  ;;  %v8870_v23 = vpack.c.bf16 %v2871_v16, %v2870_v15  ;;  %v2849_v15 = vld [vmem:[#allocation2 + $0x122] sm:$0xff]  ;;  %v2851_v16 = vld [vmem:[#allocation2 + $0x13a] sm:$0xff] }
 0x203   : > { %7632 = vmatprep.mubr.f32.mxu0 %v11590_v21  ;;  %v8902_v21 = vpack.c.bf16 %v3422_v48, %v3421_v17  ;;  %v2852_v17 = vld [vmem:[#allocation2 + $0x142] sm:$0xff]  ;;  %v2853_v48 = vld [vmem:[#allocation2 + $0x152] sm:$0xff] }
 0x206   : > { %7633 = vmatmul.mubr.f32.gmra.mrb[28].mxu0 %v11591_v39  ;;  %v2872_v39 = vld [vmem:[#allocation7 + $0x450] sm:$0xff] }
 0x207   : > { %7635 = vmatprep.mubr.f32.mxu0 %v10711_v24  ;;  %v8874_v30 = vpack.c.bf16 %v2873_v25, %v2872_v39  ;;  %v2860_v39 = vld [vmem:[#allocation2 + $0x1a2] sm:$0xff]  ;;  %v3423_v25 = vld [vmem:[#allocation9 + $0xd0] sm:$0xff] }
 0x20a   : > { %7636 = vmatmul.mubr.f32.gmra.mrb[30].mxu0 %v10715_v26 }
 0x20b   : > { %7670 = vmatprep.mubr.f32.mxu0 %v10431_v58  ;;  %v2564_v58 = vld [vmem:[#allocation7 + $0x3c0] sm:$0xff] }
 0x20e   : > { %7671 = vmatmul.mubr.f32.vlgmr.msra.gmra.mrb[0].mxu0 %v10435_v62  ;;  %v8838_v62 = vpack.c.bf16 %v2565_v37, %v2564_v58  ;;  %v2876_v58 = vld [vmem:[#allocation7 + $0x470] sm:$0xff]  ;;  %v2877_v37 = vld [vmem:[#allocation7 + $0x478] sm:$0xff] }
 0x20f   : > { %8825 = vmatpush3.bf16.msra.mxu0 %v8822_v42  ;;  %7673 = vmatprep.mubr.f32.mxu0 %v10437_v63  ;;  %v2566_v63 = vld [vmem:[#allocation7 + $0x3d0] sm:$0xff]  ;;  %v2869_v42 = vld [vmem:[#allocation7 + $0x438] sm:$0xff] }
 0x210   : > { %8827 = vmatprep.subr.bf16.mxu0 %v8826_v28  ;;  %v8866_v14 = vpack.c.bf16 %v2869_v42, %v2868_v47  ;;  %v2841_v47 = vld [vmem:[#allocation2 + $0xc2] sm:$0xff]  ;;  %v2843_v42 = vld [vmem:[#allocation2 + $0xda] sm:$0xff] }
 0x212   : > { %7674 = vmatmul.mubr.f32.gmra.mrb[2].mxu0 %v10441_v3  ;;  %v8842_v3 = vpack.c.bf16 %v2567_v38, %v2566_v63  ;;  %v2537_v63 = vld [vmem:[#allocation2 + $0xd9] sm:$0xff]  ;;  %v8882_v38 = vpack.c.bf16 %v2877_v37, %v2876_v58  ;;  %v3365_v37 = vld [vmem:[#allocation9 + $0x8] sm:$0xff] }
 0x213   : > { %7676 = vmatprep.mubr.f32.mxu0 %v10443_v4  ;;  %8829 = vmatpush3.bf16.msra.mxu0 %v8826_v28  ;;  %v2568_v4 = vld [vmem:[#allocation7 + $0x3e0] sm:$0xff]  ;;  %v2533_v28 = vld [vmem:[#allocation2 + $0xa9] sm:$0xff] }
 0x214   : > { %8831 = vmatprep.subr.bf16.mxu0 %v8830_v32  ;;  %v3364_v58 = vld [vmem:[#allocation9] sm:$0xff] }
 0x216   : > { %7677 = vmatmul.mubr.f32.gmra.mrb[4].mxu0 %v10447_v8  ;;  %v8846_v8 = vpack.c.bf16 %v2569_v50, %v2568_v4  ;;  %v2539_v4 = vld [vmem:[#allocation2 + $0xf1] sm:$0xff]  ;;  %v2540_v50 = vld [vmem:[#allocation2 + $0xf9] sm:$0xff] }
 0x217   : > { %7679 = vmatprep.mubr.f32.mxu0 %v10449_v9  ;;  %8833 = vmatpush3.bf16.msra.mxu0 %v8830_v32  ;;  %v2570_v9 = vld [vmem:[#allocation7 + $0x3f0] sm:$0xff]  ;;  %v2875_v32 = vld [vmem:[#allocation7 + $0x468] sm:$0xff] }
 0x218   : > { %8835 = vmatprep.subr.bf16.mxu0 %v8834_v36 }
 0x21a   : > { %7680 = vmatmul.mubr.f32.gmra.mrb[6].mxu0 %v10453_v18  ;;  %v8850_v18 = vpack.c.bf16 %v2571_v49, %v2570_v9  ;;  %v2542_v9 = vld [vmem:[#allocation2 + $0x111] sm:$0xff]  ;;  %v2543_v49 = vld [vmem:[#allocation2 + $0x121] sm:$0xff] }
 0x21b   : > { %7682 = vmatprep.mubr.f32.mxu0 %v10455_v22  ;;  %8837 = vmatpush3.bf16.msra.mxu0 %v8834_v36  ;;  %v2862_v22 = vld [vmem:[#allocation7 + $0x400] sm:$0xff]  ;;  %v8878_v36 = vpack.c.bf16 %v2875_v32, %v2874_v31  ;;  %v3426_v31 = vld [vmem:[#allocation9 + $0xe8] sm:$0xff] }
 0x21c   : > { %8839 = vmatprep.subr.bf16.mxu0 %v8838_v62 }
 0x21e   : > { %7683 = vmatmul.mubr.f32.gmra.mrb[8].mxu0 %v10459_v34  ;;  %v8854_v34 = vpack.c.bf16 %v2863_v53, %v2862_v22  ;;  %v2545_v22 = vld [vmem:[#allocation2 + $0x139] sm:$0xff]  ;;  %v2546_v53 = vld [vmem:[#allocation2 + $0x141] sm:$0xff] }
 0x21f   : > { %7685 = vmatprep.mubr.f32.mxu0 %v10461_v40  ;;  %8841 = vmatpush3.bf16.msra.mxu0 %v8838_v62  ;;  %v10748_v40 = vld [vmem:[#allocation2] sm:$0xff]  ;;  %v2536_v62 = vld [vmem:[#allocation2 + $0xc9] sm:$0xff] }
 0x220   : > { %8843 = vmatprep.subr.bf16.mxu0 %v8842_v3 }
 0x222   : > { %7686 = vmatmul.mubr.f32.gmra.mrb[10].mxu0 %v10465_v54  ;;  %v2523_v54 = vld [vmem:[#allocation2 + $0x31] sm:$0xff] }
 0x223   : > { %7688 = vmatprep.mubr.f32.mxu0 %v10467_v55  ;;  %8845 = vmatpush3.bf16.msra.mxu0 %v8842_v3  ;;  %v2864_v55 = vld [vmem:[#allocation7 + $0x410] sm:$0xff]  ;;  %v2538_v3 = vld [vmem:[#allocation2 + $0xe1] sm:$0xff] }
 0x224   : > { %8847 = vmatprep.subr.bf16.mxu0 %v8846_v8 }
 0x226   : > { %7689 = vmatmul.mubr.f32.gmra.mrb[12].mxu0 %v10471_v59  ;;  %v2865_v59 = vld [vmem:[#allocation7 + $0x418] sm:$0xff] }
 0x227   : > { %7691 = vmatprep.mubr.f32.mxu0 %v10473_v60  ;;  %8849 = vmatpush3.bf16.msra.mxu0 %v8846_v8  ;;  %v3413_v60 = vld [vmem:[#allocation9 + $0x80] sm:$0xff]  ;;  %v2541_v8 = vld [vmem:[#allocation2 + $0x109] sm:$0xff] }
 0x228   : > { %8851 = vmatprep.subr.bf16.mxu0 %v8850_v18 }
 0x22a   : > { %7692 = vmatmul.mubr.f32.gmra.mrb[14].mxu0 %v10477_v61  ;;  %v3414_v61 = vld [vmem:[#allocation9 + $0x88] sm:$0xff] }
 0x22b   : > { %7694 = vmatprep.mubr.f32.mxu0 %v10479_v0  ;;  %8853 = vmatpush3.bf16.msra.mxu0 %v8850_v18  ;;  %v3415_v0 = vld [vmem:[#allocation9 + $0x90] sm:$0xff] }
 0x22c   : > { %8855 = vmatprep.subr.bf16.mxu0 %v8854_v34  ;;  %v2544_v18 = vld [vmem:[#allocation2 + $0x129] sm:$0xff] }
 0x22e   : > { %7695 = vmatmul.mubr.f32.gmra.mrb[16].mxu0 %v10483_v1  ;;  %v2524_v1 = vld [vmem:[#allocation2 + $0x39] sm:$0xff] }
 0x22f   : > { %7697 = vmatprep.mubr.f32.mxu0 %v10485_v2  ;;  %v8886_v2 = vpack.c.bf16 %v3414_v61, %v3413_v60  ;;  %v9759_v60 = vld [vmem:[#allocation2 + $0x181] sm:$0xff]  ;;  %v2553_v61 = vld [vmem:[#allocation2 + $0x199] sm:$0xff] }
 0x231   : > { %8887 = vmatprep.subr.bf16.mxu1 %v8886_v2 }
 0x232   : > { %7698 = vmatmul.mubr.f32.gmra.mrb[18].mxu0 %v10489_v5  ;;  %v3416_v5 = vld [vmem:[#allocation9 + $0x98] sm:$0xff]  ;;  %8889 = vmatpush3.bf16.msra.mxu1 %v8886_v2 }
 0x233   : > { %7700 = vmatprep.mubr.f32.mxu0 %v10491_v6  ;;  %v2525_v6 = vld [vmem:[#allocation2 + $0x49] sm:$0xff]  ;;  %v2829_v2 = vld [vmem:[#allocation2 + $0x32] sm:$0xff] }
 0x236   : > { %7701 = vmatmul.mubr.f32.gmra.mrb[20].mxu0 %v10495_v7  ;;  %v8858_v7 = vpack.c.bf16 %v2865_v59, %v2864_v55  ;;  %v2549_v55 = vld [vmem:[#allocation2 + $0x169] sm:$0xff]  ;;  %v2550_v59 = vld [vmem:[#allocation2 + $0x171] sm:$0xff] }
 0x237   : > { %7703 = vmatprep.mubr.f32.mxu0 %v10497_v10  ;;  %v2866_v10 = vld [vmem:[#allocation7 + $0x420] sm:$0xff] }
 0x23a   : > { %7704 = vmatmul.mubr.f32.gmra.mrb[22].mxu0 %v10501_v11  ;;  %v8890_v11 = vpack.c.bf16 %v3416_v5, %v3415_v0  ;;  %v9760_v0 = vld [vmem:[#allocation2 + $0x189] sm:$0xff]  ;;  %v2830_v5 = vld [vmem:[#allocation2 + $0x3a] sm:$0xff] }
 0x23b   : > { %7706 = vmatprep.mubr.f32.mxu0 %v10503_v12  ;;  %v2867_v12 = vld [vmem:[#allocation7 + $0x428] sm:$0xff] }
 0x23c   : > { %8891 = vmatprep.subr.bf16.mxu1 %v8890_v11 }
 0x23d   : > { %8893 = vmatpush3.bf16.msra.mxu1 %v8890_v11  ;;  %v2834_v11 = vld [vmem:[#allocation2 + $0x6a] sm:$0xff] }
 0x23e   : > { %7707 = vmatmul.mubr.f32.gmra.mrb[24].mxu0 %v10515_v33  ;;  %v3417_v33 = vld [vmem:[#allocation9 + $0xa0] sm:$0xff] }
 0x23f   : > { %7709 = vmatprep.mubr.f32.mxu0 %v10517_v44  ;;  %v3418_v44 = vld [vmem:[#allocation9 + $0xa8] sm:$0xff] }
 0x240   : > { %v8894_v13 = vpack.c.bf16 %v3418_v44, %v3417_v33  ;;  %v2836_v33 = vld [vmem:[#allocation2 + $0x82] sm:$0xff]  ;;  %v2837_v44 = vld [vmem:[#allocation2 + $0x92] sm:$0xff] }
 0x242   : > { %7710 = vmatmul.mubr.f32.gmra.mrb[26].mxu0 %v10521_v45  ;;  %v2526_v45 = vld [vmem:[#allocation2 + $0x51] sm:$0xff]  ;;  %8895 = vmatprep.subr.bf16.mxu1 %v8894_v13 }
 0x243   : > { %7712 = vmatprep.mubr.f32.mxu0 %v10643_v52  ;;  %v2527_v52 = vld [vmem:[#allocation2 + $0x61] sm:$0xff]  ;;  %8897 = vmatpush3.bf16.msra.mxu1 %v8894_v13  ;;  %v2842_v13 = vld [vmem:[#allocation2 + $0xca] sm:$0xff] }
 0x244   : > { %8899 = vmatprep.subr.bf16.mxu1 %v8898_v57 }
 0x246   : > { %7713 = vmatmul.mubr.f32.gmra.mrb[28].mxu0 %v10647_v43  ;;  %v8862_v43 = vpack.c.bf16 %v2867_v12, %v2866_v10  ;;  %v2833_v10 = vld [vmem:[#allocation2 + $0x62] sm:$0xff]  ;;  %v2835_v12 = vld [vmem:[#allocation2 + $0x7a] sm:$0xff] }
 0x247   : > { %7715 = vmatprep.mubr.f32.mxu0 %v10748_v40  ;;  %8901 = vmatpush3.bf16.msra.mxu1 %v8898_v57  ;;  %v2850_v57 = vld [vmem:[#allocation2 + $0x12a] sm:$0xff] }
 0x248   : > { %8903 = vmatprep.subr.bf16.mxu1 %v8902_v21 }
 0x24a   : > { %7716 = vmatmul.mubr.f32.gmra.mrb[30].mxu0 %v10748_v40 }
 0x24b   : > { %7750 = vmatprep.mubr.f32.mxu0 %v2523_v54  ;;  %8905 = vmatpush3.bf16.msra.mxu1 %v8902_v21  ;;  %v2548_v54 = vld [vmem:[#allocation2 + $0x159] sm:$0xff] }
 0x24c   : > { %v2859_v21 = vld [vmem:[#allocation2 + $0x19a] sm:$0xff] }
 0x24e   : > { %7751 = vmatmul.mubr.f32.vlgmr.msra.gmra.mrb[0].mxu0 %v2524_v1  ;;  %v2554_v1 = vld [vmem:[#allocation2 + $0x1a1] sm:$0xff] }
 0x24f   : > { %8857 = vmatpush3.bf16.msra.mxu0 %v8854_v34  ;;  %7753 = vmatprep.mubr.f32.mxu0 %v2525_v6  ;;  %v2547_v34 = vld [vmem:[#allocation2 + $0x151] sm:$0xff] }
 0x250   : > { %8859 = vmatprep.subr.bf16.mxu0 %v8858_v7  ;;  %v2831_v6 = vld [vmem:[#allocation2 + $0x4a] sm:$0xff] }
 0x252   : > { %7754 = vmatmul.mubr.f32.gmra.mrb[2].mxu0 %v2526_v45  ;;  %v2838_v45 = vld [vmem:[#allocation2 + $0x9a] sm:$0xff] }
 0x253   : > { %7756 = vmatprep.mubr.f32.mxu0 %v2527_v52  ;;  %8861 = vmatpush3.bf16.msra.mxu0 %v8858_v7  ;;  %v2832_v7 = vld [vmem:[#allocation2 + $0x52] sm:$0xff]  ;;  %v2839_v52 = vld [vmem:[#allocation2 + $0xaa] sm:$0xff] }
 0x254   : > { %8863 = vmatprep.subr.bf16.mxu0 %v8862_v43 }
 0x256   : > { %7757 = vmatmul.mubr.f32.gmra.mrb[4].mxu0 %v2528_v46  ;;  %v2846_v46 = vld [vmem:[#allocation2 + $0xfa] sm:$0xff] }
 0x257   : > { %7759 = vmatprep.mubr.f32.mxu0 %v2529_v29  ;;  %8865 = vmatpush3.bf16.msra.mxu0 %v8862_v43  ;;  %v2840_v43 = vld [vmem:[#allocation2 + $0xb2] sm:$0xff]  ;;  %v2847_v29 = vld [vmem:[#allocation2 + $0x10a] sm:$0xff] }
 0x258   : > { %8867 = vmatprep.subr.bf16.mxu0 %v8866_v14 }
 0x25a   : > { %7760 = vmatmul.mubr.f32.gmra.mrb[6].mxu0 %v2530_v19  ;;  %v2854_v19 = vld [vmem:[#allocation2 + $0x15a] sm:$0xff] }
 0x25b   : > { %7762 = vmatprep.mubr.f32.mxu0 %v2531_v20  ;;  %8869 = vmatpush3.bf16.msra.mxu0 %v8866_v14  ;;  %v2848_v14 = vld [vmem:[#allocation2 + $0x112] sm:$0xff]  ;;  %v2855_v20 = vld [vmem:[#allocation2 + $0x16a] sm:$0xff] }
 0x25c   : > { %8871 = vmatprep.subr.bf16.mxu0 %v8870_v23 }
 0x25e   : > { %7763 = vmatmul.mubr.f32.gmra.mrb[8].mxu0 %v2532_v27  ;;  %v3424_v27 = vld [vmem:[#allocation9 + $0xd8] sm:$0xff] }
 0x25f   : > { %7765 = vmatprep.mubr.f32.mxu0 %v2533_v28  ;;  %8873 = vmatpush3.bf16.msra.mxu0 %v8870_v23  ;;  %v2856_v23 = vld [vmem:[#allocation2 + $0x172] sm:$0xff]  ;;  %v8906_v28 = vpack.c.bf16 %v3424_v27, %v3423_v25 }
 0x260   : > { %8875 = vmatprep.subr.bf16.mxu0 %v8874_v30 }
 0x261   : > { %8907 = vmatprep.subr.bf16.mxu1 %v8906_v28 }
 0x262   : > { %7766 = vmatmul.mubr.f32.gmra.mrb[10].mxu0 %v2534_v35  ;;  %8909 = vmatpush3.bf16.msra.mxu1 %v8906_v28  ;;  %v3427_v35 = vld [vmem:[#allocation9 + $0xf0] sm:$0xff] }
 0x263   : > { %7768 = vmatprep.mubr.f32.mxu0 %v2535_v41  ;;  %8877 = vmatpush3.bf16.msra.mxu0 %v8874_v30  ;;  %v3425_v30 = vld [vmem:[#allocation9 + $0xe0] sm:$0xff]  ;;  %v3428_v41 = vld [vmem:[#allocation9 + $0xf8] sm:$0xff] }
 0x264   : > { %8879 = vmatprep.subr.bf16.mxu0 %v8878_v36  ;;  %v8910_v32 = vpack.c.bf16 %v3426_v31, %v3425_v30 }
 0x266   : > { %7769 = vmatmul.mubr.f32.gmra.mrb[12].mxu0 %v2536_v62  ;;  %8911 = vmatprep.subr.bf16.mxu1 %v8910_v32  ;;  %v8918_v62 = vpack.c.bf16 %v3365_v37, %v3364_v58 }
 0x267   : > { %7771 = vmatprep.mubr.f32.mxu0 %v2537_v63  ;;  %8881 = vmatpush3.bf16.msra.mxu0 %v8878_v36  ;;  %v8914_v36 = vpack.c.bf16 %v3428_v41, %v3427_v35  ;;  %v3366_v63 = vld [vmem:[#allocation9 + $0x10] sm:$0xff] }
 0x268   : > { %8883 = vmatprep.subr.bf16.mxu0 %v8882_v38  ;;  %8913 = vmatpush3.bf16.msra.mxu1 %v8910_v32 }
 0x269   : > { %8915 = vmatprep.subr.bf16.mxu1 %v8914_v36 }
 0x26a   : > { %7772 = vmatmul.mubr.f32.gmra.mrb[14].mxu0 %v2538_v3 }
 0x26b   : > { %7774 = vmatprep.mubr.f32.mxu0 %v2539_v4  ;;  %8885 = vmatpush3.bf16.msra.mxu0 %v8882_v38  ;;  %v3367_v38 = vld [vmem:[#allocation9 + $0x18] sm:$0xff]  ;;  %v3368_v4 = vld [vmem:[#allocation9 + $0x20] sm:$0xff] }
 0x26c   : > { %8917 = vmatpush3.bf16.msra.mxu1 %v8914_v36  ;;  %v8922_v3 = vpack.c.bf16 %v3367_v38, %v3366_v63 }
 0x26d   : > { %8919 = vmatprep.subr.bf16.mxu1 %v8918_v62 }
 0x26e   : > { %7775 = vmatmul.mubr.f32.gmra.mrb[16].mxu0 %v2540_v50  ;;  %v3369_v50 = vld [vmem:[#allocation9 + $0x28] sm:$0xff] }
 0x26f   : > { %7777 = vmatprep.mubr.f32.mxu0 %v2541_v8  ;;  %v8926_v8 = vpack.c.bf16 %v3369_v50, %v3368_v4 }
 0x272   : > { %7778 = vmatmul.mubr.f32.gmra.mrb[18].mxu0 %v2542_v9  ;;  %v3370_v9 = vld [vmem:[#allocation9 + $0x30] sm:$0xff] }
 0x273   : > { %7780 = vmatprep.mubr.f32.mxu0 %v2543_v49  ;;  %v3371_v49 = vld [vmem:[#allocation9 + $0x38] sm:$0xff] }
 0x276   : > { %7781 = vmatmul.mubr.f32.gmra.mrb[20].mxu0 %v2544_v18  ;;  %v8930_v18 = vpack.c.bf16 %v3371_v49, %v3370_v9 }
 0x277   : > { %7783 = vmatprep.mubr.f32.mxu0 %v2545_v22  ;;  %v3372_v22 = vld [vmem:[#allocation9 + $0x40] sm:$0xff] }
 0x27a   : > { %7784 = vmatmul.mubr.f32.gmra.mrb[22].mxu0 %v2546_v53  ;;  %v3373_v53 = vld [vmem:[#allocation9 + $0x48] sm:$0xff] }
 0x27b   : > { %7786 = vmatprep.mubr.f32.mxu0 %v2547_v34  ;;  %v8934_v34 = vpack.c.bf16 %v3373_v53, %v3372_v22 }
 0x27e   : > { %7787 = vmatmul.mubr.f32.gmra.mrb[24].mxu0 %v2548_v54  ;;  %v3374_v54 = vld [vmem:[#allocation9 + $0x50] sm:$0xff] }
 0x27f   : > { %7789 = vmatprep.mubr.f32.mxu0 %v2549_v55  ;;  %v3375_v55 = vld [vmem:[#allocation9 + $0x58] sm:$0xff] }
 0x282   : > { %7790 = vmatmul.mubr.f32.gmra.mrb[26].mxu0 %v2550_v59  ;;  %v8938_v59 = vpack.c.bf16 %v3375_v55, %v3374_v54 }
 0x283   : > { %7792 = vmatprep.mubr.f32.mxu0 %v9759_v60  ;;  %v3376_v60 = vld [vmem:[#allocation9 + $0x60] sm:$0xff] }
 0x286   : > { %7793 = vmatmul.mubr.f32.gmra.mrb[28].mxu0 %v9760_v0 }
 0x287   : > { %7795 = vmatprep.mubr.f32.mxu0 %v2553_v61  ;;  %v3377_v61 = vld [vmem:[#allocation9 + $0x68] sm:$0xff] }
 0x288   : > { %v8942_v0 = vpack.c.bf16 %v3377_v61, %v3376_v60 }
 0x28a   : > { %7796 = vmatmul.mubr.f32.gmra.mrb[30].mxu0 %v2554_v1  ;;  %v3378_v1 = vld [vmem:[#allocation9 + $0x70] sm:$0xff] }
 0x28b   : > { %7830 = vmatprep.mubr.f32.mxu0 %v2829_v2  ;;  %v3379_v2 = vld [vmem:[#allocation9 + $0x78] sm:$0xff] }
 0x28e   : > { %7831 = vmatmul.mubr.f32.vlgmr.msra.gmra.mrb[0].mxu0 %v2830_v5  ;;  %v8946_v5 = vpack.c.bf16 %v3379_v2, %v3378_v1 }
 0x28f   : > { %7833 = vmatprep.mubr.f32.mxu0 %v2831_v6  ;;  %v3912_v6 = vld [vmem:[#allocation9 + $0x100] sm:$0xff] }
 0x292   : > { %7834 = vmatmul.mubr.f32.gmra.mrb[2].mxu0 %v2832_v7  ;;  %v3913_v7 = vld [vmem:[#allocation9 + $0x108] sm:$0xff] }
 0x293   : > { %7836 = vmatprep.mubr.f32.mxu0 %v2833_v10  ;;  %v10754_v10 = vpack.c.bf16 %v3913_v7, %v3912_v6 }
 0x296   : > { %7837 = vmatmul.mubr.f32.gmra.mrb[4].mxu0 %v2834_v11  ;;  %v10760_v11 = vld [vmem:[%s11421_s2] ss:$0 sm:$0xff] }
 0x297   : > { %7839 = vmatprep.mubr.f32.mxu0 %v2835_v12 }
 0x29a   : > { %7840 = vmatmul.mubr.f32.gmra.mrb[6].mxu0 %v2836_v33  ;;  %v10765_v33 = vld [vmem:[%s11422_s3] ss:$0 sm:$0xff] }
 0x29b   : > { %7842 = vmatprep.mubr.f32.mxu0 %v2837_v44 }
 0x29e   : > { %7843 = vmatmul.mubr.f32.gmra.mrb[8].mxu0 %v2838_v45 }
 0x29f   : > { %7845 = vmatprep.mubr.f32.mxu0 %v2839_v52 }
 0x2a2   : > { %7846 = vmatmul.mubr.f32.gmra.mrb[10].mxu0 %v2840_v43 }
 0x2a3   : > { %7848 = vmatprep.mubr.f32.mxu0 %v2841_v47 }
 0x2a6   : > { %7849 = vmatmul.mubr.f32.gmra.mrb[12].mxu0 %v2842_v13 }
 0x2a7   : > { %7851 = vmatprep.mubr.f32.mxu0 %v2843_v42 }
 0x2aa   : > { %7852 = vmatmul.mubr.f32.gmra.mrb[14].mxu0 %v2844_v56 }
 0x2ab   : > { %7854 = vmatprep.mubr.f32.mxu0 %v2845_v51 }
 0x2ae   : > { %7855 = vmatmul.mubr.f32.gmra.mrb[16].mxu0 %v2846_v46 }
 0x2af   : > { %7857 = vmatprep.mubr.f32.mxu0 %v2847_v29 }
 0x2b2   : > { %7858 = vmatmul.mubr.f32.gmra.mrb[18].mxu0 %v2848_v14 }
 0x2b3   : > { %7860 = vmatprep.mubr.f32.mxu0 %v2849_v15 }
 0x2b6   : > { %7861 = vmatmul.mubr.f32.gmra.mrb[20].mxu0 %v2850_v57 }
 0x2b7   : > { %7863 = vmatprep.mubr.f32.mxu0 %v2851_v16 }
 0x2ba   : > { %7864 = vmatmul.mubr.f32.gmra.mrb[22].mxu0 %v2852_v17 }
 0x2bb   : > { %7866 = vmatprep.mubr.f32.mxu0 %v2853_v48 }
 0x2be   : > { %7867 = vmatmul.mubr.f32.gmra.mrb[24].mxu0 %v2854_v19 }
 0x2bf   : > { %7869 = vmatprep.mubr.f32.mxu0 %v2855_v20 }
 0x2c2   : > { %7870 = vmatmul.mubr.f32.gmra.mrb[26].mxu0 %v2856_v23 }
 0x2c3   : > { %7872 = vmatprep.mubr.f32.mxu0 %v10711_v24  ;;  %v3380_v24 = vld [vmem:[#allocation3 + $0x1] sm:$0xff] }
 0x2c4   : > { %7910 = vmatprep.mubr.f32.mxu1 %v3380_v24 }
 0x2c6   : > { %7873 = vmatmul.mubr.f32.gmra.mrb[28].mxu0 %v10715_v26  ;;  %v3381_v26 = vld [vmem:[#allocation3 + $0x9] sm:$0xff] }
 0x2c7   : > { %7875 = vmatprep.mubr.f32.mxu0 %v2859_v21  ;;  %7911 = vmatmul.mubr.f32.vlgmr.msra.gmra.mrb[0].mxu1 %v3381_v26 }
 0x2c8   : > { %8921 = vmatpush3.bf16.msra.mxu1 %v8918_v62 }
 0x2c9   : > { %8923 = vmatprep.subr.bf16.mxu1 %v8922_v3 }
 0x2ca   : > { %7876 = vmatmul.mubr.f32.gmra.mrb[30].mxu0 %v2860_v39 }
 0x2cc   : > { %8925 = vmatpush3.bf16.msra.mxu1 %v8922_v3 }
 0x2cd   : > { %8927 = vmatprep.subr.bf16.mxu1 %v8926_v8 }
 0x2d0   : > { %8929 = vmatpush3.bf16.msra.mxu1 %v8926_v8 }
 0x2d1   : > { %8931 = vmatprep.subr.bf16.mxu1 %v8930_v18 }
 0x2d4   : > { %8933 = vmatpush3.bf16.msra.mxu1 %v8930_v18 }
 0x2d5   : > { %8935 = vmatprep.subr.bf16.mxu1 %v8934_v34 }
 0x2d8   : > { %8937 = vmatpush3.bf16.msra.mxu1 %v8934_v34 }
 0x2d9   : > { %8939 = vmatprep.subr.bf16.mxu1 %v8938_v59 }
 0x2dc   : > { %8941 = vmatpush3.bf16.msra.mxu1 %v8938_v59 }
 0x2dd   : > { %8943 = vmatprep.subr.bf16.mxu1 %v8942_v0 }
 0x2e0   : > { %8945 = vmatpush3.bf16.msra.mxu1 %v8942_v0 }
 0x2e1   : > { %8947 = vmatprep.subr.bf16.mxu1 %v8946_v5 }
 0x2e4   : > { %8949 = vmatpush3.bf16.msra.mxu1 %v8946_v5 }
 0x2e5   : > { %8951 = vmatprep.subr.bf16.mxu1 %v10754_v10 }
 0x361   : > { %v7832_v12 = vpop.f32.mrb[0].mxu0 }
 0x362   : > { %v3143_v44 = vmul.f32 %v7832_v12, %v10760_v11  ;;  %v2944_v45 = vpop.f32.mrb[1].mxu0 }
 0x363   : > { %v3142_v52 = vmul.f32 %v10760_v11, %v2944_v45 }
 0x364   : > { %v3182_v43 = vadd.f32 %v10765_v33, %v3143_v44 }
 0x365   : > { %v3181_v47 = vadd.f32 %v10765_v33, %v3142_v52  ;;  %v7835_v13 = vpop.f32.mrb[2].mxu0 }
 0x366   : > { %v3214_v42 = vmax.f32 %v3182_v43, 0.0  ;;  %v3145_v56 = vmul.f32 %v7835_v13, %v10760_v11  ;;  %v2954_v51 = vpop.f32.mrb[3].mxu0 }
 0x367   : > { %v3213_v46 = vmax.f32 %v3181_v47, 0.0  ;;  %v3144_v29 = vmul.f32 %v10760_v11, %v2954_v51 }
 0x368   : > { %3301 = vst [vmem:[#allocation3 + $0x21] sm:$0xff] %v3214_v42  ;;  %v3184_v14 = vadd.f32 %v10765_v33, %v3145_v56 }
 0x369   : > { %3300 = vst [vmem:[#allocation3 + $0x19] sm:$0xff] %v3213_v46  ;;  %v3183_v15 = vadd.f32 %v10765_v33, %v3144_v29  ;;  %v7838_v57 = vpop.f32.mrb[4].mxu0  ;;  %7913 = vmatprep.mubr.f32.mxu1 %v3213_v46 }
 0x36a   : > { %v3216_v16 = vmax.f32 %v3184_v14, 0.0  ;;  %v3147_v17 = vmul.f32 %v7838_v57, %v10760_v11  ;;  %v2964_v48 = vpop.f32.mrb[5].mxu0  ;;  %7914 = vmatmul.mubr.f32.gmra.mrb[2].mxu1 %v3214_v42 }
 0x36b   : > { %v3215_v19 = vmax.f32 %v3183_v15, 0.0  ;;  %v3146_v20 = vmul.f32 %v10760_v11, %v2964_v48 }
 0x36c   : > { %3303 = vst [vmem:[#allocation3 + $0x39] sm:$0xff] %v3216_v16  ;;  %v3186_v23 = vadd.f32 %v10765_v33, %v3147_v17 }
 0x36d   : > { %3302 = vst [vmem:[#allocation3 + $0x31] sm:$0xff] %v3215_v19  ;;  %v3185_v21 = vadd.f32 %v10765_v33, %v3146_v20  ;;  %v7841_v39 = vpop.f32.mrb[6].mxu0  ;;  %7916 = vmatprep.mubr.f32.mxu1 %v3215_v19 }
 0x36e   : > { %v3218_v25 = vmax.f32 %v3186_v23, 0.0  ;;  %v3149_v27 = vmul.f32 %v7841_v39, %v10760_v11  ;;  %v2974_v28 = vpop.f32.mrb[7].mxu0  ;;  %7917 = vmatmul.mubr.f32.gmra.mrb[4].mxu1 %v3216_v16 }
 0x36f   : > { %v3217_v30 = vmax.f32 %v3185_v21, 0.0  ;;  %v3148_v31 = vmul.f32 %v10760_v11, %v2974_v28 }
 0x370   : > { %3305 = vst [vmem:[#allocation3 + $0x51] sm:$0xff] %v3218_v25  ;;  %v3188_v32 = vadd.f32 %v10765_v33, %v3149_v27 }
 0x371   : > { %3304 = vst [vmem:[#allocation3 + $0x49] sm:$0xff] %v3217_v30  ;;  %v3187_v35 = vadd.f32 %v10765_v33, %v3148_v31  ;;  %v7844_v41 = vpop.f32.mrb[8].mxu0  ;;  %7919 = vmatprep.mubr.f32.mxu1 %v3217_v30 }
 0x372   : > { %v3220_v36 = vmax.f32 %v3188_v32, 0.0  ;;  %v3151_v24 = vmul.f32 %v7844_v41, %v10760_v11  ;;  %v2984_v26 = vpop.f32.mrb[9].mxu0  ;;  %7920 = vmatmul.mubr.f32.gmra.mrb[6].mxu1 %v3218_v25 }
 0x373   : > { %v3219_v58 = vmax.f32 %v3187_v35, 0.0  ;;  %v3150_v37 = vmul.f32 %v10760_v11, %v2984_v26 }
 0x374   : > { %3307 = vst [vmem:[#allocation3 + $0x69] sm:$0xff] %v3220_v36  ;;  %v3190_v62 = vadd.f32 %v10765_v33, %v3151_v24 }
 0x375   : > { %3306 = vst [vmem:[#allocation3 + $0x61] sm:$0xff] %v3219_v58  ;;  %v3189_v63 = vadd.f32 %v10765_v33, %v3150_v37  ;;  %v7847_v38 = vpop.f32.mrb[10].mxu0  ;;  %7922 = vmatprep.mubr.f32.mxu1 %v3219_v58 }
 0x376   : > { %v3222_v3 = vmax.f32 %v3190_v62, 0.0  ;;  %v3153_v4 = vmul.f32 %v7847_v38, %v10760_v11  ;;  %v2994_v50 = vpop.f32.mrb[11].mxu0  ;;  %7923 = vmatmul.mubr.f32.gmra.mrb[8].mxu1 %v3220_v36 }
 0x377   : > { %v3221_v8 = vmax.f32 %v3189_v63, 0.0  ;;  %v3152_v9 = vmul.f32 %v10760_v11, %v2994_v50 }
 0x378   : > { %3309 = vst [vmem:[#allocation3 + $0x81] sm:$0xff] %v3222_v3  ;;  %v3192_v49 = vadd.f32 %v10765_v33, %v3153_v4 }
 0x379   : > { %3308 = vst [vmem:[#allocation3 + $0x79] sm:$0xff] %v3221_v8  ;;  %v3191_v18 = vadd.f32 %v10765_v33, %v3152_v9  ;;  %v7850_v22 = vpop.f32.mrb[12].mxu0  ;;  %7925 = vmatprep.mubr.f32.mxu1 %v3221_v8 }
 0x37a   : > { %v3224_v53 = vmax.f32 %v3192_v49, 0.0  ;;  %v3155_v34 = vmul.f32 %v7850_v22, %v10760_v11  ;;  %v3004_v54 = vpop.f32.mrb[13].mxu0  ;;  %7926 = vmatmul.mubr.f32.gmra.mrb[10].mxu1 %v3222_v3 }
 0x37b   : > { %v3223_v55 = vmax.f32 %v3191_v18, 0.0  ;;  %v3154_v59 = vmul.f32 %v10760_v11, %v3004_v54 }
 0x37c   : > { %3311 = vst [vmem:[#allocation3 + $0x99] sm:$0xff] %v3224_v53  ;;  %v3194_v60 = vadd.f32 %v10765_v33, %v3155_v34 }
 0x37d   : > { %3310 = vst [vmem:[#allocation3 + $0x91] sm:$0xff] %v3223_v55  ;;  %v3193_v61 = vadd.f32 %v10765_v33, %v3154_v59  ;;  %v7853_v0 = vpop.f32.mrb[14].mxu0  ;;  %7928 = vmatprep.mubr.f32.mxu1 %v3223_v55 }
 0x37e   : > { %v3226_v1 = vmax.f32 %v3194_v60, 0.0  ;;  %v3157_v2 = vmul.f32 %v7853_v0, %v10760_v11  ;;  %v3014_v5 = vpop.f32.mrb[15].mxu0  ;;  %7929 = vmatmul.mubr.f32.gmra.mrb[12].mxu1 %v3224_v53 }
 0x37f   : > { %v3225_v6 = vmax.f32 %v3193_v61, 0.0  ;;  %v3156_v7 = vmul.f32 %v10760_v11, %v3014_v5 }
 0x380   : > { %3313 = vst [vmem:[#allocation3 + $0xb1] sm:$0xff] %v3226_v1  ;;  %v3196_v12 = vadd.f32 %v10765_v33, %v3157_v2 }
 0x381   : > { %3312 = vst [vmem:[#allocation3 + $0xa9] sm:$0xff] %v3225_v6  ;;  %v3195_v44 = vadd.f32 %v10765_v33, %v3156_v7  ;;  %v7856_v45 = vpop.f32.mrb[16].mxu0  ;;  %7931 = vmatprep.mubr.f32.mxu1 %v3225_v6 }
 0x382   : > { %v3228_v52 = vmax.f32 %v3196_v12, 0.0  ;;  %v3159_v43 = vmul.f32 %v7856_v45, %v10760_v11  ;;  %v3024_v47 = vpop.f32.mrb[17].mxu0  ;;  %7932 = vmatmul.mubr.f32.gmra.mrb[14].mxu1 %v3226_v1 }
 0x383   : > { %v3227_v13 = vmax.f32 %v3195_v44, 0.0  ;;  %v3158_v42 = vmul.f32 %v10760_v11, %v3024_v47 }
 0x384   : > { %3315 = vst [vmem:[#allocation3 + $0xc9] sm:$0xff] %v3228_v52  ;;  %v3198_v56 = vadd.f32 %v10765_v33, %v3159_v43 }
 0x385   : > { %3314 = vst [vmem:[#allocation3 + $0xc1] sm:$0xff] %v3227_v13  ;;  %v3197_v51 = vadd.f32 %v10765_v33, %v3158_v42  ;;  %v7859_v46 = vpop.f32.mrb[18].mxu0  ;;  %7934 = vmatprep.mubr.f32.mxu1 %v3227_v13  ;;  %v3914_v13 = vld [vmem:[#allocation9 + $0x110] sm:$0xff]  ;;  %v3915_v42 = vld [vmem:[#allocation9 + $0x118] sm:$0xff] }
 0x386   : > { %v10803_v29 = vmax.f32 %v3198_v56, 0.0  ;;  %v3161_v14 = vmul.f32 %v7859_v46, %v10760_v11  ;;  %v3034_v15 = vpop.f32.mrb[19].mxu0  ;;  %7935 = vmatmul.mubr.f32.gmra.mrb[16].mxu1 %v3228_v52  ;;  %v3917_v46 = vld [vmem:[#allocation9 + $0x128] sm:$0xff] }
 0x387   : > { %v10806_v57 = vmax.f32 %v3197_v51, 0.0  ;;  %v3160_v16 = vmul.f32 %v10760_v11, %v3034_v15  ;;  %v8954_v51 = vpack.c.bf16 %v3915_v42, %v3914_v13 }
 0x388   : > { %3317 = vst [vmem:[#allocation3 + $0xe1] sm:$0xff] %v10803_v29  ;;  %v3200_v17 = vadd.f32 %v10765_v33, %v3161_v14  ;;  %v10899_v14 = vld [vmem:[#allocation3 + $0x18] sm:$0xff] }
 0x389   : > { %3316 = vst [vmem:[#allocation3 + $0xd9] sm:$0xff] %v10806_v57  ;;  %v3199_v48 = vadd.f32 %v10765_v33, %v3160_v16  ;;  %v7862_v19 = vpop.f32.mrb[20].mxu0  ;;  %7937 = vmatprep.mubr.f32.mxu1 %v10806_v57  ;;  %v10903_v16 = vld [vmem:[#allocation3 + $0x20] sm:$0xff] }
 0x38a   : > { %v10814_v20 = vmax.f32 %v3200_v17, 0.0  ;;  %v3163_v23 = vmul.f32 %v7862_v19, %v10760_v11  ;;  %v3044_v21 = vpop.f32.mrb[21].mxu0  ;;  %7938 = vmatmul.mubr.f32.gmra.mrb[18].mxu1 %v10803_v29  ;;  %v3918_v17 = vld [vmem:[#allocation9 + $0x130] sm:$0xff]  ;;  %v10906_v19 = vld [vmem:[#allocation3 + $0x30] sm:$0xff] }
 0x38b   : > { %v10818_v39 = vmax.f32 %v3199_v48, 0.0  ;;  %v3162_v25 = vmul.f32 %v10760_v11, %v3044_v21  ;;  %v3919_v48 = vld [vmem:[#allocation9 + $0x138] sm:$0xff]  ;;  %v3920_v21 = vld [vmem:[#allocation9 + $0x140] sm:$0xff] }
 0x38c   : > { %3319 = vst [vmem:[#allocation3 + $0xf9] sm:$0xff] %v10814_v20  ;;  %v3202_v27 = vadd.f32 %v10765_v33, %v3163_v23  ;;  %v10909_v23 = vld [vmem:[#allocation3 + $0x38] sm:$0xff] }
 0x38d   : > { %3318 = vst [vmem:[#allocation3 + $0xf1] sm:$0xff] %v10818_v39  ;;  %v3201_v28 = vadd.f32 %v10765_v33, %v3162_v25  ;;  %v7865_v30 = vpop.f32.mrb[22].mxu0  ;;  %7940 = vmatprep.mubr.f32.mxu1 %v10818_v39  ;;  %v3921_v25 = vld [vmem:[#allocation9 + $0x148] sm:$0xff] }
 0x38e   : > { %v10826_v31 = vmax.f32 %v3202_v27, 0.0  ;;  %v3165_v32 = vmul.f32 %v7865_v30, %v10760_v11  ;;  %v3054_v35 = vpop.f32.mrb[23].mxu0  ;;  %7941 = vmatmul.mubr.f32.gmra.mrb[20].mxu1 %v10814_v20  ;;  %v8966_v27 = vpack.c.bf16 %v3921_v25, %v3920_v21  ;;  %v3922_v30 = vld [vmem:[#allocation9 + $0x150] sm:$0xff]  ;;  %v4221_v25 = vld [vmem:[#allocation9 + $0x198] sm:$0xff] }
 0x38f   : > { %v10830_v41 = vmax.f32 %v3201_v28, 0.0  ;;  %v3164_v36 = vmul.f32 %v10760_v11, %v3054_v35  ;;  %v10915_v28 = vld [vmem:[#allocation3 + $0x50] sm:$0xff]  ;;  %v10918_v35 = vld [vmem:[#allocation3 + $0x60] sm:$0xff] }
 0x390   : > { %3321 = vst [vmem:[#allocation3 + $0x111] sm:$0xff] %v10826_v31  ;;  %v3204_v24 = vadd.f32 %v10765_v33, %v3165_v32  ;;  %v3923_v32 = vld [vmem:[#allocation9 + $0x158] sm:$0xff]  ;;  %v4220_v21 = vld [vmem:[#allocation9 + $0x190] sm:$0xff] }
 0x391   : > { %3320 = vst [vmem:[#allocation3 + $0x109] sm:$0xff] %v10830_v41  ;;  %v3203_v26 = vadd.f32 %v10765_v33, %v3164_v36  ;;  %v7868_v58 = vpop.f32.mrb[24].mxu0  ;;  %7943 = vmatprep.mubr.f32.mxu1 %v10830_v41  ;;  %v8970_v36 = vpack.c.bf16 %v3923_v32, %v3922_v30  ;;  %v8986_v30 = vpack.c.bf16 %v4221_v25, %v4220_v21  ;;  %v4222_v32 = vld [vmem:[#allocation9 + $0x1a0] sm:$0xff]  ;;  %v4227_v21 = vld [vmem:[#allocation9 + $0x1c8] sm:$0xff] }
 0x392   : > { %v10838_v37 = vmax.f32 %v3204_v24, 0.0  ;;  %v3167_v62 = vmul.f32 %v7868_v58, %v10760_v11  ;;  %v3064_v63 = vpop.f32.mrb[25].mxu0  ;;  %7944 = vmatmul.mubr.f32.gmra.mrb[22].mxu1 %v10826_v31  ;;  %v10921_v24 = vld [vmem:[#allocation3 + $0x68] sm:$0xff]  ;;  %v3925_v58 = vld [vmem:[#allocation9 + $0x168] sm:$0xff] }
 0x393   : > { %v10842_v38 = vmax.f32 %v3203_v26, 0.0  ;;  %v3166_v3 = vmul.f32 %v10760_v11, %v3064_v63  ;;  %v3924_v26 = vld [vmem:[#allocation9 + $0x160] sm:$0xff] }
 0x394   : > { %3323 = vst [vmem:[#allocation3 + $0x129] sm:$0xff] %v10838_v37  ;;  %v3206_v4 = vadd.f32 %v10765_v33, %v3167_v62  ;;  %v10924_v62 = vld [vmem:[#allocation3 + $0x78] sm:$0xff]  ;;  %v8974_v63 = vpack.c.bf16 %v3925_v58, %v3924_v26 }
 0x395   : > { %3322 = vst [vmem:[#allocation3 + $0x121] sm:$0xff] %v10842_v38  ;;  %v3205_v50 = vadd.f32 %v10765_v33, %v3166_v3  ;;  %v7871_v8 = vpop.f32.mrb[26].mxu0  ;;  %7946 = vmatprep.mubr.f32.mxu1 %v10842_v38  ;;  %v10927_v3 = vld [vmem:[#allocation3 + $0x80] sm:$0xff] }
 0x396   : > { %v10850_v9 = vmax.f32 %v3206_v4, 0.0  ;;  %v3169_v49 = vmul.f32 %v7871_v8, %v10760_v11  ;;  %v3074_v18 = vpop.f32.mrb[27].mxu0  ;;  %7947 = vmatmul.mubr.f32.gmra.mrb[24].mxu1 %v10838_v37  ;;  %v3926_v4 = vld [vmem:[#allocation9 + $0x170] sm:$0xff]  ;;  %v10930_v8 = vld [vmem:[#allocation3 + $0x90] sm:$0xff] }
 0x397   : > { %v10854_v22 = vmax.f32 %v3205_v50, 0.0  ;;  %v3168_v53 = vmul.f32 %v10760_v11, %v3074_v18  ;;  %v3927_v50 = vld [vmem:[#allocation9 + $0x178] sm:$0xff]  ;;  %v10933_v18 = vld [vmem:[#allocation3 + $0x98] sm:$0xff] }
 0x398   : > { %3325 = vst [vmem:[#allocation3 + $0x141] sm:$0xff] %v10850_v9  ;;  %v3208_v34 = vadd.f32 %v10765_v33, %v3169_v49  ;;  %v8978_v49 = vpack.c.bf16 %v3927_v50, %v3926_v4  ;;  %v10990_v26 = vld [vmem:[#allocation3 + $0x1a] sm:$0xff]  ;;  %v4225_v50 = vld [vmem:[#allocation9 + $0x1b8] sm:$0xff] }
 0x399   : > { %3324 = vst [vmem:[#allocation3 + $0x139] sm:$0xff] %v10854_v22  ;;  %v3207_v54 = vadd.f32 %v10765_v33, %v3168_v53  ;;  %v7874_v55 = vpop.f32.mrb[28].mxu0  ;;  %7949 = vmatprep.mubr.f32.mxu1 %v10854_v22  ;;  %v4218_v53 = vld [vmem:[#allocation9 + $0x180] sm:$0xff]  ;;  %v4224_v4 = vld [vmem:[#allocation9 + $0x1b0] sm:$0xff] }
 0x39a   : > { %v10862_v59 = vmax.f32 %v3208_v34, 0.0  ;;  %v3171_v60 = vmul.f32 %v7874_v55, %v10760_v11  ;;  %v3084_v61 = vpop.f32.mrb[29].mxu0  ;;  %7950 = vmatmul.mubr.f32.gmra.mrb[26].mxu1 %v10850_v9  ;;  %v4219_v34 = vld [vmem:[#allocation9 + $0x188] sm:$0xff] }
 0x39b   : > { %v10866_v0 = vmax.f32 %v3207_v54, 0.0  ;;  %v3170_v1 = vmul.f32 %v10760_v11, %v3084_v61  ;;  %v10936_v54 = vld [vmem:[#allocation3 + $0xa8] sm:$0xff]  ;;  %v8982_v55 = vpack.c.bf16 %v4219_v34, %v4218_v53  ;;  %v10942_v61 = vld [vmem:[#allocation3 + $0xc0] sm:$0xff]  ;;  %v8994_v53 = vpack.c.bf16 %v4225_v50, %v4224_v4 }
 0x39c   : > { %3327 = vst [vmem:[#allocation3 + $0x159] sm:$0xff] %v10862_v59  ;;  %v3210_v2 = vadd.f32 %v10765_v33, %v3171_v60  ;;  %v10939_v60 = vld [vmem:[#allocation3 + $0xb0] sm:$0xff]  ;;  %v10966_v13 = vld [vmem:[#allocation3 + $0x120] sm:$0xff]  ;;  %v10969_v42 = vld [vmem:[#allocation3 + $0x128] sm:$0xff] }
 0x39d   : > { %3326 = vst [vmem:[#allocation3 + $0x151] sm:$0xff] %v10866_v0  ;;  %v3209_v5 = vadd.f32 %v10765_v33, %v3170_v1  ;;  %v7877_v6 = vpop.f32.mrb[30].mxu0  ;;  %7952 = vmatprep.mubr.f32.mxu1 %v10866_v0  ;;  %v10945_v1 = vld [vmem:[#allocation3 + $0xc8] sm:$0xff]  ;;  %v10999_v34 = vld [vmem:[#allocation3 + $0x3a] sm:$0xff] }
 0x39e   : > { %v10874_v7 = vmax.f32 %v3210_v2, 0.0  ;;  %v3173_v12 = vmul.f32 %v7877_v6, %v10760_v11  ;;  %v3094_v44 = vpop.f32.mrb[31].mxu0  ;;  %7953 = vmatmul.mubr.f32.gmra.mrb[28].mxu1 %v10862_v59  ;;  %v10948_v2 = vld [vmem:[#allocation3 + $0xd8] sm:$0xff]  ;;  %v10954_v6 = vld [vmem:[#allocation3 + $0xf0] sm:$0xff] }
 0x39f   : > { %v10878_v45 = vmax.f32 %v3209_v5, 0.0  ;;  %v3172_v52 = vmul.f32 %v10760_v11, %v3094_v44  ;;  %v10951_v5 = vld [vmem:[#allocation3 + $0xe0] sm:$0xff]  ;;  %v10960_v44 = vld [vmem:[#allocation3 + $0x108] sm:$0xff] }
 0x3a0   : > { %3329 = vst [vmem:[#allocation3 + $0x171] sm:$0xff] %v10874_v7  ;;  %v10883_v43 = vadd.f32 %v10765_v33, %v3173_v12  ;;  %v10957_v12 = vld [vmem:[#allocation3 + $0xf8] sm:$0xff]  ;;  %v11011_v50 = vld [vmem:[#allocation3 + $0x6a] sm:$0xff] }
 0x3a1   : > { %3328 = vst [vmem:[#allocation3 + $0x169] sm:$0xff] %v10878_v45  ;;  %v10887_v47 = vadd.f32 %v10765_v33, %v3172_v52  ;;  %7955 = vmatprep.mubr.f32.mxu1 %v10878_v45  ;;  %v3916_v33 = vld [vmem:[#allocation9 + $0x120] sm:$0xff]  ;;  %11596 = vst [vmem:[#allocation18_spill] sm:$0xff] %v11011_v50 }
 0x3a2   : > { %v11469_v56 = vmax.f32 %v10883_v43, 0.0  ;;  %7956 = vmatmul.mubr.f32.gmra.mrb[30].mxu1 %v10874_v7  ;;  %v8958_v15 = vpack.c.bf16 %v3917_v46, %v3916_v33  ;;  %v10963_v52 = vld [vmem:[#allocation3 + $0x110] sm:$0xff]  ;;  %v10975_v33 = vld [vmem:[#allocation3 + $0x140] sm:$0xff] }
 0x3a3   : > { %v11470_v11 = vmax.f32 %v10887_v47, 0.0  ;;  %7990 = vmatprep.mubr.f32.mxu1 %v10748_v40 }
 0x3a4   : > { %3331 = vst [vmem:[#allocation3 + $0x189] sm:$0xff] %v11469_v56  ;;  %v10978_v46 = vld [vmem:[#allocation3 + $0x150] sm:$0xff] }
 0x3a5   : > { %3330 = vst [vmem:[#allocation3 + $0x181] sm:$0xff] %v11470_v11  ;;  %v4230_v56 = vld [vmem:[#allocation9 + $0x1e0] sm:$0xff]  ;;  %v4231_v11 = vld [vmem:[#allocation9 + $0x1e8] sm:$0xff] }
 0x3a6   : > { %7991 = vmatmul.mubr.f32.vlgmr.msra.gmra.mrb[0].mxu1 %v10748_v40  ;;  %v8962_v40 = vpack.c.bf16 %v3919_v48, %v3918_v17  ;;  %v3879_v48 = vld [vmem:[#allocation3 + $0x2] sm:$0xff] }
 0x3a7   : > { %7993 = vmatprep.mubr.f32.mxu1 %v10899_v14  ;;  %8953 = vmatpush3.bf16.msra.mxu1 %v10754_v10  ;;  %v10912_v10 = vld [vmem:[#allocation3 + $0x48] sm:$0xff] }
 0x3a8   : > { %8955 = vmatprep.subr.bf16.mxu1 %v8954_v51  ;;  %v10984_v17 = vld [vmem:[#allocation3 + $0x168] sm:$0xff] }
 0x3a9   : > { %11592 = vst [vmem:[#allocation14_spill] sm:$0xff] %v10984_v17 }
 0x3aa   : > { %7994 = vmatmul.mubr.f32.gmra.mrb[2].mxu1 %v10903_v16 }
 0x3ab   : > { %7996 = vmatprep.mubr.f32.mxu1 %v10906_v19  ;;  %8957 = vmatpush3.bf16.msra.mxu1 %v8954_v51  ;;  %v10972_v51 = vld [vmem:[#allocation3 + $0x138] sm:$0xff] }
 0x3ac   : > { %8959 = vmatprep.subr.bf16.mxu1 %v8958_v15 }
 0x3ae   : > { %7997 = vmatmul.mubr.f32.gmra.mrb[4].mxu1 %v10909_v23 }
 0x3af   : > { %7999 = vmatprep.mubr.f32.mxu1 %v10912_v10  ;;  %8961 = vmatpush3.bf16.msra.mxu1 %v8958_v15  ;;  %v10981_v15 = vld [vmem:[#allocation3 + $0x158] sm:$0xff] }
 0x3b0   : > { %8963 = vmatprep.subr.bf16.mxu1 %v8962_v40 }
 0x3b2   : > { %8000 = vmatmul.mubr.f32.gmra.mrb[6].mxu1 %v10915_v28 }
 0x3b3   : > { %8002 = vmatprep.mubr.f32.mxu1 %v10918_v35  ;;  %8965 = vmatpush3.bf16.msra.mxu1 %v8962_v40  ;;  %v10987_v40 = vld [vmem:[#allocation3 + $0x170] sm:$0xff] }
 0x3b4   : > { %8967 = vmatprep.subr.bf16.mxu1 %v8966_v27  ;;  %11593 = vst [vmem:[#allocation15_spill] sm:$0xff] %v10987_v40 }
 0x3b6   : > { %8003 = vmatmul.mubr.f32.gmra.mrb[8].mxu1 %v10921_v24 }
 0x3b7   : > { %8005 = vmatprep.mubr.f32.mxu1 %v10924_v62  ;;  %8969 = vmatpush3.bf16.msra.mxu1 %v8966_v27  ;;  %v3880_v27 = vld [vmem:[#allocation3 + $0xa] sm:$0xff] }
 0x3b8   : > { %8971 = vmatprep.subr.bf16.mxu1 %v8970_v36 }
 0x3ba   : > { %8006 = vmatmul.mubr.f32.gmra.mrb[10].mxu1 %v10927_v3 }
 0x3bb   : > { %8008 = vmatprep.mubr.f32.mxu1 %v10930_v8  ;;  %8973 = vmatpush3.bf16.msra.mxu1 %v8970_v36  ;;  %v4223_v36 = vld [vmem:[#allocation9 + $0x1a8] sm:$0xff] }
 0x3bc   : > { %8975 = vmatprep.subr.bf16.mxu1 %v8974_v63  ;;  %v8990_v58 = vpack.c.bf16 %v4223_v36, %v4222_v32  ;;  %v4228_v32 = vld [vmem:[#allocation9 + $0x1d0] sm:$0xff]  ;;  %v4229_v36 = vld [vmem:[#allocation9 + $0x1d8] sm:$0xff] }
 0x3bd   : > { %v9002_v4 = vpack.c.bf16 %v4229_v36, %v4228_v32  ;;  %v11023_v36 = vld [vmem:[#allocation3 + $0x9a] sm:$0xff] }
 0x3be   : > { %8009 = vmatmul.mubr.f32.gmra.mrb[12].mxu1 %v10933_v18 }
 0x3bf   : > { %8011 = vmatprep.mubr.f32.mxu1 %v10936_v54  ;;  %8977 = vmatpush3.bf16.msra.mxu1 %v8974_v63  ;;  %v10993_v63 = vld [vmem:[#allocation3 + $0x22] sm:$0xff] }
 0x3c0   : > { %8979 = vmatprep.subr.bf16.mxu1 %v8978_v49 }
 0x3c2   : > { %8012 = vmatmul.mubr.f32.gmra.mrb[14].mxu1 %v10939_v60 }
 0x3c3   : > { %8014 = vmatprep.mubr.f32.mxu1 %v10942_v61  ;;  %8981 = vmatpush3.bf16.msra.mxu1 %v8978_v49  ;;  %v10996_v49 = vld [vmem:[#allocation3 + $0x32] sm:$0xff] }
 0x3c4   : > { %8983 = vmatprep.subr.bf16.mxu1 %v8982_v55 }
 0x3c6   : > { %8015 = vmatmul.mubr.f32.gmra.mrb[16].mxu1 %v10945_v1 }
 0x3c7   : > { %8017 = vmatprep.mubr.f32.mxu1 %v10948_v2 }
 0x3ca   : > { %8018 = vmatmul.mubr.f32.gmra.mrb[18].mxu1 %v10951_v5 }
 0x3cb   : > { %8020 = vmatprep.mubr.f32.mxu1 %v10954_v6 }
 0x3ce   : > { %8021 = vmatmul.mubr.f32.gmra.mrb[20].mxu1 %v10957_v12 }
 0x3cf   : > { %8023 = vmatprep.mubr.f32.mxu1 %v10960_v44 }
 0x3d2   : > { %8024 = vmatmul.mubr.f32.gmra.mrb[22].mxu1 %v10963_v52 }
 0x3d3   : > { %8026 = vmatprep.mubr.f32.mxu1 %v10966_v13 }
 0x3d6   : > { %8027 = vmatmul.mubr.f32.gmra.mrb[24].mxu1 %v10969_v42 }
 0x3d7   : > { %8029 = vmatprep.mubr.f32.mxu1 %v10972_v51 }
 0x3da   : > { %8030 = vmatmul.mubr.f32.gmra.mrb[26].mxu1 %v10975_v33 }
 0x3db   : > { %8032 = vmatprep.mubr.f32.mxu1 %v10978_v46 }
 0x3de   : > { %8033 = vmatmul.mubr.f32.gmra.mrb[28].mxu1 %v10981_v15 }
 0x3df   : > { %8035 = vmatprep.mubr.f32.mxu1 %v10984_v17 }
 0x3e2   : > { %8036 = vmatmul.mubr.f32.gmra.mrb[30].mxu1 %v10987_v40 }
 0x3e3   : > { %8070 = vmatprep.mubr.f32.mxu1 %v3879_v48  ;;  %v4226_v48 = vld [vmem:[#allocation9 + $0x1c0] sm:$0xff] }
 0x3e4   : > { %v8998_v25 = vpack.c.bf16 %v4227_v21, %v4226_v48  ;;  %v9006_v48 = vpack.c.bf16 %v4231_v11, %v4230_v56  ;;  %v11017_v21 = vld [vmem:[#allocation3 + $0x82] sm:$0xff]  ;;  %v11026_v56 = vld [vmem:[#allocation3 + $0xaa] sm:$0xff] }
 0x3e5   : > { %11598 = vst [vmem:[#allocation20_spill] sm:$0xff] %v11026_v56 }
 0x3e6   : > { %8071 = vmatmul.mubr.f32.vlgmr.msra.gmra.mrb[0].mxu1 %v3880_v27  ;;  %v11005_v27 = vld [vmem:[#allocation3 + $0x52] sm:$0xff] }
 0x3e7   : > { %8073 = vmatprep.mubr.f32.mxu1 %v10990_v26  ;;  %8985 = vmatpush3.bf16.msra.mxu1 %v8982_v55  ;;  %v11002_v55 = vld [vmem:[#allocation3 + $0x4a] sm:$0xff]  ;;  %11594 = vst [vmem:[#allocation16_spill] sm:$0xff] %v11005_v27 }
 0x3e8   : > { %8987 = vmatprep.subr.bf16.mxu1 %v8986_v30 }
 0x3ea   : > { %8074 = vmatmul.mubr.f32.gmra.mrb[2].mxu1 %v10993_v63 }
 0x3eb   : > { %8076 = vmatprep.mubr.f32.mxu1 %v10996_v49  ;;  %8989 = vmatpush3.bf16.msra.mxu1 %v8986_v30  ;;  %v11008_v30 = vld [vmem:[#allocation3 + $0x62] sm:$0xff] }
 0x3ec   : > { %8991 = vmatprep.subr.bf16.mxu1 %v8990_v58  ;;  %11595 = vst [vmem:[#allocation17_spill] sm:$0xff] %v11008_v30 }
 0x3ee   : > { %8077 = vmatmul.mubr.f32.gmra.mrb[4].mxu1 %v10999_v34 }
 0x3ef   : > { %8079 = vmatprep.mubr.f32.mxu1 %v11002_v55  ;;  %8993 = vmatpush3.bf16.msra.mxu1 %v8990_v58  ;;  %v11014_v58 = vld [vmem:[#allocation3 + $0x7a] sm:$0xff] }
 0x3f0   : > { %8995 = vmatprep.subr.bf16.mxu1 %v8994_v53  ;;  %11597 = vst [vmem:[#allocation19_spill] sm:$0xff] %v11014_v58 }
 0x3f2   : > { %8080 = vmatmul.mubr.f32.gmra.mrb[6].mxu1 %v11005_v27  ;;  %v4232_v27 = vld [vmem:[#allocation9 + $0x1f0] sm:$0xff] }
 0x3f3   : > { %8082 = vmatprep.mubr.f32.mxu1 %v11008_v30  ;;  %8997 = vmatpush3.bf16.msra.mxu1 %v8994_v53  ;;  %v4233_v30 = vld [vmem:[#allocation9 + $0x1f8] sm:$0xff]  ;;  %v11020_v53 = vld [vmem:[#allocation3 + $0x92] sm:$0xff] }
 0x3f4   : > { %8999 = vmatprep.subr.bf16.mxu1 %v8998_v25  ;;  %v9010_v32 = vpack.c.bf16 %v4233_v30, %v4232_v27  ;;  %v11035_v27 = vld [vmem:[#allocation3 + $0xca] sm:$0xff]  ;;  %v11038_v30 = vld [vmem:[#allocation3 + $0xda] sm:$0xff] }
 0x3f5   : > { %11601 = vst [vmem:[#allocation23_spill] sm:$0xff] %v11035_v27  ;;  %11602 = vst [vmem:[#allocation24_spill] sm:$0xff] %v11038_v30 }
 0x3f6   : > { %8083 = vmatmul.mubr.f32.gmra.mrb[8].mxu1 %v11011_v50  ;;  %v4524_v50 = vld [vmem:[#allocation9 + $0x200] sm:$0xff] }
 0x3f7   : > { %8085 = vmatprep.mubr.f32.mxu1 %v11014_v58  ;;  %9001 = vmatpush3.bf16.msra.mxu1 %v8998_v25  ;;  %v4525_v58 = vld [vmem:[#allocation9 + $0x208] sm:$0xff] }
 0x3f8   : > { %9003 = vmatprep.subr.bf16.mxu1 %v9002_v4  ;;  %v9014_v11 = vpack.c.bf16 %v4525_v58, %v4524_v50  ;;  %v11029_v25 = vld [vmem:[#allocation3 + $0xb2] sm:$0xff]  ;;  %v11047_v58 = vld [vmem:[#allocation3 + $0xfa] sm:$0xff] }
 0x3f9   : > { %11599 = vst [vmem:[#allocation21_spill] sm:$0xff] %v11029_v25  ;;  %v11044_v50 = vld [vmem:[#allocation3 + $0xf2] sm:$0xff]  ;;  %11605 = vst [vmem:[#allocation27_spill] sm:$0xff] %v11047_v58 }
 0x3fa   : > { %8086 = vmatmul.mubr.f32.gmra.mrb[10].mxu1 %v11017_v21  ;;  %11604 = vst [vmem:[#allocation26_spill] sm:$0xff] %v11044_v50 }
 0x3fb   : > { %8088 = vmatprep.mubr.f32.mxu1 %v11020_v53  ;;  %9005 = vmatpush3.bf16.msra.mxu1 %v9002_v4  ;;  %v11032_v4 = vld [vmem:[#allocation3 + $0xc2] sm:$0xff] }
 0x3fc   : > { %9007 = vmatprep.subr.bf16.mxu1 %v9006_v48  ;;  %11600 = vst [vmem:[#allocation22_spill] sm:$0xff] %v11032_v4 }
 0x3fe   : > { %8089 = vmatmul.mubr.f32.gmra.mrb[12].mxu1 %v11023_v36 }
 0x3ff   : > { %8091 = vmatprep.mubr.f32.mxu1 %v11026_v56  ;;  %9009 = vmatpush3.bf16.msra.mxu1 %v9006_v48  ;;  %v11041_v48 = vld [vmem:[#allocation3 + $0xe2] sm:$0xff]  ;;  %v4529_v56 = vld [vmem:[#allocation9 + $0x228] sm:$0xff] }
 0x400   : > { %9011 = vmatprep.subr.bf16.mxu1 %v9010_v32  ;;  %11603 = vst [vmem:[#allocation25_spill] sm:$0xff] %v11041_v48 }
 0x402   : > { %8092 = vmatmul.mubr.f32.gmra.mrb[14].mxu1 %v11029_v25  ;;  %v4528_v25 = vld [vmem:[#allocation9 + $0x220] sm:$0xff] }
 0x403   : > { %8094 = vmatprep.mubr.f32.mxu1 %v11032_v4  ;;  %9013 = vmatpush3.bf16.msra.mxu1 %v9010_v32  ;;  %v11050_v32 = vld [vmem:[#allocation3 + $0x10a] sm:$0xff]  ;;  %v4526_v4 = vld [vmem:[#allocation9 + $0x210] sm:$0xff] }
 0x404   : > { %9015 = vmatprep.subr.bf16.mxu1 %v9014_v11  ;;  %11606 = vst [vmem:[#allocation28_spill] sm:$0xff] %v11050_v32 }
 0x406   : > { %8095 = vmatmul.mubr.f32.gmra.mrb[16].mxu1 %v11035_v27  ;;  %v11053_v27 = vld [vmem:[#allocation3 + $0x112] sm:$0xff] }
 0x407   : > { %8097 = vmatprep.mubr.f32.mxu1 %v11038_v30  ;;  %11607 = vst [vmem:[#allocation29_spill] sm:$0xff] %v11053_v27  ;;  %v11056_v30 = vld [vmem:[#allocation3 + $0x122] sm:$0xff] }
 0x408   : > { %11608 = vst [vmem:[#allocation30_spill] sm:$0xff] %v11056_v30 }
 0x40a   : > { %8098 = vmatmul.mubr.f32.gmra.mrb[18].mxu1 %v11041_v48  ;;  %v11059_v48 = vld [vmem:[#allocation3 + $0x12a] sm:$0xff] }
 0x40b   : > { %8100 = vmatprep.mubr.f32.mxu1 %v11044_v50  ;;  %11609 = vst [vmem:[#allocation31_spill] sm:$0xff] %v11059_v48  ;;  %v11062_v50 = vld [vmem:[#allocation3 + $0x13a] sm:$0xff] }
 0x40c   : > { %11610 = vst [vmem:[#allocation32_spill] sm:$0xff] %v11062_v50 }
 0x40e   : > { %8101 = vmatmul.mubr.f32.gmra.mrb[20].mxu1 %v11047_v58  ;;  %v11065_v58 = vld [vmem:[#allocation3 + $0x142] sm:$0xff] }
 0x40f   : > { %8103 = vmatprep.mubr.f32.mxu1 %v11050_v32  ;;  %11611 = vst [vmem:[#allocation33_spill] sm:$0xff] %v11065_v58  ;;  %v11068_v32 = vld [vmem:[#allocation3 + $0x152] sm:$0xff] }
 0x410   : > { %11612 = vst [vmem:[#allocation34_spill] sm:$0xff] %v11068_v32 }
 0x412   : > { %8104 = vmatmul.mubr.f32.gmra.mrb[22].mxu1 %v11053_v27  ;;  %v11071_v27 = vld [vmem:[#allocation3 + $0x15a] sm:$0xff] }
 0x413   : > { %8106 = vmatprep.mubr.f32.mxu1 %v11056_v30  ;;  %11613 = vst [vmem:[#allocation35_spill] sm:$0xff] %v11071_v27  ;;  %v11074_v30 = vld [vmem:[#allocation3 + $0x16a] sm:$0xff] }
 0x414   : > { %11614 = vst [vmem:[#allocation36_spill] sm:$0xff] %v11074_v30 }
 0x416   : > { %8107 = vmatmul.mubr.f32.gmra.mrb[24].mxu1 %v11059_v48  ;;  %v11077_v48 = vld [vmem:[#allocation3 + $0x172] sm:$0xff] }
 0x417   : > { %8109 = vmatprep.mubr.f32.mxu1 %v11062_v50  ;;  %11615 = vst [vmem:[#allocation37_spill] sm:$0xff] %v11077_v48  ;;  %v4527_v50 = vld [vmem:[#allocation9 + $0x218] sm:$0xff] }
 0x41a   : > { %8110 = vmatmul.mubr.f32.gmra.mrb[26].mxu1 %v11065_v58  ;;  %v9018_v58 = vpack.c.bf16 %v4527_v50, %v4526_v4  ;;  %v4533_v4 = vld [vmem:[#allocation9 + $0x248] sm:$0xff]  ;;  %v4536_v50 = vld [vmem:[#allocation9 + $0x260] sm:$0xff] }
 0x41b   : > { %8112 = vmatprep.mubr.f32.mxu1 %v11068_v32  ;;  %v4530_v32 = vld [vmem:[#allocation9 + $0x230] sm:$0xff] }
 0x41e   : > { %8113 = vmatmul.mubr.f32.gmra.mrb[28].mxu1 %v11071_v27  ;;  %v9022_v27 = vpack.c.bf16 %v4529_v56, %v4528_v25  ;;  %v4535_v56 = vld [vmem:[#allocation9 + $0x258] sm:$0xff] }
 0x41f   : > { %8115 = vmatprep.mubr.f32.mxu1 %v11074_v30  ;;  %v4531_v30 = vld [vmem:[#allocation9 + $0x238] sm:$0xff] }
 0x422   : > { %8116 = vmatmul.mubr.f32.gmra.mrb[30].mxu1 %v11077_v48  ;;  %v9026_v48 = vpack.c.bf16 %v4531_v30, %v4530_v32  ;;  %v4537_v30 = vld [vmem:[#allocation9 + $0x268] sm:$0xff]  ;;  %v4539_v32 = vld [vmem:[#allocation9 + $0x278] sm:$0xff] }
 0x423   : > { %8150 = vmatprep.mubr.f32.mxu1 %v10899_v14  ;;  %v4532_v14 = vld [vmem:[#allocation9 + $0x240] sm:$0xff] }
 0x426   : > { %8151 = vmatmul.mubr.f32.vlgmr.msra.gmra.mrb[0].mxu1 %v10903_v16  ;;  %v9030_v16 = vpack.c.bf16 %v4533_v4, %v4532_v14  ;;  %v4830_v14 = vld [vmem:[#allocation9 + $0x280] sm:$0xff]  ;;  %v4831_v4 = vld [vmem:[#allocation9 + $0x288] sm:$0xff] }
 0x427   : > { %8153 = vmatprep.mubr.f32.mxu1 %v10906_v19  ;;  %9017 = vmatpush3.bf16.msra.mxu1 %v9014_v11  ;;  %v4534_v11 = vld [vmem:[#allocation9 + $0x250] sm:$0xff] }
 0x428   : > { %9019 = vmatprep.subr.bf16.mxu1 %v9018_v58  ;;  %v9034_v25 = vpack.c.bf16 %v4535_v56, %v4534_v11  ;;  %v11110_v11 = vld [vmem:[#allocation3 + $0x180] sm:$0xff]  ;;  %v11113_v56 = vld [vmem:[#allocation3 + $0x188] sm:$0xff] }
 0x429   : > { %11616 = vst [vmem:[#allocation38_spill] sm:$0xff] %v11110_v11  ;;  %11617 = vst [vmem:[#allocation39_spill] sm:$0xff] %v11113_v56 }
 0x42a   : > { %8154 = vmatmul.mubr.f32.gmra.mrb[2].mxu1 %v10909_v23 }
 0x42b   : > { %8156 = vmatprep.mubr.f32.mxu1 %v10912_v10  ;;  %9021 = vmatpush3.bf16.msra.mxu1 %v9018_v58  ;;  %v4538_v58 = vld [vmem:[#allocation9 + $0x270] sm:$0xff] }
 0x42c   : > { %9023 = vmatprep.subr.bf16.mxu1 %v9022_v27 }
 0x42e   : > { %8157 = vmatmul.mubr.f32.gmra.mrb[4].mxu1 %v10915_v28 }
 0x42f   : > { %8159 = vmatprep.mubr.f32.mxu1 %v10918_v35  ;;  %9025 = vmatpush3.bf16.msra.mxu1 %v9022_v27  ;;  %v9038_v27 = vpack.c.bf16 %v4537_v30, %v4536_v50  ;;  %v4833_v50 = vld [vmem:[#allocation9 + $0x298] sm:$0xff]  ;;  %v4491_v30 = vld [vmem:[#allocation3 + $0x19] sm:$0xff] }
 0x430   : > { %9027 = vmatprep.subr.bf16.mxu1 %v9026_v48 }
 0x432   : > { %8160 = vmatmul.mubr.f32.gmra.mrb[6].mxu1 %v10921_v24 }
 0x433   : > { %8162 = vmatprep.mubr.f32.mxu1 %v10924_v62  ;;  %9029 = vmatpush3.bf16.msra.mxu1 %v9026_v48  ;;  %v9042_v48 = vpack.c.bf16 %v4539_v32, %v4538_v58  ;;  %v4492_v58 = vld [vmem:[#allocation3 + $0x21] sm:$0xff]  ;;  %v4834_v32 = vld [vmem:[#allocation9 + $0x2a0] sm:$0xff] }
 0x434   : > { %9031 = vmatprep.subr.bf16.mxu1 %v9030_v16 }
 0x436   : > { %8163 = vmatmul.mubr.f32.gmra.mrb[8].mxu1 %v10927_v3 }
 0x437   : > { %8165 = vmatprep.mubr.f32.mxu1 %v10930_v8  ;;  %9033 = vmatpush3.bf16.msra.mxu1 %v9030_v16  ;;  %v9046_v16 = vpack.c.bf16 %v4831_v4, %v4830_v14  ;;  %v11116_v14 = vld [vmem:[#allocation3 + $0x31] sm:$0xff] }
 0x438   : > { %9035 = vmatprep.subr.bf16.mxu1 %v9034_v25 }
 0x43a   : > { %8166 = vmatmul.mubr.f32.gmra.mrb[10].mxu1 %v10933_v18 }
 0x43b   : > { %8168 = vmatprep.mubr.f32.mxu1 %v10936_v54  ;;  %9037 = vmatpush3.bf16.msra.mxu1 %v9034_v25  ;;  %v4832_v25 = vld [vmem:[#allocation9 + $0x290] sm:$0xff] }
 0x43c   : > { %9039 = vmatprep.subr.bf16.mxu1 %v9038_v27 }
 0x43e   : > { %8169 = vmatmul.mubr.f32.gmra.mrb[12].mxu1 %v10939_v60 }
 0x43f   : > { %8171 = vmatprep.mubr.f32.mxu1 %v10942_v61  ;;  %9041 = vmatpush3.bf16.msra.mxu1 %v9038_v27  ;;  %v9050_v27 = vpack.c.bf16 %v4833_v50, %v4832_v25  ;;  %v11125_v50 = vld [vmem:[#allocation3 + $0x51] sm:$0xff] }
 0x440   : > { %9043 = vmatprep.subr.bf16.mxu1 %v9042_v48  ;;  %11620 = vst [vmem:[#allocation42_spill] sm:$0xff] %v11125_v50 }
 0x442   : > { %8172 = vmatmul.mubr.f32.gmra.mrb[14].mxu1 %v10945_v1 }
 0x443   : > { %8174 = vmatprep.mubr.f32.mxu1 %v10948_v2  ;;  %9045 = vmatpush3.bf16.msra.mxu1 %v9042_v48  ;;  %v4835_v48 = vld [vmem:[#allocation9 + $0x2a8] sm:$0xff] }
 0x444   : > { %9047 = vmatprep.subr.bf16.mxu1 %v9046_v16  ;;  %v9054_v4 = vpack.c.bf16 %v4835_v48, %v4834_v32  ;;  %v11131_v48 = vld [vmem:[#allocation3 + $0x69] sm:$0xff] }
 0x445   : > { %11622 = vst [vmem:[#allocation44_spill] sm:$0xff] %v11131_v48 }
 0x446   : > { %8175 = vmatmul.mubr.f32.gmra.mrb[16].mxu1 %v10951_v5 }
 0x447   : > { %8177 = vmatprep.mubr.f32.mxu1 %v10954_v6 }
 0x44a   : > { %8178 = vmatmul.mubr.f32.gmra.mrb[18].mxu1 %v10957_v12 }
 0x44b   : > { %8180 = vmatprep.mubr.f32.mxu1 %v10960_v44 }
 0x44e   : > { %8181 = vmatmul.mubr.f32.gmra.mrb[20].mxu1 %v10963_v52 }
 0x44f   : > { %8183 = vmatprep.mubr.f32.mxu1 %v10966_v13 }
 0x452   : > { %8184 = vmatmul.mubr.f32.gmra.mrb[22].mxu1 %v10969_v42 }
 0x453   : > { %8186 = vmatprep.mubr.f32.mxu1 %v10972_v51 }
 0x456   : > { %8187 = vmatmul.mubr.f32.gmra.mrb[24].mxu1 %v10975_v33 }
 0x457   : > { %8189 = vmatprep.mubr.f32.mxu1 %v10978_v46 }
 0x45a   : > { %8190 = vmatmul.mubr.f32.gmra.mrb[26].mxu1 %v10981_v15 }
 0x45b   : > { %8192 = vmatprep.mubr.f32.mxu1 %v10984_v17  ;;  %v4837_v17 = vld [vmem:[#allocation9 + $0x2b8] sm:$0xff] }
 0x45e   : > { %8193 = vmatmul.mubr.f32.gmra.mrb[28].mxu1 %v10987_v40  ;;  %v4836_v40 = vld [vmem:[#allocation9 + $0x2b0] sm:$0xff] }
 0x45f   : > { %8195 = vmatprep.mubr.f32.mxu1 %v11110_v11  ;;  %v11119_v11 = vld [vmem:[#allocation3 + $0x39] sm:$0xff]  ;;  %v9058_v25 = vpack.c.bf16 %v4837_v17, %v4836_v40 }
 0x460   : > { %11618 = vst [vmem:[#allocation40_spill] sm:$0xff] %v11119_v11  ;;  %v11134_v17 = vld [vmem:[#allocation3 + $0x79] sm:$0xff] }
 0x461   : > { %11623 = vst [vmem:[#allocation45_spill] sm:$0xff] %v11134_v17 }
 0x462   : > { %8196 = vmatmul.mubr.f32.gmra.mrb[30].mxu1 %v11113_v56  ;;  %v11122_v56 = vld [vmem:[#allocation3 + $0x49] sm:$0xff] }
 0x463   : > { %8230 = vmatprep.mubr.f32.mxu1 %v4491_v30  ;;  %11619 = vst [vmem:[#allocation41_spill] sm:$0xff] %v11122_v56  ;;  %v4838_v30 = vld [vmem:[#allocation9 + $0x2c0] sm:$0xff] }
 0x466   : > { %8231 = vmatmul.mubr.f32.vlgmr.msra.gmra.mrb[0].mxu1 %v4492_v58  ;;  %v4839_v58 = vld [vmem:[#allocation9 + $0x2c8] sm:$0xff] }
 0x467   : > { %8233 = vmatprep.mubr.f32.mxu1 %v11116_v14  ;;  %9049 = vmatpush3.bf16.msra.mxu1 %v9046_v16  ;;  %v11128_v16 = vld [vmem:[#allocation3 + $0x61] sm:$0xff]  ;;  %v9062_v32 = vpack.c.bf16 %v4839_v58, %v4838_v30  ;;  %v11143_v58 = vld [vmem:[#allocation3 + $0x99] sm:$0xff] }
 0x468   : > { %9051 = vmatprep.subr.bf16.mxu1 %v9050_v27  ;;  %11621 = vst [vmem:[#allocation43_spill] sm:$0xff] %v11128_v16 }
 0x46a   : > { %8234 = vmatmul.mubr.f32.gmra.mrb[2].mxu1 %v11119_v11  ;;  %v4840_v11 = vld [vmem:[#allocation9 + $0x2d0] sm:$0xff] }
 0x46b   : > { %8236 = vmatprep.mubr.f32.mxu1 %v11122_v56  ;;  %9053 = vmatpush3.bf16.msra.mxu1 %v9050_v27  ;;  %v4841_v56 = vld [vmem:[#allocation9 + $0x2d8] sm:$0xff] }
 0x46c   : > { %9055 = vmatprep.subr.bf16.mxu1 %v9054_v4  ;;  %v9066_v40 = vpack.c.bf16 %v4841_v56, %v4840_v11  ;;  %v11137_v27 = vld [vmem:[#allocation3 + $0x81] sm:$0xff]  ;;  %v11146_v11 = vld [vmem:[#allocation3 + $0xa9] sm:$0xff] }
 0x46d   : > { %11624 = vst [vmem:[#allocation46_spill] sm:$0xff] %v11137_v27 }
 0x46e   : > { %8237 = vmatmul.mubr.f32.gmra.mrb[4].mxu1 %v11125_v50  ;;  %v4842_v50 = vld [vmem:[#allocation9 + $0x2e0] sm:$0xff] }
 0x46f   : > { %8239 = vmatprep.mubr.f32.mxu1 %v11128_v16  ;;  %9057 = vmatpush3.bf16.msra.mxu1 %v9054_v4  ;;  %v4843_v16 = vld [vmem:[#allocation9 + $0x2e8] sm:$0xff] }
 0x470   : > { %9059 = vmatprep.subr.bf16.mxu1 %v9058_v25  ;;  %v11140_v4 = vld [vmem:[#allocation3 + $0x91] sm:$0xff]  ;;  %v9070_v30 = vpack.c.bf16 %v4843_v16, %v4842_v50  ;;  %v11152_v50 = vld [vmem:[#allocation3 + $0xc1] sm:$0xff] }
 0x471   : > { %11625 = vst [vmem:[#allocation47_spill] sm:$0xff] %v11140_v4 }
 0x472   : > { %8240 = vmatmul.mubr.f32.gmra.mrb[6].mxu1 %v11131_v48  ;;  %v4844_v48 = vld [vmem:[#allocation9 + $0x2f0] sm:$0xff] }
 0x473   : > { %8242 = vmatprep.mubr.f32.mxu1 %v11134_v17  ;;  %9061 = vmatpush3.bf16.msra.mxu1 %v9058_v25  ;;  %v4845_v17 = vld [vmem:[#allocation9 + $0x2f8] sm:$0xff]  ;;  %v11149_v25 = vld [vmem:[#allocation3 + $0xb1] sm:$0xff] }
 0x474   : > { %9063 = vmatprep.subr.bf16.mxu1 %v9062_v32  ;;  %v9074_v56 = vpack.c.bf16 %v4845_v17, %v4844_v48  ;;  %v11631_v48 = vld [vmem:[#allocation19_spill] sm:$0xff] }
 0x475   : > { %v5150_v17 = vld [vmem:[#allocation9 + $0x368] sm:$0xff] }
 0x476   : > { %8243 = vmatmul.mubr.f32.gmra.mrb[8].mxu1 %v11137_v27  ;;  %v5137_v27 = vld [vmem:[#allocation9 + $0x300] sm:$0xff] }
 0x477   : > { %8245 = vmatprep.mubr.f32.mxu1 %v11140_v4  ;;  %9065 = vmatpush3.bf16.msra.mxu1 %v9062_v32  ;;  %v5138_v4 = vld [vmem:[#allocation9 + $0x308] sm:$0xff]  ;;  %v11155_v32 = vld [vmem:[#allocation3 + $0xc9] sm:$0xff] }
 0x478   : > { %9067 = vmatprep.subr.bf16.mxu1 %v9066_v40  ;;  %v9078_v16 = vpack.c.bf16 %v5138_v4, %v5137_v27  ;;  %v5151_v27 = vld [vmem:[#allocation9 + $0x370] sm:$0xff]  ;;  %v5152_v4 = vld [vmem:[#allocation9 + $0x378] sm:$0xff] }
 0x47a   : > { %8246 = vmatmul.mubr.f32.gmra.mrb[10].mxu1 %v11143_v58 }
 0x47b   : > { %8248 = vmatprep.mubr.f32.mxu1 %v11146_v11  ;;  %9069 = vmatpush3.bf16.msra.mxu1 %v9066_v40 }
 0x47c   : > { %9071 = vmatprep.subr.bf16.mxu1 %v9070_v30 }
 0x47e   : > { %8249 = vmatmul.mubr.f32.gmra.mrb[12].mxu1 %v11149_v25 }
 0x47f   : > { %8251 = vmatprep.mubr.f32.mxu1 %v11152_v50  ;;  %9073 = vmatpush3.bf16.msra.mxu1 %v9070_v30  ;;  %v11632_v30 = vld [vmem:[#allocation20_spill] sm:$0xff] }
 0x480   : > { %9075 = vmatprep.subr.bf16.mxu1 %v9074_v56 }
 0x482   : > { %8252 = vmatmul.mubr.f32.gmra.mrb[14].mxu1 %v11155_v32 }
 0x483   : > { %8254 = vmatprep.mubr.f32.mxu1 %v10806_v57  ;;  %9077 = vmatpush3.bf16.msra.mxu1 %v9074_v56  ;;  %v5139_v57 = vld [vmem:[#allocation9 + $0x310] sm:$0xff]  ;;  %v9106_v56 = vpack.c.bf16 %v5152_v4, %v5151_v27  ;;  %v5450_v4 = vld [vmem:[#allocation9 + $0x3b8] sm:$0xff] }
 0x484   : > { %9079 = vmatprep.subr.bf16.mxu1 %v9078_v16  ;;  %v5449_v27 = vld [vmem:[#allocation9 + $0x3b0] sm:$0xff] }
 0x486   : > { %8255 = vmatmul.mubr.f32.gmra.mrb[16].mxu1 %v10803_v29  ;;  %v11626_v29 = vmax.f32 %v10887_v47, 0.0 }
 0x487   : > { %8257 = vmatprep.mubr.f32.mxu1 %v10818_v39  ;;  %v11627_v39 = vmax.f32 %v10883_v43, 0.0  ;;  %v11629_v43 = vld [vmem:[#allocation17_spill] sm:$0xff] }
 0x48a   : > { %8258 = vmatmul.mubr.f32.gmra.mrb[18].mxu1 %v10814_v20  ;;  %v5140_v20 = vld [vmem:[#allocation9 + $0x318] sm:$0xff] }
 0x48b   : > { %8260 = vmatprep.mubr.f32.mxu1 %v10830_v41  ;;  %v5141_v41 = vld [vmem:[#allocation9 + $0x320] sm:$0xff] }
 0x48e   : > { %8261 = vmatmul.mubr.f32.gmra.mrb[20].mxu1 %v10826_v31  ;;  %v9082_v31 = vpack.c.bf16 %v5140_v20, %v5139_v57  ;;  %v11633_v57 = vld [vmem:[#allocation21_spill] sm:$0xff]  ;;  %v11634_v20 = vld [vmem:[#allocation22_spill] sm:$0xff] }
 0x48f   : > { %8263 = vmatprep.mubr.f32.mxu1 %v10842_v38 }
 0x492   : > { %8264 = vmatmul.mubr.f32.gmra.mrb[22].mxu1 %v10838_v37  ;;  %v5142_v37 = vld [vmem:[#allocation9 + $0x328] sm:$0xff] }
 0x493   : > { %8266 = vmatprep.mubr.f32.mxu1 %v10854_v22  ;;  %v9086_v38 = vpack.c.bf16 %v5142_v37, %v5141_v41  ;;  %v5144_v22 = vld [vmem:[#allocation9 + $0x338] sm:$0xff]  ;;  %v11639_v41 = vld [vmem:[#allocation27_spill] sm:$0xff]  ;;  %v11640_v37 = vld [vmem:[#allocation28_spill] sm:$0xff] }
 0x496   : > { %8267 = vmatmul.mubr.f32.gmra.mrb[24].mxu1 %v10850_v9  ;;  %v5143_v9 = vld [vmem:[#allocation9 + $0x330] sm:$0xff] }
 0x497   : > { %8269 = vmatprep.mubr.f32.mxu1 %v10866_v0  ;;  %v5145_v0 = vld [vmem:[#allocation9 + $0x340] sm:$0xff] }
 0x49a   : > { %8270 = vmatmul.mubr.f32.gmra.mrb[26].mxu1 %v10862_v59  ;;  %v9090_v59 = vpack.c.bf16 %v5144_v22, %v5143_v9  ;;  %v11642_v9 = vld [vmem:[#allocation30_spill] sm:$0xff]  ;;  %v11643_v22 = vld [vmem:[#allocation31_spill] sm:$0xff] }
 0x49b   : > { %8272 = vmatprep.mubr.f32.mxu1 %v10878_v45  ;;  %v11628_v45 = vld [vmem:[#allocation16_spill] sm:$0xff] }
 0x49e   : > { %8273 = vmatmul.mubr.f32.gmra.mrb[28].mxu1 %v10874_v7  ;;  %v5146_v7 = vld [vmem:[#allocation9 + $0x348] sm:$0xff] }
 0x49f   : > { %8275 = vmatprep.mubr.f32.mxu1 %v11626_v29  ;;  %v9094_v47 = vpack.c.bf16 %v5146_v7, %v5145_v0  ;;  %v5444_v29 = vld [vmem:[#allocation9 + $0x388] sm:$0xff]  ;;  %v11645_v0 = vld [vmem:[#allocation33_spill] sm:$0xff]  ;;  %v11646_v7 = vld [vmem:[#allocation34_spill] sm:$0xff] }
 0x4a2   : > { %8276 = vmatmul.mubr.f32.gmra.mrb[30].mxu1 %v11627_v39  ;;  %v11636_v39 = vld [vmem:[#allocation24_spill] sm:$0xff] }
 0x4a3   : > { %8310 = vmatprep.mubr.f32.mxu1 %v10990_v26  ;;  %v5147_v26 = vld [vmem:[#allocation9 + $0x350] sm:$0xff] }
 0x4a6   : > { %8311 = vmatmul.mubr.f32.vlgmr.msra.gmra.mrb[0].mxu1 %v10993_v63  ;;  %v5148_v63 = vld [vmem:[#allocation9 + $0x358] sm:$0xff] }
 0x4a7   : > { %8313 = vmatprep.mubr.f32.mxu1 %v10996_v49  ;;  %9081 = vmatpush3.bf16.msra.mxu1 %v9078_v16  ;;  %v11630_v49 = vld [vmem:[#allocation18_spill] sm:$0xff] }
 0x4a8   : > { %9083 = vmatprep.subr.bf16.mxu1 %v9082_v31  ;;  %v5443_v16 = vld [vmem:[#allocation9 + $0x380] sm:$0xff] }
 0x4aa   : > { %8314 = vmatmul.mubr.f32.gmra.mrb[2].mxu1 %v10999_v34  ;;  %v9098_v34 = vpack.c.bf16 %v5148_v63, %v5147_v26  ;;  %v11206_v26 = vld [vmem:[#allocation3 + $0x182] sm:$0xff]  ;;  %v11209_v63 = vld [vmem:[#allocation3 + $0x18a] sm:$0xff] }
 0x4ab   : > { %8316 = vmatprep.mubr.f32.mxu1 %v11002_v55  ;;  %9085 = vmatpush3.bf16.msra.mxu1 %v9082_v31  ;;  %v5149_v55 = vld [vmem:[#allocation9 + $0x360] sm:$0xff] }
 0x4ac   : > { %9087 = vmatprep.subr.bf16.mxu1 %v9086_v38  ;;  %v9102_v40 = vpack.c.bf16 %v5150_v17, %v5149_v55  ;;  %v11638_v31 = vld [vmem:[#allocation26_spill] sm:$0xff]  ;;  %v5448_v17 = vld [vmem:[#allocation9 + $0x3a8] sm:$0xff] }
 0x4ad   : > { %v5447_v55 = vld [vmem:[#allocation9 + $0x3a0] sm:$0xff] }
 0x4ae   : > { %8317 = vmatmul.mubr.f32.gmra.mrb[4].mxu1 %v11628_v45  ;;  %v11647_v45 = vld [vmem:[#allocation35_spill] sm:$0xff] }
 0x4af   : > { %8319 = vmatprep.mubr.f32.mxu1 %v11629_v43  ;;  %9089 = vmatpush3.bf16.msra.mxu1 %v9086_v38  ;;  %v11641_v38 = vld [vmem:[#allocation29_spill] sm:$0xff]  ;;  %v11648_v43 = vld [vmem:[#allocation36_spill] sm:$0xff] }
 0x4b0   : > { %9091 = vmatprep.subr.bf16.mxu1 %v9090_v59 }
 0x4b2   : > { %8320 = vmatmul.mubr.f32.gmra.mrb[6].mxu1 %v11630_v49  ;;  %v5445_v49 = vld [vmem:[#allocation9 + $0x390] sm:$0xff] }
 0x4b3   : > { %8322 = vmatprep.mubr.f32.mxu1 %v11631_v48  ;;  %9093 = vmatpush3.bf16.msra.mxu1 %v9090_v59  ;;  %v11644_v59 = vld [vmem:[#allocation32_spill] sm:$0xff]  ;;  %v5446_v48 = vld [vmem:[#allocation9 + $0x398] sm:$0xff] }
 0x4b4   : > { %9095 = vmatprep.subr.bf16.mxu1 %v9094_v47 }
 0x4b6   : > { %8323 = vmatmul.mubr.f32.gmra.mrb[8].mxu1 %v11017_v21  ;;  %v9110_v21 = vpack.c.bf16 %v5444_v29, %v5443_v16  ;;  %v5454_v16 = vld [vmem:[#allocation9 + $0x3d8] sm:$0xff]  ;;  %v5456_v29 = vld [vmem:[#allocation9 + $0x3e8] sm:$0xff] }
 0x4b7   : > { %8325 = vmatprep.mubr.f32.mxu1 %v11020_v53  ;;  %9097 = vmatpush3.bf16.msra.mxu1 %v9094_v47  ;;  %v11635_v53 = vld [vmem:[#allocation23_spill] sm:$0xff]  ;;  %v11649_v47 = vld [vmem:[#allocation37_spill] sm:$0xff] }
 0x4b8   : > { %9099 = vmatprep.subr.bf16.mxu1 %v9098_v34 }
 0x4ba   : > { %8326 = vmatmul.mubr.f32.gmra.mrb[10].mxu1 %v11023_v36  ;;  %v11637_v36 = vld [vmem:[#allocation25_spill] sm:$0xff] }
 0x4bb   : > { %8328 = vmatprep.mubr.f32.mxu1 %v11632_v30  ;;  %9101 = vmatpush3.bf16.msra.mxu1 %v9098_v34  ;;  %v9114_v34 = vpack.c.bf16 %v5446_v48, %v5445_v49  ;;  %v9122_v30 = vpack.c.bf16 %v5450_v4, %v5449_v27  ;;  %v5424_v48 = vld [vmem:[#allocation3 + $0xd9] sm:$0xff]  ;;  %v5434_v27 = vld [vmem:[#allocation3 + $0x151] sm:$0xff] }
 0x4bc   : > { %9103 = vmatprep.subr.bf16.mxu1 %v9102_v40  ;;  %v5435_v4 = vld [vmem:[#allocation3 + $0x159] sm:$0xff] }
 0x4be   : > { %8329 = vmatmul.mubr.f32.gmra.mrb[12].mxu1 %v11633_v57  ;;  %v5458_v57 = vld [vmem:[#allocation9 + $0x3f8] sm:$0xff] }
 0x4bf   : > { %8331 = vmatprep.mubr.f32.mxu1 %v11634_v20  ;;  %9105 = vmatpush3.bf16.msra.mxu1 %v9102_v40  ;;  %v9118_v40 = vpack.c.bf16 %v5448_v17, %v5447_v55  ;;  %v5750_v20 = vld [vmem:[#allocation9 + $0x408] sm:$0xff]  ;;  %v5428_v55 = vld [vmem:[#allocation3 + $0x109] sm:$0xff] }
 0x4c0   : > { %9107 = vmatprep.subr.bf16.mxu1 %v9106_v56  ;;  %v5431_v17 = vld [vmem:[#allocation3 + $0x129] sm:$0xff] }
 0x4c2   : > { %8332 = vmatmul.mubr.f32.gmra.mrb[14].mxu1 %v11635_v53 }
 0x4c3   : > { %8334 = vmatprep.mubr.f32.mxu1 %v11636_v39  ;;  %9109 = vmatpush3.bf16.msra.mxu1 %v9106_v56  ;;  %v5452_v56 = vld [vmem:[#allocation9 + $0x3c8] sm:$0xff] }
 0x4c4   : > { %9111 = vmatprep.subr.bf16.mxu1 %v9110_v21  ;;  %v5758_v39 = vld [vmem:[#allocation9 + $0x448] sm:$0xff] }
 0x4c6   : > { %8335 = vmatmul.mubr.f32.gmra.mrb[16].mxu1 %v11637_v36  ;;  %v11658_v36 = vld [vmem:[#allocation44_spill] sm:$0xff] }
 0x4c7   : > { %8337 = vmatprep.mubr.f32.mxu1 %v11638_v31  ;;  %v11659_v31 = vld [vmem:[#allocation45_spill] sm:$0xff] }
 0x4ca   : > { %8338 = vmatmul.mubr.f32.gmra.mrb[18].mxu1 %v11639_v41 }
 0x4cb   : > { %8340 = vmatprep.mubr.f32.mxu1 %v11640_v37  ;;  %v5759_v37 = vld [vmem:[#allocation9 + $0x450] sm:$0xff] }
 0x4ce   : > { %8341 = vmatmul.mubr.f32.gmra.mrb[20].mxu1 %v11641_v38  ;;  %v5760_v38 = vld [vmem:[#allocation9 + $0x458] sm:$0xff] }
 0x4cf   : > { %8343 = vmatprep.mubr.f32.mxu1 %v11642_v9  ;;  %v11660_v9 = vld [vmem:[#allocation46_spill] sm:$0xff] }
 0x4d2   : > { %8344 = vmatmul.mubr.f32.gmra.mrb[22].mxu1 %v11643_v22  ;;  %v11661_v22 = vld [vmem:[#allocation47_spill] sm:$0xff] }
 0x4d3   : > { %8346 = vmatprep.mubr.f32.mxu1 %v11644_v59  ;;  %v9162_v59 = vpack.c.bf16 %v5760_v38, %v5759_v37 }
 0x4d6   : > { %8347 = vmatmul.mubr.f32.gmra.mrb[24].mxu1 %v11645_v0  ;;  %v5761_v0 = vld [vmem:[#allocation9 + $0x460] sm:$0xff] }
 0x4d7   : > { %8349 = vmatprep.mubr.f32.mxu1 %v11646_v7  ;;  %v5762_v7 = vld [vmem:[#allocation9 + $0x468] sm:$0xff] }
 0x4da   : > { %8350 = vmatmul.mubr.f32.gmra.mrb[26].mxu1 %v11647_v45  ;;  %v9166_v45 = vpack.c.bf16 %v5762_v7, %v5761_v0 }
 0x4db   : > { %8352 = vmatprep.mubr.f32.mxu1 %v11648_v43  ;;  %v5763_v43 = vld [vmem:[#allocation9 + $0x470] sm:$0xff] }
 0x4de   : > { %8353 = vmatmul.mubr.f32.gmra.mrb[28].mxu1 %v11649_v47  ;;  %v5764_v47 = vld [vmem:[#allocation9 + $0x478] sm:$0xff] }
 0x4df   : > { %8355 = vmatprep.mubr.f32.mxu1 %v11206_v26  ;;  %v9170_v49 = vpack.c.bf16 %v5764_v47, %v5763_v43 }
 0x4e2   : > { %8356 = vmatmul.mubr.f32.gmra.mrb[30].mxu1 %v11209_v63 }
 0x4e3   : > { %8390 = vmatprep.mubr.f32.mxu1 %v10906_v19  ;;  %v5451_v19 = vld [vmem:[#allocation9 + $0x3c0] sm:$0xff] }
 0x4e6   : > { %8391 = vmatmul.mubr.f32.vlgmr.msra.gmra.mrb[0].mxu1 %v10909_v23  ;;  %v9126_v23 = vpack.c.bf16 %v5452_v56, %v5451_v19  ;;  %v5437_v19 = vld [vmem:[#allocation3 + $0x171] sm:$0xff]  ;;  %v5438_v56 = vld [vmem:[#allocation3 + $0x181] sm:$0xff] }
 0x4e7   : > { %8393 = vmatprep.mubr.f32.mxu1 %v10912_v10  ;;  %9113 = vmatpush3.bf16.msra.mxu1 %v9110_v21  ;;  %v5453_v10 = vld [vmem:[#allocation9 + $0x3d0] sm:$0xff]  ;;  %v11657_v21 = vld [vmem:[#allocation43_spill] sm:$0xff] }
 0x4e8   : > { %9115 = vmatprep.subr.bf16.mxu1 %v9114_v34 }
 0x4ea   : > { %8394 = vmatmul.mubr.f32.gmra.mrb[2].mxu1 %v10915_v28  ;;  %v9130_v28 = vpack.c.bf16 %v5454_v16, %v5453_v10  ;;  %v5439_v10 = vld [vmem:[#allocation3 + $0x189] sm:$0xff]  ;;  %v5441_v16 = vld [vmem:[#allocation3 + $0x1a1] sm:$0xff] }
 0x4eb   : > { %8396 = vmatprep.mubr.f32.mxu1 %v10918_v35  ;;  %9117 = vmatpush3.bf16.msra.mxu1 %v9114_v34  ;;  %v5455_v35 = vld [vmem:[#allocation9 + $0x3e0] sm:$0xff]  ;;  %v5427_v34 = vld [vmem:[#allocation3 + $0xf9] sm:$0xff] }
 0x4ec   : > { %9119 = vmatprep.subr.bf16.mxu1 %v9118_v40 }
 0x4ee   : > { %8397 = vmatmul.mubr.f32.gmra.mrb[4].mxu1 %v10921_v24  ;;  %v9134_v24 = vpack.c.bf16 %v5456_v29, %v5455_v35  ;;  %v5717_v35 = vld [vmem:[#allocation3 + $0x3a] sm:$0xff]  ;;  %v5718_v29 = vld [vmem:[#allocation3 + $0x4a] sm:$0xff] }
 0x4ef   : > { %8399 = vmatprep.mubr.f32.mxu1 %v10924_v62  ;;  %9121 = vmatpush3.bf16.msra.mxu1 %v9118_v40  ;;  %v5457_v62 = vld [vmem:[#allocation9 + $0x3f0] sm:$0xff] }
 0x4f0   : > { %9123 = vmatprep.subr.bf16.mxu1 %v9122_v30  ;;  %v5433_v40 = vld [vmem:[#allocation3 + $0x141] sm:$0xff] }
 0x4f2   : > { %8400 = vmatmul.mubr.f32.gmra.mrb[6].mxu1 %v10927_v3  ;;  %v9138_v3 = vpack.c.bf16 %v5458_v57, %v5457_v62  ;;  %v5720_v62 = vld [vmem:[#allocation3 + $0x62] sm:$0xff]  ;;  %v5721_v57 = vld [vmem:[#allocation3 + $0x6a] sm:$0xff] }
 0x4f3   : > { %8402 = vmatprep.mubr.f32.mxu1 %v10930_v8  ;;  %9125 = vmatpush3.bf16.msra.mxu1 %v9122_v30  ;;  %v5749_v8 = vld [vmem:[#allocation9 + $0x400] sm:$0xff] }
 0x4f4   : > { %9127 = vmatprep.subr.bf16.mxu1 %v9126_v23  ;;  %v5436_v30 = vld [vmem:[#allocation3 + $0x169] sm:$0xff] }
 0x4f6   : > { %8403 = vmatmul.mubr.f32.gmra.mrb[8].mxu1 %v10933_v18  ;;  %v9142_v18 = vpack.c.bf16 %v5750_v20, %v5749_v8  ;;  %v5723_v8 = vld [vmem:[#allocation3 + $0x82] sm:$0xff]  ;;  %v5724_v20 = vld [vmem:[#allocation3 + $0x92] sm:$0xff] }
 0x4f7   : > { %8405 = vmatprep.mubr.f32.mxu1 %v10936_v54  ;;  %9129 = vmatpush3.bf16.msra.mxu1 %v9126_v23  ;;  %v11650_v54 = vld [vmem:[#allocation14_spill] sm:$0xff]  ;;  %v5440_v23 = vld [vmem:[#allocation3 + $0x199] sm:$0xff] }
 0x4f8   : > { %9131 = vmatprep.subr.bf16.mxu1 %v9130_v28 }
 0x4fa   : > { %8406 = vmatmul.mubr.f32.gmra.mrb[10].mxu1 %v10939_v60  ;;  %v11651_v60 = vld [vmem:[#allocation15_spill] sm:$0xff] }
 0x4fb   : > { %8408 = vmatprep.mubr.f32.mxu1 %v10942_v61  ;;  %9133 = vmatpush3.bf16.msra.mxu1 %v9130_v28  ;;  %v11652_v61 = vld [vmem:[#allocation38_spill] sm:$0xff] }
 0x4fc   : > { %9135 = vmatprep.subr.bf16.mxu1 %v9134_v24  ;;  %v5716_v28 = vld [vmem:[#allocation3 + $0x32] sm:$0xff] }
 0x4fe   : > { %8409 = vmatmul.mubr.f32.gmra.mrb[12].mxu1 %v10945_v1  ;;  %v11653_v1 = vld [vmem:[#allocation39_spill] sm:$0xff] }
 0x4ff   : > { %8411 = vmatprep.mubr.f32.mxu1 %v10948_v2  ;;  %9137 = vmatpush3.bf16.msra.mxu1 %v9134_v24  ;;  %v9761_v2 = vld [vmem:[#allocation2] sm:$0xff] }
 0x500   : > { %9139 = vmatprep.subr.bf16.mxu1 %v9138_v3  ;;  %v5719_v24 = vld [vmem:[#allocation3 + $0x52] sm:$0xff] }
 0x502   : > { %8412 = vmatmul.mubr.f32.gmra.mrb[14].mxu1 %v10951_v5  ;;  %v5751_v5 = vld [vmem:[#allocation9 + $0x410] sm:$0xff] }
 0x503   : > { %8414 = vmatprep.mubr.f32.mxu1 %v10954_v6  ;;  %9141 = vmatpush3.bf16.msra.mxu1 %v9138_v3  ;;  %v5752_v6 = vld [vmem:[#allocation9 + $0x418] sm:$0xff]  ;;  %v5722_v3 = vld [vmem:[#allocation3 + $0x7a] sm:$0xff] }
 0x504   : > { %9143 = vmatprep.subr.bf16.mxu1 %v9142_v18 }
 0x506   : > { %8415 = vmatmul.mubr.f32.gmra.mrb[16].mxu1 %v10957_v12  ;;  %v9146_v12 = vpack.c.bf16 %v5752_v6, %v5751_v5  ;;  %v5731_v5 = vld [vmem:[#allocation3 + $0xe2] sm:$0xff]  ;;  %v5732_v6 = vld [vmem:[#allocation3 + $0xf2] sm:$0xff] }
 0x507   : > { %8417 = vmatprep.mubr.f32.mxu1 %v10960_v44  ;;  %v5753_v44 = vld [vmem:[#allocation9 + $0x420] sm:$0xff] }
 0x50a   : > { %8418 = vmatmul.mubr.f32.gmra.mrb[18].mxu1 %v10963_v52  ;;  %v5754_v52 = vld [vmem:[#allocation9 + $0x428] sm:$0xff] }
 0x50b   : > { %8420 = vmatprep.mubr.f32.mxu1 %v10966_v13  ;;  %v11654_v13 = vld [vmem:[#allocation40_spill] sm:$0xff] }
 0x50e   : > { %8421 = vmatmul.mubr.f32.gmra.mrb[20].mxu1 %v10969_v42  ;;  %v11655_v42 = vld [vmem:[#allocation41_spill] sm:$0xff] }
 0x50f   : > { %8423 = vmatprep.mubr.f32.mxu1 %v10972_v51  ;;  %v9150_v51 = vpack.c.bf16 %v5754_v52, %v5753_v44  ;;  %v5734_v44 = vld [vmem:[#allocation3 + $0x10a] sm:$0xff]  ;;  %v5735_v52 = vld [vmem:[#allocation3 + $0x112] sm:$0xff] }
 0x512   : > { %8424 = vmatmul.mubr.f32.gmra.mrb[22].mxu1 %v10975_v33  ;;  %v5755_v33 = vld [vmem:[#allocation9 + $0x430] sm:$0xff] }
 0x513   : > { %8426 = vmatprep.mubr.f32.mxu1 %v10978_v46  ;;  %v5756_v46 = vld [vmem:[#allocation9 + $0x438] sm:$0xff] }
 0x514   : > { %v9154_v53 = vpack.c.bf16 %v5756_v46, %v5755_v33  ;;  %v5739_v33 = vld [vmem:[#allocation3 + $0x142] sm:$0xff]  ;;  %v5740_v46 = vld [vmem:[#allocation3 + $0x152] sm:$0xff] }
 0x516   : > { %8427 = vmatmul.mubr.f32.gmra.mrb[24].mxu1 %v10981_v15  ;;  %v11656_v15 = vld [vmem:[#allocation42_spill] sm:$0xff] }
 0x517   : > { %8429 = vmatprep.mubr.f32.mxu1 %v11650_v54  ;;  %v5726_v54 = vld [vmem:[#allocation3 + $0xaa] sm:$0xff] }
 0x51a   : > { %8430 = vmatmul.mubr.f32.gmra.mrb[26].mxu1 %v11651_v60  ;;  %v5727_v60 = vld [vmem:[#allocation3 + $0xb2] sm:$0xff] }
 0x51b   : > { %8432 = vmatprep.mubr.f32.mxu1 %v11652_v61  ;;  %v5728_v61 = vld [vmem:[#allocation3 + $0xc2] sm:$0xff] }
 0x51e   : > { %8433 = vmatmul.mubr.f32.gmra.mrb[28].mxu1 %v11653_v1  ;;  %v5729_v1 = vld [vmem:[#allocation3 + $0xca] sm:$0xff] }
 0x51f   : > { %8435 = vmatprep.mubr.f32.mxu1 %v9761_v2 }
 0x522   : > { %8436 = vmatmul.mubr.f32.gmra.mrb[30].mxu1 %v9761_v2  ;;  %v5730_v2 = vld [vmem:[#allocation3 + $0xda] sm:$0xff] }
 0x523   : > { %8470 = vmatprep.mubr.f32.mxu1 %v11116_v14  ;;  %v5757_v14 = vld [vmem:[#allocation9 + $0x440] sm:$0xff] }
 0x524   : > { %v9158_v41 = vpack.c.bf16 %v5758_v39, %v5757_v14  ;;  %v5746_v14 = vld [vmem:[#allocation3 + $0x19a] sm:$0xff]  ;;  %v5747_v39 = vld [vmem:[#allocation3 + $0x1a2] sm:$0xff] }
 0x526   : > { %8471 = vmatmul.mubr.f32.vlgmr.msra.gmra.mrb[0].mxu1 %v11654_v13  ;;  %v5736_v13 = vld [vmem:[#allocation3 + $0x122] sm:$0xff] }
 0x527   : > { %8473 = vmatprep.mubr.f32.mxu1 %v11655_v42  ;;  %9145 = vmatpush3.bf16.msra.mxu1 %v9142_v18  ;;  %v5725_v18 = vld [vmem:[#allocation3 + $0x9a] sm:$0xff]  ;;  %v5737_v42 = vld [vmem:[#allocation3 + $0x12a] sm:$0xff] }
 0x528   : > { %9147 = vmatprep.subr.bf16.mxu1 %v9146_v12 }
 0x52a   : > { %8474 = vmatmul.mubr.f32.gmra.mrb[2].mxu1 %v11656_v15  ;;  %v5741_v15 = vld [vmem:[#allocation3 + $0x15a] sm:$0xff] }
 0x52b   : > { %8476 = vmatprep.mubr.f32.mxu1 %v11657_v21  ;;  %9149 = vmatpush3.bf16.msra.mxu1 %v9146_v12  ;;  %v5733_v12 = vld [vmem:[#allocation3 + $0xfa] sm:$0xff]  ;;  %v5742_v21 = vld [vmem:[#allocation3 + $0x16a] sm:$0xff] }
 0x52c   : > { %9151 = vmatprep.subr.bf16.mxu1 %v9150_v51 }
 0x52e   : > { %8477 = vmatmul.mubr.f32.gmra.mrb[4].mxu1 %v11658_v36  ;;  %v11261_v36 = vld [vmem:[%s11424_s5] ss:$0 sm:$0xff] }
 0x52f   : > { %8479 = vmatprep.mubr.f32.mxu1 %v11659_v31  ;;  %9153 = vmatpush3.bf16.msra.mxu1 %v9150_v51  ;;  %v5738_v51 = vld [vmem:[#allocation3 + $0x13a] sm:$0xff] }
 0x530   : > { %9155 = vmatprep.subr.bf16.mxu1 %v9154_v53 }
 0x532   : > { %8480 = vmatmul.mubr.f32.gmra.mrb[6].mxu1 %v11660_v9 }
 0x533   : > { %8482 = vmatprep.mubr.f32.mxu1 %v11661_v22  ;;  %9157 = vmatpush3.bf16.msra.mxu1 %v9154_v53  ;;  %v5743_v53 = vld [vmem:[#allocation3 + $0x172] sm:$0xff] }
 0x534   : > { %9159 = vmatprep.subr.bf16.mxu1 %v9158_v41 }
 0x536   : > { %8483 = vmatmul.mubr.f32.gmra.mrb[8].mxu1 %v11143_v58  ;;  %v5425_v58 = vld [vmem:[#allocation3 + $0xe1] sm:$0xff] }
 0x537   : > { %8485 = vmatprep.mubr.f32.mxu1 %v11146_v11  ;;  %9161 = vmatpush3.bf16.msra.mxu1 %v9158_v41  ;;  %v5426_v11 = vld [vmem:[#allocation3 + $0xf1] sm:$0xff]  ;;  %v11266_v41 = vld [vmem:[%s11425_s6] ss:$0 sm:$0xff] }
 0x538   : > { %9163 = vmatprep.subr.bf16.mxu1 %v9162_v59 }
 0x53a   : > { %8486 = vmatmul.mubr.f32.gmra.mrb[10].mxu1 %v11149_v25  ;;  %v5429_v25 = vld [vmem:[#allocation3 + $0x111] sm:$0xff] }
 0x53b   : > { %8488 = vmatprep.mubr.f32.mxu1 %v11152_v50  ;;  %9165 = vmatpush3.bf16.msra.mxu1 %v9162_v59  ;;  %v5430_v50 = vld [vmem:[#allocation3 + $0x121] sm:$0xff] }
 0x53c   : > { %9167 = vmatprep.subr.bf16.mxu1 %v9166_v45 }
 0x53e   : > { %8489 = vmatmul.mubr.f32.gmra.mrb[12].mxu1 %v11155_v32  ;;  %v5432_v32 = vld [vmem:[#allocation3 + $0x139] sm:$0xff] }
 0x53f   : > { %8491 = vmatprep.mubr.f32.mxu1 %v5424_v48  ;;  %9169 = vmatpush3.bf16.msra.mxu1 %v9166_v45 }
 0x540   : > { %9171 = vmatprep.subr.bf16.mxu1 %v9170_v49 }
 0x542   : > { %8492 = vmatmul.mubr.f32.gmra.mrb[14].mxu1 %v5425_v58 }
 0x543   : > { %8494 = vmatprep.mubr.f32.mxu1 %v5426_v11  ;;  %9173 = vmatpush3.bf16.msra.mxu1 %v9170_v49 }
 0x546   : > { %8495 = vmatmul.mubr.f32.gmra.mrb[16].mxu1 %v5427_v34 }
 0x547   : > { %8497 = vmatprep.mubr.f32.mxu1 %v5428_v55 }
 0x54a   : > { %8498 = vmatmul.mubr.f32.gmra.mrb[18].mxu1 %v5429_v25 }
 0x54b   : > { %8500 = vmatprep.mubr.f32.mxu1 %v5430_v50 }
 0x54e   : > { %8501 = vmatmul.mubr.f32.gmra.mrb[20].mxu1 %v5431_v17 }
 0x54f   : > { %8503 = vmatprep.mubr.f32.mxu1 %v5432_v32 }
 0x552   : > { %8504 = vmatmul.mubr.f32.gmra.mrb[22].mxu1 %v5433_v40 }
 0x553   : > { %8506 = vmatprep.mubr.f32.mxu1 %v5434_v27 }
 0x556   : > { %8507 = vmatmul.mubr.f32.gmra.mrb[24].mxu1 %v5435_v4 }
 0x557   : > { %8509 = vmatprep.mubr.f32.mxu1 %v5436_v30 }
 0x55a   : > { %8510 = vmatmul.mubr.f32.gmra.mrb[26].mxu1 %v5437_v19 }
 0x55b   : > { %8512 = vmatprep.mubr.f32.mxu1 %v5438_v56 }
 0x55e   : > { %8513 = vmatmul.mubr.f32.gmra.mrb[28].mxu1 %v5439_v10 }
 0x55f   : > { %8515 = vmatprep.mubr.f32.mxu1 %v5440_v23 }
 0x562   : > { %8516 = vmatmul.mubr.f32.gmra.mrb[30].mxu1 %v5441_v16 }
 0x563   : > { %8550 = vmatprep.mubr.f32.mxu1 %v5716_v28 }
 0x566   : > { %8551 = vmatmul.mubr.f32.vlgmr.msra.gmra.mrb[0].mxu1 %v5717_v35 }
 0x567   : > { %8553 = vmatprep.mubr.f32.mxu1 %v5718_v29 }
 0x56a   : > { %8554 = vmatmul.mubr.f32.gmra.mrb[2].mxu1 %v5719_v24 }
 0x56b   : > { %8556 = vmatprep.mubr.f32.mxu1 %v5720_v62 }
 0x56e   : > { %8557 = vmatmul.mubr.f32.gmra.mrb[4].mxu1 %v5721_v57 }
 0x56f   : > { %8559 = vmatprep.mubr.f32.mxu1 %v5722_v3 }
 0x572   : > { %8560 = vmatmul.mubr.f32.gmra.mrb[6].mxu1 %v5723_v8 }
 0x573   : > { %8562 = vmatprep.mubr.f32.mxu1 %v5724_v20 }
 0x576   : > { %8563 = vmatmul.mubr.f32.gmra.mrb[8].mxu1 %v5725_v18 }
 0x577   : > { %8565 = vmatprep.mubr.f32.mxu1 %v5726_v54 }
 0x57a   : > { %8566 = vmatmul.mubr.f32.gmra.mrb[10].mxu1 %v5727_v60 }
 0x57b   : > { %8568 = vmatprep.mubr.f32.mxu1 %v5728_v61 }
 0x57e   : > { %8569 = vmatmul.mubr.f32.gmra.mrb[12].mxu1 %v5729_v1 }
 0x57f   : > { %8571 = vmatprep.mubr.f32.mxu1 %v5730_v2 }
 0x582   : > { %8572 = vmatmul.mubr.f32.gmra.mrb[14].mxu1 %v5731_v5 }
 0x583   : > { %8574 = vmatprep.mubr.f32.mxu1 %v5732_v6 }
 0x586   : > { %8575 = vmatmul.mubr.f32.gmra.mrb[16].mxu1 %v5733_v12 }
 0x587   : > { %8577 = vmatprep.mubr.f32.mxu1 %v5734_v44 }
 0x58a   : > { %8578 = vmatmul.mubr.f32.gmra.mrb[18].mxu1 %v5735_v52 }
 0x58b   : > { %8580 = vmatprep.mubr.f32.mxu1 %v5736_v13 }
 0x58e   : > { %8581 = vmatmul.mubr.f32.gmra.mrb[20].mxu1 %v5737_v42 }
 0x58f   : > { %8583 = vmatprep.mubr.f32.mxu1 %v5738_v51 }
 0x592   : > { %8584 = vmatmul.mubr.f32.gmra.mrb[22].mxu1 %v5739_v33 }
 0x593   : > { %8586 = vmatprep.mubr.f32.mxu1 %v5740_v46 }
 0x596   : > { %8587 = vmatmul.mubr.f32.gmra.mrb[24].mxu1 %v5741_v15 }
 0x597   : > { %8589 = vmatprep.mubr.f32.mxu1 %v5742_v21 }
 0x59a   : > { %8590 = vmatmul.mubr.f32.gmra.mrb[26].mxu1 %v5743_v53 }
 0x59b   : > { %8592 = vmatprep.mubr.f32.mxu1 %v11206_v26 }
 0x59e   : > { %8593 = vmatmul.mubr.f32.gmra.mrb[28].mxu1 %v11209_v63 }
 0x59f   : > { %8595 = vmatprep.mubr.f32.mxu1 %v5746_v14 }
 0x5a2   : > { %8596 = vmatmul.mubr.f32.gmra.mrb[30].mxu1 %v5747_v39 }
 0x639   : > { %v8552_v31 = vpop.f32.mrb[0].mxu1 }
 0x63a   : > { %v6030_v26 = vmul.f32 %v8552_v31, %v11261_v36  ;;  %v5831_v37 = vpop.f32.mrb[1].mxu1 }
 0x63b   : > { %v6029_v63 = vmul.f32 %v11261_v36, %v5831_v37 }
 0x63c   : > { %v6069_v38 = vadd.f32 %v11266_v41, %v6030_v26 }
 0x63d   : > { %v6068_v9 = vadd.f32 %v11266_v41, %v6029_v63  ;;  %v8555_v22 = vpop.f32.mrb[2].mxu1 }
 0x63e   : > { %v6101_v59 = vmax.f32 %v6069_v38, 0.0  ;;  %v6032_v0 = vmul.f32 %v8555_v22, %v11261_v36  ;;  %v5841_v7 = vpop.f32.mrb[3].mxu1 }
 0x63f   : > { %v6100_v45 = vmax.f32 %v6068_v9, 0.0  ;;  %v6031_v43 = vmul.f32 %v11261_v36, %v5841_v7 }
 0x640   : > { %6133 = vst [vmem:[%s11276_s21 + $0x8] sm:$0xff] %v6101_v59  ;;  %v6071_v47 = vadd.f32 %v11266_v41, %v6032_v0 }
 0x641   : > { %6132 = vst [vmem:[%s11276_s21] sm:$0xff] %v6100_v45  ;;  %v6070_v49 = vadd.f32 %v11266_v41, %v6031_v43  ;;  %v8558_v48 = vpop.f32.mrb[4].mxu1 }
 0x642   : > { %v6103_v58 = vmax.f32 %v6071_v47, 0.0  ;;  %v6034_v11 = vmul.f32 %v8558_v48, %v11261_v36  ;;  %v5851_v34 = vpop.f32.mrb[5].mxu1 }
 0x643   : > { %v6102_v55 = vmax.f32 %v6070_v49, 0.0  ;;  %v6033_v25 = vmul.f32 %v11261_v36, %v5851_v34 }
 0x644   : > { %6135 = vst [vmem:[%s11276_s21 + $0x18] sm:$0xff] %v6103_v58  ;;  %v6073_v50 = vadd.f32 %v11266_v41, %v6034_v11 }
 0x645   : > { %6134 = vst [vmem:[%s11276_s21 + $0x10] sm:$0xff] %v6102_v55  ;;  %v6072_v17 = vadd.f32 %v11266_v41, %v6033_v25  ;;  %v8561_v32 = vpop.f32.mrb[6].mxu1 }
 0x646   : > { %v6105_v40 = vmax.f32 %v6073_v50, 0.0  ;;  %v6036_v27 = vmul.f32 %v8561_v32, %v11261_v36  ;;  %v5861_v4 = vpop.f32.mrb[7].mxu1 }
 0x647   : > { %v6104_v30 = vmax.f32 %v6072_v17, 0.0  ;;  %v6035_v19 = vmul.f32 %v11261_v36, %v5861_v4 }
 0x648   : > { %6137 = vst [vmem:[%s11276_s21 + $0x28] sm:$0xff] %v6105_v40  ;;  %v6075_v56 = vadd.f32 %v11266_v41, %v6036_v27 }
 0x649   : > { %6136 = vst [vmem:[%s11276_s21 + $0x20] sm:$0xff] %v6104_v30  ;;  %v6074_v23 = vadd.f32 %v11266_v41, %v6035_v19  ;;  %v8564_v10 = vpop.f32.mrb[8].mxu1 }
 0x64a   : > { %v6107_v16 = vmax.f32 %v6075_v56, 0.0  ;;  %v6038_v28 = vmul.f32 %v8564_v10, %v11261_v36  ;;  %v5871_v35 = vpop.f32.mrb[9].mxu1 }
 0x64b   : > { %v6106_v29 = vmax.f32 %v6074_v23, 0.0  ;;  %v6037_v24 = vmul.f32 %v11261_v36, %v5871_v35 }
 0x64c   : > { %6139 = vst [vmem:[%s11276_s21 + $0x38] sm:$0xff] %v6107_v16  ;;  %v6077_v62 = vadd.f32 %v11266_v41, %v6038_v28 }
 0x64d   : > { %6138 = vst [vmem:[%s11276_s21 + $0x30] sm:$0xff] %v6106_v29  ;;  %v6076_v57 = vadd.f32 %v11266_v41, %v6037_v24  ;;  %v8567_v3 = vpop.f32.mrb[10].mxu1 }
 0x64e   : > { %v6109_v8 = vmax.f32 %v6077_v62, 0.0  ;;  %v6040_v20 = vmul.f32 %v8567_v3, %v11261_v36  ;;  %v5881_v18 = vpop.f32.mrb[11].mxu1 }
 0x64f   : > { %v6108_v54 = vmax.f32 %v6076_v57, 0.0  ;;  %v6039_v60 = vmul.f32 %v11261_v36, %v5881_v18 }
 0x650   : > { %6141 = vst [vmem:[%s11276_s21 + $0x48] sm:$0xff] %v6109_v8  ;;  %v6079_v61 = vadd.f32 %v11266_v41, %v6040_v20 }
 0x651   : > { %6140 = vst [vmem:[%s11276_s21 + $0x40] sm:$0xff] %v6108_v54  ;;  %v6078_v1 = vadd.f32 %v11266_v41, %v6039_v60  ;;  %v8570_v2 = vpop.f32.mrb[12].mxu1 }
 0x652   : > { %v6111_v5 = vmax.f32 %v6079_v61, 0.0  ;;  %v6042_v6 = vmul.f32 %v8570_v2, %v11261_v36  ;;  %v5891_v12 = vpop.f32.mrb[13].mxu1 }
 0x653   : > { %v6110_v44 = vmax.f32 %v6078_v1, 0.0  ;;  %v6041_v52 = vmul.f32 %v11261_v36, %v5891_v12 }
 0x654   : > { %6143 = vst [vmem:[%s11276_s21 + $0x58] sm:$0xff] %v6111_v5  ;;  %v6081_v13 = vadd.f32 %v11266_v41, %v6042_v6 }
 0x655   : > { %6142 = vst [vmem:[%s11276_s21 + $0x50] sm:$0xff] %v6110_v44  ;;  %v6080_v42 = vadd.f32 %v11266_v41, %v6041_v52  ;;  %v8573_v51 = vpop.f32.mrb[14].mxu1 }
 0x656   : > { %v6113_v33 = vmax.f32 %v6081_v13, 0.0  ;;  %v6044_v46 = vmul.f32 %v8573_v51, %v11261_v36  ;;  %v5901_v15 = vpop.f32.mrb[15].mxu1 }
 0x657   : > { %v6112_v21 = vmax.f32 %v6080_v42, 0.0  ;;  %v6043_v53 = vmul.f32 %v11261_v36, %v5901_v15 }
 0x658   : > { %6145 = vst [vmem:[%s11276_s21 + $0x68] sm:$0xff] %v6113_v33  ;;  %v6083_v14 = vadd.f32 %v11266_v41, %v6044_v46 }
 0x659   : > { %6144 = vst [vmem:[%s11276_s21 + $0x60] sm:$0xff] %v6112_v21  ;;  %v6082_v39 = vadd.f32 %v11266_v41, %v6043_v53  ;;  %v8576_v31 = vpop.f32.mrb[16].mxu1 }
 0x65a   : > { %v6115_v26 = vmax.f32 %v6083_v14, 0.0  ;;  %v6046_v37 = vmul.f32 %v8576_v31, %v11261_v36  ;;  %v5911_v63 = vpop.f32.mrb[17].mxu1 }
 0x65b   : > { %v6114_v38 = vmax.f32 %v6082_v39, 0.0  ;;  %v6045_v9 = vmul.f32 %v11261_v36, %v5911_v63 }
 0x65c   : > { %6147 = vst [vmem:[%s11276_s21 + $0x78] sm:$0xff] %v6115_v26  ;;  %v6085_v22 = vadd.f32 %v11266_v41, %v6046_v37 }
 0x65d   : > { %6146 = vst [vmem:[%s11276_s21 + $0x70] sm:$0xff] %v6114_v38  ;;  %v6084_v59 = vadd.f32 %v11266_v41, %v6045_v9  ;;  %v8579_v0 = vpop.f32.mrb[18].mxu1 }
 0x65e   : > { %v6117_v7 = vmax.f32 %v6085_v22, 0.0  ;;  %v6048_v45 = vmul.f32 %v8579_v0, %v11261_v36  ;;  %v5921_v43 = vpop.f32.mrb[19].mxu1 }
 0x65f   : > { %v6116_v47 = vmax.f32 %v6084_v59, 0.0  ;;  %v6047_v49 = vmul.f32 %v11261_v36, %v5921_v43 }
 0x660   : > { %6149 = vst [vmem:[%s11276_s21 + $0x88] sm:$0xff] %v6117_v7  ;;  %v6087_v48 = vadd.f32 %v11266_v41, %v6048_v45 }
 0x661   : > { %6148 = vst [vmem:[%s11276_s21 + $0x80] sm:$0xff] %v6116_v47  ;;  %v6086_v58 = vadd.f32 %v11266_v41, %v6047_v49  ;;  %v8582_v11 = vpop.f32.mrb[20].mxu1 }
 0x662   : > { %v6119_v34 = vmax.f32 %v6087_v48, 0.0  ;;  %v6050_v55 = vmul.f32 %v8582_v11, %v11261_v36  ;;  %v5931_v25 = vpop.f32.mrb[21].mxu1 }
 0x663   : > { %v6118_v50 = vmax.f32 %v6086_v58, 0.0  ;;  %v6049_v17 = vmul.f32 %v11261_v36, %v5931_v25 }
 0x664   : > { %6151 = vst [vmem:[%s11276_s21 + $0x98] sm:$0xff] %v6119_v34  ;;  %v6089_v32 = vadd.f32 %v11266_v41, %v6050_v55 }
 0x665   : > { %6150 = vst [vmem:[%s11276_s21 + $0x90] sm:$0xff] %v6118_v50  ;;  %v6088_v40 = vadd.f32 %v11266_v41, %v6049_v17  ;;  %v8585_v27 = vpop.f32.mrb[22].mxu1 }
 0x666   : > { %v6121_v4 = vmax.f32 %v6089_v32, 0.0  ;;  %v6052_v30 = vmul.f32 %v8585_v27, %v11261_v36  ;;  %v5941_v19 = vpop.f32.mrb[23].mxu1 }
 0x667   : > { %v6120_v56 = vmax.f32 %v6088_v40, 0.0  ;;  %v6051_v23 = vmul.f32 %v11261_v36, %v5941_v19 }
 0x668   : > { %6153 = vst [vmem:[%s11276_s21 + $0xa8] sm:$0xff] %v6121_v4  ;;  %v6091_v10 = vadd.f32 %v11266_v41, %v6052_v30 }
 0x669   : > { %6152 = vst [vmem:[%s11276_s21 + $0xa0] sm:$0xff] %v6120_v56  ;;  %v6090_v16 = vadd.f32 %v11266_v41, %v6051_v23  ;;  %v8588_v28 = vpop.f32.mrb[24].mxu1 }
 0x66a   : > { %v6123_v35 = vmax.f32 %v6091_v10, 0.0  ;;  %v6054_v29 = vmul.f32 %v8588_v28, %v11261_v36  ;;  %v5951_v24 = vpop.f32.mrb[25].mxu1 }
 0x66b   : > { %v6122_v62 = vmax.f32 %v6090_v16, 0.0  ;;  %v6053_v57 = vmul.f32 %v11261_v36, %v5951_v24 }
 0x66c   : > { %6155 = vst [vmem:[%s11276_s21 + $0xb8] sm:$0xff] %v6123_v35  ;;  %v6093_v3 = vadd.f32 %v11266_v41, %v6054_v29 }
 0x66d   : > { %6154 = vst [vmem:[%s11276_s21 + $0xb0] sm:$0xff] %v6122_v62  ;;  %v6092_v8 = vadd.f32 %v11266_v41, %v6053_v57  ;;  %v8591_v20 = vpop.f32.mrb[26].mxu1 }
 0x66e   : > { %v6125_v18 = vmax.f32 %v6093_v3, 0.0  ;;  %v6056_v54 = vmul.f32 %v8591_v20, %v11261_v36  ;;  %v5961_v60 = vpop.f32.mrb[27].mxu1 }
 0x66f   : > { %v6124_v61 = vmax.f32 %v6092_v8, 0.0  ;;  %v6055_v1 = vmul.f32 %v11261_v36, %v5961_v60 }
 0x670   : > { %6157 = vst [vmem:[%s11276_s21 + $0xc8] sm:$0xff] %v6125_v18  ;;  %v6095_v2 = vadd.f32 %v11266_v41, %v6056_v54 }
 0x671   : > { %6156 = vst [vmem:[%s11276_s21 + $0xc0] sm:$0xff] %v6124_v61  ;;  %v6094_v5 = vadd.f32 %v11266_v41, %v6055_v1  ;;  %v8594_v6 = vpop.f32.mrb[28].mxu1 }
 0x672   : > { %v6127_v12 = vmax.f32 %v6095_v2, 0.0  ;;  %v6058_v44 = vmul.f32 %v8594_v6, %v11261_v36  ;;  %v5971_v52 = vpop.f32.mrb[29].mxu1 }
 0x673   : > { %v6126_v13 = vmax.f32 %v6094_v5, 0.0  ;;  %v6057_v42 = vmul.f32 %v11261_v36, %v5971_v52 }
 0x674   : > { %6159 = vst [vmem:[%s11276_s21 + $0xd8] sm:$0xff] %v6127_v12  ;;  %v6097_v51 = vadd.f32 %v11266_v41, %v6058_v44 }
 0x675   : > { %6158 = vst [vmem:[%s11276_s21 + $0xd0] sm:$0xff] %v6126_v13  ;;  %v6096_v33 = vadd.f32 %v11266_v41, %v6057_v42  ;;  %v8597_v46 = vpop.f32.mrb[30].mxu1 }
 0x676   : > { %v6129_v15 = vmax.f32 %v6097_v51, 0.0  ;;  %v6060_v21 = vmul.f32 %v8597_v46, %v11261_v36  ;;  %v5981_v53 = vpop.f32.mrb[31].mxu1 }
 0x677   : > { %v6128_v14 = vmax.f32 %v6096_v33, 0.0  ;;  %v6059_v39 = vmul.f32 %v11261_v36, %v5981_v53 }
 0x678   : > { %6161 = vst [vmem:[%s11276_s21 + $0xe8] sm:$0xff] %v6129_v15  ;;  %v6099_v31 = vadd.f32 %v11266_v41, %v6060_v21 }
 0x679   : > { %6160 = vst [vmem:[%s11276_s21 + $0xe0] sm:$0xff] %v6128_v14  ;;  %v6098_v26 = vadd.f32 %v11266_v41, %v6059_v39 }
 0x67a   : > { %v6131_v37 = vmax.f32 %v6099_v31, 0.0 }
 0x67b   : > { %v6130_v36 = vmax.f32 %v6098_v26, 0.0 }
 0x67c   : > { %6163 = vst [vmem:[%s11276_s21 + $0xf8] sm:$0xff] %v6131_v37 }
 0x67d   : > { %6162 = vst [vmem:[%s11276_s21 + $0xf0] sm:$0xff] %v6130_v36 }
 0x67e   : > { %9861 = shalt.err (!%p9858_p1)
}
 0x67f   : > { %s9862_s15 = scalar_lea.hbm %s11371_s30, 4096  ;;  %s9866_s21 = scalar_lea.hbm %s11426_s7, 8192 }
 0x680   : > { %p9863_p13 = scmp.ne.s32.totalorder %s11371_s30, %s9862_s15  ;;  %p9867_p4 = scmp.lt.u32.totalorder %s11371_s30, %s11426_s7 }
 0x681   : > { %p9868_p5 = scmp.lt.u32.totalorder %s9866_s21, %s9862_s15  ;;  %p9870_p11 = scmp.lt.u32.totalorder %s9862_s15, %s11371_s30 }
 0x682   : > { %p9864_p6 = pnand %p9863_p13, %p11662_p0 }
 0x683   : > { %p9869_p8 = por %p9868_p5, %p9867_p4 }
 0x684   : > { %p9865_p10 = pneg %p9864_p6 }
 0x685   : > { %p9871_p2 = por %p9870_p11, %p9869_p8 }
 0x687   : > { %p9872_p3 = pnand %p9871_p2, %p9865_p10 }
 0x689   : > { %9875 = shalt.err (!%p9872_p3)
}
 0x68a   : > { %s9927_s13 = smov 128   ;;  %s9928_s9 = smov 8  }
 0x68b   : > { %9696 = dma.vmem_to_hbm [thread:$0]  (%p11662_p0), %s11373_s22, 4096, %s11371_s30, %s6165_s28, %s9927_s13, %s9927_s13, %s9928_s9  }
 0x68c PF: > { %s6193_s29 = sand.u32 1, %s9906_s24   ;;  %p11663_p7 = scmp.ne.s32.totalorder %s11506_s8, 0 }
 0x68d   : > { %p11664_p9 = scmp.ge.s32.totalorder %s9918_s27, 2  ;;  %s6194_s11 = scalar_lea.sflag [#allocation6], %s6193_s29 }
 0x68f   : > { %p9710_p12 = pnand %p11664_p9, %p11663_p7 }
 0x691   : > { %9901 = dma.done.wait (!%p9710_p12), %s6194_s11, 4096  }
 0x692   : > { %9903 = vsyncadd (!%p9710_p12), %s6194_s11, 4294963200  ;;  %p21_p1 = scmp.ge.s32.totalorder %s10085_s12, 4   ;;  %s11665_s24 = smov %s9910_s25 }
 0x693   : > { %s11666_s25 = smov %s9914_s26  ;;  %s11667_s26 = smov %s10101_s17 }
 0x694   : > { %s11668_s27 = smov %s10085_s12  ;;  %23 = sbr.rel (!%p21_p1) target bundleno = 6 (0x6), region = 121 }
 0x69b   :  { %6199 = vsyncpa [#allocation5], 1 }
 0x69c   :  { %6201 = vsyncpa [#allocation5 + $0x1], 1 }
 0x69d   :  { %6202 = vsyncpa [#allocation8], 1 }
 0x69e   :  { %6203 = vsyncpa [#allocation6], 1 }
 0x69f   :  { %6205 = vsyncpa [#allocation6 + $0x1], 1 }

</bundles_post_ra>
